<compile_context>
chip_gen: v7x
topology: tpu7x:2x2x1
jax: 0.10.0
libtpu: 0.0.40
codegen_flags: <defaults>
</compile_context>

<pallas_src>
import math

import jax
import jax.numpy as jnp
from jax import lax
from jax.experimental import pallas as pl
from jax.experimental.pallas import tpu as pltpu

EPS = 1e-5
P_TOTAL = 2304          # 48*48 conv1 output positions
P_BLOCK = 576           # patch rows per grid step (2304 = 4 * 576, 576 % 8 == 0)
N_STEPS = P_TOTAL // P_BLOCK
F1 = 300                # conv1 fan-in = 3*10*10


# ---------------------------------------------------------------------------
# Fused kernel: conv1 (tiled over the grid) -> IN -> ReLU -> conv2 -> IN -> ReLU
#               -> conv3 -> IN -> ReLU -> Linear   (tail under pl.when on last step)
# ---------------------------------------------------------------------------
def fused_net_kernel(p_ref, w1_ref, b1_ref, w2_ref, b2_ref, w3_ref, b3_ref,
                     wl_ref, bl_ref, o_ref, y1_ref, s1_ref, q1_ref):
    # p_ref : (576, 300)  patch rows (kh2,kw2,kh3,kw3,ho3,wo3), cols (c,kh1,kw1)
    # w1_ref: (300, 10)                       b1_ref: (1, 10)
    # w2_ref: (160, 20) rows=(kh2*4+kw2)*10+c1; b2_ref: (1, 20)
    # w3_ref: (180, 10) rows=(kh3*3+kw3)*20+c2; b3_ref: (1, 10)
    # wl_ref: (4, 16, 10) = (out, ho3*4+wo3, c3); bl_ref: (4, 1)
    # o_ref : (4, 1)
    # y1_ref: (2304, 10) conv1 scratch; s1_ref/q1_ref: (1, 10) sum / sum-of-squares
    i = pl.program_id(0)

    @pl.when(i == 0)
    def _init():
        s1_ref[...] = jnp.zeros_like(s1_ref)
        q1_ref[...] = jnp.zeros_like(q1_ref)

    # ---- conv1 on this block: (576, 300) @ (300, 10) -------------------------
    z = jnp.dot(p_ref[...], w1_ref[...], preferred_element_type=jnp.float32)
    z = z + b1_ref[...]                                   # (576, 10)
    s1_ref[...] += jnp.sum(z, axis=0, keepdims=True)
    q1_ref[...] += jnp.sum(z * z, axis=0, keepdims=True)
    off = pl.multiple_of(i * P_BLOCK, P_BLOCK)
    y1_ref[pl.ds(off, P_BLOCK), :] = z

    # ---- rest of the network, once all of y1 is resident ---------------------
    @pl.when(i == N_STEPS - 1)
    def _finalize():
        inv_n = 1.0 / float(P_TOTAL)
        mean1 = s1_ref[...] * inv_n                       # (1, 10)
        var1 = q1_ref[...] * inv_n - mean1 * mean1        # one-pass variance
        inv1 = lax.rsqrt(var1 + EPS)

        # conv2: 16 row-blocks (one per (kh2,kw2)), 4 parallel accumulators.
        acc2 = [jnp.zeros((144, 20), jnp.float32) for _ in range(4)]
        for q in range(16):
            blk = y1_ref[q * 144:(q + 1) * 144, :]        # (144, 10)
            blk = jnp.maximum((blk - mean1) * inv1, 0.0)  # IN1 + ReLU
            acc2[q % 4] += jnp.dot(blk, w2_ref[q * 10:(q + 1) * 10, :],
                                   preferred_element_type=jnp.float32)
        y2 = (acc2[0] + acc2[1]) + (acc2[2] + acc2[3]) + b2_ref[...]   # (144, 20)
        mean2 = jnp.mean(y2, axis=0, keepdims=True)
        var2 = jnp.mean((y2 - mean2) ** 2, axis=0, keepdims=True)
        y2n = jnp.maximum((y2 - mean2) * lax.rsqrt(var2 + EPS), 0.0)

        # conv3: 9 row-blocks (one per (kh3,kw3)), 3 parallel accumulators.
        acc3 = [jnp.zeros((16, 10), jnp.float32) for _ in range(3)]
        for q in range(9):
            acc3[q % 3] += jnp.dot(y2n[q * 16:(q + 1) * 16, :],
                                   w3_ref[q * 20:(q + 1) * 20, :],
                                   preferred_element_type=jnp.float32)
        y3 = acc3[0] + acc3[1] + acc3[2] + b3_ref[...]                 # (16, 10)
        mean3 = jnp.mean(y3, axis=0, keepdims=True)
        var3 = jnp.mean((y3 - mean3) ** 2, axis=0, keepdims=True)
        y3n = jnp.maximum((y3 - mean3) * lax.rsqrt(var3 + EPS), 0.0)   # (16, 10)

        # Linear(160, 4) on the VPU: out[o] = bl[o] + sum_{s,c3} wl[o,s,c3]*y3n[s,c3]
        prod = wl_ref[...] * y3n[None, :, :]                           # (4, 16, 10)
        t = jnp.sum(prod, axis=2)                                      # (4, 16)
        o_ref[...] = jnp.sum(t, axis=1, keepdims=True) + bl_ref[...]   # (4, 1)


# ---------------------------------------------------------------------------
# Wrapper: cheap layout glue + single pallas_call
# ---------------------------------------------------------------------------
def _const_spec(shape):
    return pl.BlockSpec(shape, lambda i: (0,) * len(shape))


def auto_player_forward(x, params):
    assert x.shape == (1, 3, 480, 480), x.shape   # factorization below is hard-coded

    # Patch matrix, P-major: rows = (kh2,kw2,kh3,kw3,ho3,wo3), cols = (c,kh1,kw1).
    # H = 480 factors as (ho3=4, kh3=3, kh2=4, kh1=10); same for W.  kw1 is the
    # destination-minor axis -> the relayout copies 40-byte contiguous runs of x.
    xs = x.reshape(3, 4, 3, 4, 10, 4, 3, 4, 10)
    # (c,ho3,kh3,kh2,kh1,wo3,kw3,kw2,kw1) -> (kh2,kw2,kh3,kw3,ho3,wo3,c,kh1,kw1)
    p1t = xs.transpose(3, 7, 2, 6, 1, 5, 0, 4, 8).reshape(P_TOTAL, F1)

    w1t = params["w1"].reshape(10, F1).T                        # (300, 10)
    b1r = params["b1"].reshape(1, 10)
    w2f = params["w2"].transpose(2, 3, 1, 0).reshape(160, 20)   # rows=(kh2,kw2,c1)
    b2r = params["b2"].reshape(1, 20)
    w3f = params["w3"].transpose(2, 3, 1, 0).reshape(180, 10)   # rows=(kh3,kw3,c2)
    b3r = params["b3"].reshape(1, 10)
    wlr = params["wl"].reshape(4, 10, 16).transpose(0, 2, 1)    # (4, 16, 10)=(o,s,c3)
    blr = params["bl"].reshape(4, 1)

    weight_shapes = [(F1, 10), (1, 10), (160, 20), (1, 20),
                     (180, 10), (1, 10), (4, 16, 10), (4, 1)]
    flops = 2 * (P_TOTAL * F1 * 10 + 144 * 160 * 20 + 16 * 180 * 10 + 4 * 160)
    bytes_accessed = 4 * (P_TOTAL * F1
                          + sum(math.prod(s) for s in weight_shapes) + 4)

    out = pl.pallas_call(
        fused_net_kernel,
        out_shape=jax.ShapeDtypeStruct((4, 1), jnp.float32),
        grid=(N_STEPS,),
        in_specs=[pl.BlockSpec((P_BLOCK, F1), lambda i: (i, 0))]
                 + [_const_spec(s) for s in weight_shapes],
        out_specs=_const_spec((4, 1)),
        scratch_shapes=[pltpu.VMEM((P_TOTAL, 10), jnp.float32),   # conv1 output
                        pltpu.VMEM((1, 10), jnp.float32),         # running sum
                        pltpu.VMEM((1, 10), jnp.float32)],        # running sum of sq
        compiler_params=pltpu.CompilerParams(
            dimension_semantics=("arbitrary",),
            vmem_limit_bytes=32 * 1024 * 1024),
        cost_estimate=pl.CostEstimate(
            flops=flops, transcendentals=40, bytes_accessed=bytes_accessed),
    )(p1t, w1t, b1r, w2f, b2r, w3f, b3r, wlr, blr)
    return out.reshape(1, 4)


# ---------------------------------------------------------------------------
# Pure-JAX reference (lax conv) for verification
# ---------------------------------------------------------------------------
def _ref_conv_in_relu(x, w, b, stride):
    y = lax.conv_general_dilated(
        x, w, window_strides=(stride, stride), padding="VALID",
        dimension_numbers=("NCHW", "OIHW", "NCHW"))
    y = y + b.reshape(1, -1, 1, 1)
    mean = jnp.mean(y, axis=(2, 3), keepdims=True)
    var = jnp.mean((y - mean) ** 2, axis=(2, 3), keepdims=True)
    y = (y - mean) * lax.rsqrt(var + EPS)
    return jnp.maximum(y, 0.0)


def auto_player_reference(x, params):
    x = _ref_conv_in_relu(x, params["w1"], params["b1"], 10)
    x = _ref_conv_in_relu(x, params["w2"], params["b2"], 4)
    x = _ref_conv_in_relu(x, params["w3"], params["b3"], 3)
    flat = x.reshape(1, -1)
    return flat @ params["wl"].T + params["bl"].reshape(1, -1)


# ---------------------------------------------------------------------------
# Deterministic parameter init (PyTorch-default uniform bounds)
# ---------------------------------------------------------------------------
def init_params(key):
    def u(k, shape, fan_in):
        bound = 1.0 / jnp.sqrt(fan_in)
        return jax.random.uniform(k, shape, jnp.float32, -bound, bound)

    ks = jax.random.split(key, 8)
    return {
        "w1": u(ks[0], (10, 3, 10, 10), 3 * 10 * 10),
        "b1": u(ks[1], (10,), 3 * 10 * 10),
        "w2": u(ks[2], (20, 10, 4, 4), 10 * 4 * 4),
        "b2": u(ks[3], (20,), 10 * 4 * 4),
        "w3": u(ks[4], (10, 20, 3, 3), 20 * 3 * 3),
        "b3": u(ks[5], (10,), 20 * 3 * 3),
        "wl": u(ks[6], (4, 160), 160),   # torch Linear weight layout (out, in)
        "bl": u(ks[7], (4,), 160),
    }


if __name__ == "__main__":
    key = jax.random.PRNGKey(0)
    pkey, xkey = jax.random.split(key)
    params = init_params(pkey)

    # Forward pass implies input (1, 3, 480, 480):
    # 480 -conv1(k10,s10)-> 48 -conv2(k4,s4)-> 12 -conv3(k3,s3)-> 4 ; 10*4*4=160
    x = jax.random.normal(xkey, (1, 3, 480, 480), dtype=jnp.float32)

    out = jax.block_until_ready(jax.jit(auto_player_forward)(x, params))
    ref = jax.block_until_ready(jax.jit(auto_player_reference)(x, params))

    assert out.shape == (1, 4), out.shape
    assert jnp.allclose(out, ref, atol=1e-3, rtol=1e-3), (out, ref)

    print("KERNEL_OK")
</pallas_src>

<mosaic_0001>
module attributes {stable_mosaic.version = 11 : i64} {
  func.func @fused_net_kernel(%arg0: i32, %arg1: memref<576x300xf32, #tpu.memory_space<vmem>>, %arg2: memref<300x10xf32, #tpu.memory_space<vmem>>, %arg3: memref<1x10xf32, #tpu.memory_space<vmem>>, %arg4: memref<160x20xf32, #tpu.memory_space<vmem>>, %arg5: memref<1x20xf32, #tpu.memory_space<vmem>>, %arg6: memref<180x10xf32, #tpu.memory_space<vmem>>, %arg7: memref<1x10xf32, #tpu.memory_space<vmem>>, %arg8: memref<4x16x10xf32, #tpu.memory_space<vmem>>, %arg9: memref<4x1xf32, #tpu.memory_space<vmem>>, %arg10: memref<4x1xf32, #tpu.memory_space<vmem>>, %arg11: memref<2304x10xf32, #tpu.memory_space<vmem>>, %arg12: memref<1x10xf32, #tpu.memory_space<vmem>>, %arg13: memref<1x10xf32, #tpu.memory_space<vmem>>) attributes {dimension_semantics = [#tpu.dimension_semantics<arbitrary>], iteration_bounds = array<i64: 4>, scalar_prefetch = 0 : i64, scratch_operands = 3 : i64, tpu.core_type = #tpu.core_type<tc>, window_params = [{transform_indices = @transform_0, window_bounds = array<i64: 576, 300>}, {pipeline_mode = #tpu.pipeline_mode<synchronous>, transform_indices = @transform_1, window_bounds = array<i64: 300, 10>}, {pipeline_mode = #tpu.pipeline_mode<synchronous>, transform_indices = @transform_2, window_bounds = array<i64: 1, 10>}, {pipeline_mode = #tpu.pipeline_mode<synchronous>, transform_indices = @transform_3, window_bounds = array<i64: 160, 20>}, {pipeline_mode = #tpu.pipeline_mode<synchronous>, transform_indices = @transform_4, window_bounds = array<i64: 1, 20>}, {pipeline_mode = #tpu.pipeline_mode<synchronous>, transform_indices = @transform_5, window_bounds = array<i64: 180, 10>}, {pipeline_mode = #tpu.pipeline_mode<synchronous>, transform_indices = @transform_6, window_bounds = array<i64: 1, 10>}, {pipeline_mode = #tpu.pipeline_mode<synchronous>, transform_indices = @transform_7, window_bounds = array<i64: 4, 16, 10>}, {pipeline_mode = #tpu.pipeline_mode<synchronous>, transform_indices = @transform_8, window_bounds = array<i64: 4, 1>}, {pipeline_mode = #tpu.pipeline_mode<synchronous>, transform_indices = @transform_9, window_bounds = array<i64: 4, 1>}]} {
    %c0_i32 = arith.constant 0 : i32
    %0 = arith.cmpi eq, %arg0, %c0_i32 : i32
    %1 = arith.extui %0 : i1 to i32
    %c0_i32_0 = arith.constant 0 : i32
    %2 = arith.cmpi ne, %1, %c0_i32_0 : i32
    scf.if %2 {
      %cst_18 = arith.constant 0.000000e+00 : f32
      %27 = vector.broadcast %cst_18 : f32 to vector<1x10xf32>
      %c0_19 = arith.constant 0 : index
      %c0_20 = arith.constant 0 : index
      %28 = vector.load %arg12[%c0_19, %c0_20] : memref<1x10xf32, #tpu.memory_space<vmem>>, vector<1x10xf32>
      tpu.vector_store %arg12[%c0_19, %c0_20], %27 {strides = array<i32>} : memref<1x10xf32, #tpu.memory_space<vmem>>, vector<1x10xf32>,
      %cst_21 = arith.constant 0.000000e+00 : f32
      %29 = vector.broadcast %cst_21 : f32 to vector<1x10xf32>
      %c0_22 = arith.constant 0 : index
      %c0_23 = arith.constant 0 : index
      %30 = vector.load %arg13[%c0_22, %c0_23] : memref<1x10xf32, #tpu.memory_space<vmem>>, vector<1x10xf32>
      tpu.vector_store %arg13[%c0_22, %c0_23], %29 {strides = array<i32>} : memref<1x10xf32, #tpu.memory_space<vmem>>, vector<1x10xf32>,
    } else {
    }
    %c0 = arith.constant 0 : index
    %c0_1 = arith.constant 0 : index
    %3 = vector.load %arg1[%c0, %c0_1] : memref<576x300xf32, #tpu.memory_space<vmem>>, vector<576x300xf32>
    %c0_2 = arith.constant 0 : index
    %c0_3 = arith.constant 0 : index
    %4 = vector.load %arg2[%c0_2, %c0_3] : memref<300x10xf32, #tpu.memory_space<vmem>>, vector<300x10xf32>
    %cst = arith.constant dense<0.000000e+00> : vector<576x10xf32>
    %5 = tpu.matmul %3, %4, %cst {dimension_numbers = #tpu.dot_dimension_numbers<[1], [0], [0], [1], [0, 0, 1, 1], [], []>} : vector<576x300xf32>, vector<300x10xf32>, vector<576x10xf32> -> vector<576x10xf32>
    %c0_4 = arith.constant 0 : index
    %c0_5 = arith.constant 0 : index
    %6 = vector.load %arg3[%c0_4, %c0_5] : memref<1x10xf32, #tpu.memory_space<vmem>>, vector<1x10xf32>
    %7 = vector.broadcast %6 : vector<1x10xf32> to vector<576x10xf32>
    %8 = arith.addf %5, %7 : vector<576x10xf32>
    %c0_6 = arith.constant 0 : index
    %c0_7 = arith.constant 0 : index
    %9 = vector.load %arg12[%c0_6, %c0_7] : memref<1x10xf32, #tpu.memory_space<vmem>>, vector<1x10xf32>
    %cst_8 = arith.constant dense<0.000000e+00> : vector<10xf32>
    %10 = vector.multi_reduction <add>, %8, %cst_8 [0] : vector<576x10xf32> to vector<10xf32>
    %11 = vector.shape_cast %10 : vector<10xf32> to vector<1x10xf32>
    %12 = arith.addf %9, %11 : vector<1x10xf32>
    %c0_9 = arith.constant 0 : index
    %c0_10 = arith.constant 0 : index
    %13 = vector.load %arg12[%c0_9, %c0_10] : memref<1x10xf32, #tpu.memory_space<vmem>>, vector<1x10xf32>
    tpu.vector_store %arg12[%c0_9, %c0_10], %12 {strides = array<i32>} : memref<1x10xf32, #tpu.memory_space<vmem>>, vector<1x10xf32>,
    %c0_11 = arith.constant 0 : index
    %c0_12 = arith.constant 0 : index
    %14 = vector.load %arg13[%c0_11, %c0_12] : memref<1x10xf32, #tpu.memory_space<vmem>>, vector<1x10xf32>
    %15 = arith.mulf %8, %8 : vector<576x10xf32>
    %cst_13 = arith.constant dense<0.000000e+00> : vector<10xf32>
    %16 = vector.multi_reduction <add>, %15, %cst_13 [0] : vector<576x10xf32> to vector<10xf32>
    %17 = vector.shape_cast %16 : vector<10xf32> to vector<1x10xf32>
    %18 = arith.addf %14, %17 : vector<1x10xf32>
    %c0_14 = arith.constant 0 : index
    %c0_15 = arith.constant 0 : index
    %19 = vector.load %arg13[%c0_14, %c0_15] : memref<1x10xf32, #tpu.memory_space<vmem>>, vector<1x10xf32>
    tpu.vector_store %arg13[%c0_14, %c0_15], %18 {strides = array<i32>} : memref<1x10xf32, #tpu.memory_space<vmem>>, vector<1x10xf32>,
    %c576_i32 = arith.constant 576 : i32
    %20 = arith.muli %arg0, %c576_i32 : i32
    %21 = tpu.assume_multiple %20, 576 : i32
    %22 = arith.index_cast %21 : i32 to index
    %c0_16 = arith.constant 0 : index
    %23 = vector.load %arg11[%22, %c0_16] : memref<2304x10xf32, #tpu.memory_space<vmem>>, vector<576x10xf32>
    tpu.vector_store %arg11[%22, %c0_16], %8 {strides = array<i32>} : memref<2304x10xf32, #tpu.memory_space<vmem>>, vector<576x10xf32>,
    %c3_i32 = arith.constant 3 : i32
    %24 = arith.cmpi eq, %arg0, %c3_i32 : i32
    %25 = arith.extui %24 : i1 to i32
    %c0_i32_17 = arith.constant 0 : i32
    %26 = arith.cmpi ne, %25, %c0_i32_17 : i32
    scf.if %26 {
      %c0_18 = arith.constant 0 : index
      %c0_19 = arith.constant 0 : index
      %27 = vector.load %arg12[%c0_18, %c0_19] : memref<1x10xf32, #tpu.memory_space<vmem>>, vector<1x10xf32>
      %cst_20 = arith.constant 4.34027781E-4 : f32
      %28 = vector.broadcast %cst_20 : f32 to vector<1x10xf32>
      %29 = arith.mulf %27, %28 : vector<1x10xf32>
      %c0_21 = arith.constant 0 : index
      %c0_22 = arith.constant 0 : index
      %30 = vector.load %arg13[%c0_21, %c0_22] : memref<1x10xf32, #tpu.memory_space<vmem>>, vector<1x10xf32>
      %cst_23 = arith.constant 4.34027781E-4 : f32
      %31 = vector.broadcast %cst_23 : f32 to vector<1x10xf32>
      %32 = arith.mulf %30, %31 : vector<1x10xf32>
      %33 = arith.mulf %29, %29 : vector<1x10xf32>
      %34 = arith.subf %32, %33 : vector<1x10xf32>
      %cst_24 = arith.constant 9.99999974E-6 : f32
      %35 = vector.broadcast %cst_24 : f32 to vector<1x10xf32>
      %36 = arith.addf %34, %35 : vector<1x10xf32>
      %37 = math.rsqrt %36 : vector<1x10xf32>
      %cst_25 = arith.constant 0.000000e+00 : f32
      %38 = vector.broadcast %cst_25 : f32 to vector<144x20xf32>
      %cst_26 = arith.constant 0.000000e+00 : f32
      %39 = vector.broadcast %cst_26 : f32 to vector<144x20xf32>
      %cst_27 = arith.constant 0.000000e+00 : f32
      %40 = vector.broadcast %cst_27 : f32 to vector<144x20xf32>
      %cst_28 = arith.constant 0.000000e+00 : f32
      %41 = vector.broadcast %cst_28 : f32 to vector<144x20xf32>
      %c0_29 = arith.constant 0 : index
      %c0_30 = arith.constant 0 : index
      %42 = vector.load %arg11[%c0_29, %c0_30] : memref<2304x10xf32, #tpu.memory_space<vmem>>, vector<144x10xf32>
      %43 = vector.broadcast %29 : vector<1x10xf32> to vector<144x10xf32>
      %44 = arith.subf %42, %43 : vector<144x10xf32>
      %45 = vector.broadcast %37 : vector<1x10xf32> to vector<144x10xf32>
      %46 = arith.mulf %44, %45 : vector<144x10xf32>
      %cst_31 = arith.constant 0.000000e+00 : f32
      %47 = vector.broadcast %cst_31 : f32 to vector<144x10xf32>
      %48 = arith.maximumf %46, %47 : vector<144x10xf32>
      %c0_32 = arith.constant 0 : index
      %c0_33 = arith.constant 0 : index
      %49 = vector.load %arg4[%c0_32, %c0_33] : memref<160x20xf32, #tpu.memory_space<vmem>>, vector<10x20xf32>
      %cst_34 = arith.constant dense<0.000000e+00> : vector<144x20xf32>
      %50 = tpu.matmul %48, %49, %cst_34 {dimension_numbers = #tpu.dot_dimension_numbers<[1], [0], [0], [1], [0, 0, 1, 1], [], []>} : vector<144x10xf32>, vector<10x20xf32>, vector<144x20xf32> -> vector<144x20xf32>
      %51 = arith.addf %38, %50 : vector<144x20xf32>
      %c144 = arith.constant 144 : index
      %c0_35 = arith.constant 0 : index
      %52 = vector.load %arg11[%c144, %c0_35] : memref<2304x10xf32, #tpu.memory_space<vmem>>, vector<144x10xf32>
      %53 = vector.broadcast %29 : vector<1x10xf32> to vector<144x10xf32>
      %54 = arith.subf %52, %53 : vector<144x10xf32>
      %55 = vector.broadcast %37 : vector<1x10xf32> to vector<144x10xf32>
      %56 = arith.mulf %54, %55 : vector<144x10xf32>
      %cst_36 = arith.constant 0.000000e+00 : f32
      %57 = vector.broadcast %cst_36 : f32 to vector<144x10xf32>
      %58 = arith.maximumf %56, %57 : vector<144x10xf32>
      %c10 = arith.constant 10 : index
      %c0_37 = arith.constant 0 : index
      %59 = vector.load %arg4[%c10, %c0_37] : memref<160x20xf32, #tpu.memory_space<vmem>>, vector<10x20xf32>
      %cst_38 = arith.constant dense<0.000000e+00> : vector<144x20xf32>
      %60 = tpu.matmul %58, %59, %cst_38 {dimension_numbers = #tpu.dot_dimension_numbers<[1], [0], [0], [1], [0, 0, 1, 1], [], []>} : vector<144x10xf32>, vector<10x20xf32>, vector<144x20xf32> -> vector<144x20xf32>
      %61 = arith.addf %39, %60 : vector<144x20xf32>
      %c288 = arith.constant 288 : index
      %c0_39 = arith.constant 0 : index
      %62 = vector.load %arg11[%c288, %c0_39] : memref<2304x10xf32, #tpu.memory_space<vmem>>, vector<144x10xf32>
      %63 = vector.broadcast %29 : vector<1x10xf32> to vector<144x10xf32>
      %64 = arith.subf %62, %63 : vector<144x10xf32>
      %65 = vector.broadcast %37 : vector<1x10xf32> to vector<144x10xf32>
      %66 = arith.mulf %64, %65 : vector<144x10xf32>
      %cst_40 = arith.constant 0.000000e+00 : f32
      %67 = vector.broadcast %cst_40 : f32 to vector<144x10xf32>
      %68 = arith.maximumf %66, %67 : vector<144x10xf32>
      %c20 = arith.constant 20 : index
      %c0_41 = arith.constant 0 : index
      %69 = vector.load %arg4[%c20, %c0_41] : memref<160x20xf32, #tpu.memory_space<vmem>>, vector<10x20xf32>
      %cst_42 = arith.constant dense<0.000000e+00> : vector<144x20xf32>
      %70 = tpu.matmul %68, %69, %cst_42 {dimension_numbers = #tpu.dot_dimension_numbers<[1], [0], [0], [1], [0, 0, 1, 1], [], []>} : vector<144x10xf32>, vector<10x20xf32>, vector<144x20xf32> -> vector<144x20xf32>
      %71 = arith.addf %40, %70 : vector<144x20xf32>
      %c432 = arith.constant 432 : index
      %c0_43 = arith.constant 0 : index
      %72 = vector.load %arg11[%c432, %c0_43] : memref<2304x10xf32, #tpu.memory_space<vmem>>, vector<144x10xf32>
      %73 = vector.broadcast %29 : vector<1x10xf32> to vector<144x10xf32>
      %74 = arith.subf %72, %73 : vector<144x10xf32>
      %75 = vector.broadcast %37 : vector<1x10xf32> to vector<144x10xf32>
      %76 = arith.mulf %74, %75 : vector<144x10xf32>
      %cst_44 = arith.constant 0.000000e+00 : f32
      %77 = vector.broadcast %cst_44 : f32 to vector<144x10xf32>
      %78 = arith.maximumf %76, %77 : vector<144x10xf32>
      %c30 = arith.constant 30 : index
      %c0_45 = arith.constant 0 : index
      %79 = vector.load %arg4[%c30, %c0_45] : memref<160x20xf32, #tpu.memory_space<vmem>>, vector<10x20xf32>
      %cst_46 = arith.constant dense<0.000000e+00> : vector<144x20xf32>
      %80 = tpu.matmul %78, %79, %cst_46 {dimension_numbers = #tpu.dot_dimension_numbers<[1], [0], [0], [1], [0, 0, 1, 1], [], []>} : vector<144x10xf32>, vector<10x20xf32>, vector<144x20xf32> -> vector<144x20xf32>
      %81 = arith.addf %41, %80 : vector<144x20xf32>
      %c576 = arith.constant 576 : index
      %c0_47 = arith.constant 0 : index
      %82 = vector.load %arg11[%c576, %c0_47] : memref<2304x10xf32, #tpu.memory_space<vmem>>, vector<144x10xf32>
      %83 = vector.broadcast %29 : vector<1x10xf32> to vector<144x10xf32>
      %84 = arith.subf %82, %83 : vector<144x10xf32>
      %85 = vector.broadcast %37 : vector<1x10xf32> to vector<144x10xf32>
      %86 = arith.mulf %84, %85 : vector<144x10xf32>
      %cst_48 = arith.constant 0.000000e+00 : f32
      %87 = vector.broadcast %cst_48 : f32 to vector<144x10xf32>
      %88 = arith.maximumf %86, %87 : vector<144x10xf32>
      %c40 = arith.constant 40 : index
      %c0_49 = arith.constant 0 : index
      %89 = vector.load %arg4[%c40, %c0_49] : memref<160x20xf32, #tpu.memory_space<vmem>>, vector<10x20xf32>
      %cst_50 = arith.constant dense<0.000000e+00> : vector<144x20xf32>
      %90 = tpu.matmul %88, %89, %cst_50 {dimension_numbers = #tpu.dot_dimension_numbers<[1], [0], [0], [1], [0, 0, 1, 1], [], []>} : vector<144x10xf32>, vector<10x20xf32>, vector<144x20xf32> -> vector<144x20xf32>
      %91 = arith.addf %51, %90 : vector<144x20xf32>
      %c720 = arith.constant 720 : index
      %c0_51 = arith.constant 0 : index
      %92 = vector.load %arg11[%c720, %c0_51] : memref<2304x10xf32, #tpu.memory_space<vmem>>, vector<144x10xf32>
      %93 = vector.broadcast %29 : vector<1x10xf32> to vector<144x10xf32>
      %94 = arith.subf %92, %93 : vector<144x10xf32>
      %95 = vector.broadcast %37 : vector<1x10xf32> to vector<144x10xf32>
      %96 = arith.mulf %94, %95 : vector<144x10xf32>
      %cst_52 = arith.constant 0.000000e+00 : f32
      %97 = vector.broadcast %cst_52 : f32 to vector<144x10xf32>
      %98 = arith.maximumf %96, %97 : vector<144x10xf32>
      %c50 = arith.constant 50 : index
      %c0_53 = arith.constant 0 : index
      %99 = vector.load %arg4[%c50, %c0_53] : memref<160x20xf32, #tpu.memory_space<vmem>>, vector<10x20xf32>
      %cst_54 = arith.constant dense<0.000000e+00> : vector<144x20xf32>
      %100 = tpu.matmul %98, %99, %cst_54 {dimension_numbers = #tpu.dot_dimension_numbers<[1], [0], [0], [1], [0, 0, 1, 1], [], []>} : vector<144x10xf32>, vector<10x20xf32>, vector<144x20xf32> -> vector<144x20xf32>
      %101 = arith.addf %61, %100 : vector<144x20xf32>
      %c864 = arith.constant 864 : index
      %c0_55 = arith.constant 0 : index
      %102 = vector.load %arg11[%c864, %c0_55] : memref<2304x10xf32, #tpu.memory_space<vmem>>, vector<144x10xf32>
      %103 = vector.broadcast %29 : vector<1x10xf32> to vector<144x10xf32>
      %104 = arith.subf %102, %103 : vector<144x10xf32>
      %105 = vector.broadcast %37 : vector<1x10xf32> to vector<144x10xf32>
      %106 = arith.mulf %104, %105 : vector<144x10xf32>
      %cst_56 = arith.constant 0.000000e+00 : f32
      %107 = vector.broadcast %cst_56 : f32 to vector<144x10xf32>
      %108 = arith.maximumf %106, %107 : vector<144x10xf32>
      %c60 = arith.constant 60 : index
      %c0_57 = arith.constant 0 : index
      %109 = vector.load %arg4[%c60, %c0_57] : memref<160x20xf32, #tpu.memory_space<vmem>>, vector<10x20xf32>
      %cst_58 = arith.constant dense<0.000000e+00> : vector<144x20xf32>
      %110 = tpu.matmul %108, %109, %cst_58 {dimension_numbers = #tpu.dot_dimension_numbers<[1], [0], [0], [1], [0, 0, 1, 1], [], []>} : vector<144x10xf32>, vector<10x20xf32>, vector<144x20xf32> -> vector<144x20xf32>
      %111 = arith.addf %71, %110 : vector<144x20xf32>
      %c1008 = arith.constant 1008 : index
      %c0_59 = arith.constant 0 : index
      %112 = vector.load %arg11[%c1008, %c0_59] : memref<2304x10xf32, #tpu.memory_space<vmem>>, vector<144x10xf32>
      %113 = vector.broadcast %29 : vector<1x10xf32> to vector<144x10xf32>
      %114 = arith.subf %112, %113 : vector<144x10xf32>
      %115 = vector.broadcast %37 : vector<1x10xf32> to vector<144x10xf32>
      %116 = arith.mulf %114, %115 : vector<144x10xf32>
      %cst_60 = arith.constant 0.000000e+00 : f32
      %117 = vector.broadcast %cst_60 : f32 to vector<144x10xf32>
      %118 = arith.maximumf %116, %117 : vector<144x10xf32>
      %c70 = arith.constant 70 : index
      %c0_61 = arith.constant 0 : index
      %119 = vector.load %arg4[%c70, %c0_61] : memref<160x20xf32, #tpu.memory_space<vmem>>, vector<10x20xf32>
      %cst_62 = arith.constant dense<0.000000e+00> : vector<144x20xf32>
      %120 = tpu.matmul %118, %119, %cst_62 {dimension_numbers = #tpu.dot_dimension_numbers<[1], [0], [0], [1], [0, 0, 1, 1], [], []>} : vector<144x10xf32>, vector<10x20xf32>, vector<144x20xf32> -> vector<144x20xf32>
      %121 = arith.addf %81, %120 : vector<144x20xf32>
      %c1152 = arith.constant 1152 : index
      %c0_63 = arith.constant 0 : index
      %122 = vector.load %arg11[%c1152, %c0_63] : memref<2304x10xf32, #tpu.memory_space<vmem>>, vector<144x10xf32>
      %123 = vector.broadcast %29 : vector<1x10xf32> to vector<144x10xf32>
      %124 = arith.subf %122, %123 : vector<144x10xf32>
      %125 = vector.broadcast %37 : vector<1x10xf32> to vector<144x10xf32>
      %126 = arith.mulf %124, %125 : vector<144x10xf32>
      %cst_64 = arith.constant 0.000000e+00 : f32
      %127 = vector.broadcast %cst_64 : f32 to vector<144x10xf32>
      %128 = arith.maximumf %126, %127 : vector<144x10xf32>
      %c80 = arith.constant 80 : index
      %c0_65 = arith.constant 0 : index
      %129 = vector.load %arg4[%c80, %c0_65] : memref<160x20xf32, #tpu.memory_space<vmem>>, vector<10x20xf32>
      %cst_66 = arith.constant dense<0.000000e+00> : vector<144x20xf32>
      %130 = tpu.matmul %128, %129, %cst_66 {dimension_numbers = #tpu.dot_dimension_numbers<[1], [0], [0], [1], [0, 0, 1, 1], [], []>} : vector<144x10xf32>, vector<10x20xf32>, vector<144x20xf32> -> vector<144x20xf32>
      %131 = arith.addf %91, %130 : vector<144x20xf32>
      %c1296 = arith.constant 1296 : index
      %c0_67 = arith.constant 0 : index
      %132 = vector.load %arg11[%c1296, %c0_67] : memref<2304x10xf32, #tpu.memory_space<vmem>>, vector<144x10xf32>
      %133 = vector.broadcast %29 : vector<1x10xf32> to vector<144x10xf32>
      %134 = arith.subf %132, %133 : vector<144x10xf32>
      %135 = vector.broadcast %37 : vector<1x10xf32> to vector<144x10xf32>
      %136 = arith.mulf %134, %135 : vector<144x10xf32>
      %cst_68 = arith.constant 0.000000e+00 : f32
      %137 = vector.broadcast %cst_68 : f32 to vector<144x10xf32>
      %138 = arith.maximumf %136, %137 : vector<144x10xf32>
      %c90 = arith.constant 90 : index
      %c0_69 = arith.constant 0 : index
      %139 = vector.load %arg4[%c90, %c0_69] : memref<160x20xf32, #tpu.memory_space<vmem>>, vector<10x20xf32>
      %cst_70 = arith.constant dense<0.000000e+00> : vector<144x20xf32>
      %140 = tpu.matmul %138, %139, %cst_70 {dimension_numbers = #tpu.dot_dimension_numbers<[1], [0], [0], [1], [0, 0, 1, 1], [], []>} : vector<144x10xf32>, vector<10x20xf32>, vector<144x20xf32> -> vector<144x20xf32>
      %141 = arith.addf %101, %140 : vector<144x20xf32>
      %c1440 = arith.constant 1440 : index
      %c0_71 = arith.constant 0 : index
      %142 = vector.load %arg11[%c1440, %c0_71] : memref<2304x10xf32, #tpu.memory_space<vmem>>, vector<144x10xf32>
      %143 = vector.broadcast %29 : vector<1x10xf32> to vector<144x10xf32>
      %144 = arith.subf %142, %143 : vector<144x10xf32>
      %145 = vector.broadcast %37 : vector<1x10xf32> to vector<144x10xf32>
      %146 = arith.mulf %144, %145 : vector<144x10xf32>
      %cst_72 = arith.constant 0.000000e+00 : f32
      %147 = vector.broadcast %cst_72 : f32 to vector<144x10xf32>
      %148 = arith.maximumf %146, %147 : vector<144x10xf32>
      %c100 = arith.constant 100 : index
      %c0_73 = arith.constant 0 : index
      %149 = vector.load %arg4[%c100, %c0_73] : memref<160x20xf32, #tpu.memory_space<vmem>>, vector<10x20xf32>
      %cst_74 = arith.constant dense<0.000000e+00> : vector<144x20xf32>
      %150 = tpu.matmul %148, %149, %cst_74 {dimension_numbers = #tpu.dot_dimension_numbers<[1], [0], [0], [1], [0, 0, 1, 1], [], []>} : vector<144x10xf32>, vector<10x20xf32>, vector<144x20xf32> -> vector<144x20xf32>
      %151 = arith.addf %111, %150 : vector<144x20xf32>
      %c1584 = arith.constant 1584 : index
      %c0_75 = arith.constant 0 : index
      %152 = vector.load %arg11[%c1584, %c0_75] : memref<2304x10xf32, #tpu.memory_space<vmem>>, vector<144x10xf32>
      %153 = vector.broadcast %29 : vector<1x10xf32> to vector<144x10xf32>
      %154 = arith.subf %152, %153 : vector<144x10xf32>
      %155 = vector.broadcast %37 : vector<1x10xf32> to vector<144x10xf32>
      %156 = arith.mulf %154, %155 : vector<144x10xf32>
      %cst_76 = arith.constant 0.000000e+00 : f32
      %157 = vector.broadcast %cst_76 : f32 to vector<144x10xf32>
      %158 = arith.maximumf %156, %157 : vector<144x10xf32>
      %c110 = arith.constant 110 : index
      %c0_77 = arith.constant 0 : index
      %159 = vector.load %arg4[%c110, %c0_77] : memref<160x20xf32, #tpu.memory_space<vmem>>, vector<10x20xf32>
      %cst_78 = arith.constant dense<0.000000e+00> : vector<144x20xf32>
      %160 = tpu.matmul %158, %159, %cst_78 {dimension_numbers = #tpu.dot_dimension_numbers<[1], [0], [0], [1], [0, 0, 1, 1], [], []>} : vector<144x10xf32>, vector<10x20xf32>, vector<144x20xf32> -> vector<144x20xf32>
      %161 = arith.addf %121, %160 : vector<144x20xf32>
      %c1728 = arith.constant 1728 : index
      %c0_79 = arith.constant 0 : index
      %162 = vector.load %arg11[%c1728, %c0_79] : memref<2304x10xf32, #tpu.memory_space<vmem>>, vector<144x10xf32>
      %163 = vector.broadcast %29 : vector<1x10xf32> to vector<144x10xf32>
      %164 = arith.subf %162, %163 : vector<144x10xf32>
      %165 = vector.broadcast %37 : vector<1x10xf32> to vector<144x10xf32>
      %166 = arith.mulf %164, %165 : vector<144x10xf32>
      %cst_80 = arith.constant 0.000000e+00 : f32
      %167 = vector.broadcast %cst_80 : f32 to vector<144x10xf32>
      %168 = arith.maximumf %166, %167 : vector<144x10xf32>
      %c120 = arith.constant 120 : index
      %c0_81 = arith.constant 0 : index
      %169 = vector.load %arg4[%c120, %c0_81] : memref<160x20xf32, #tpu.memory_space<vmem>>, vector<10x20xf32>
      %cst_82 = arith.constant dense<0.000000e+00> : vector<144x20xf32>
      %170 = tpu.matmul %168, %169, %cst_82 {dimension_numbers = #tpu.dot_dimension_numbers<[1], [0], [0], [1], [0, 0, 1, 1], [], []>} : vector<144x10xf32>, vector<10x20xf32>, vector<144x20xf32> -> vector<144x20xf32>
      %171 = arith.addf %131, %170 : vector<144x20xf32>
      %c1872 = arith.constant 1872 : index
      %c0_83 = arith.constant 0 : index
      %172 = vector.load %arg11[%c1872, %c0_83] : memref<2304x10xf32, #tpu.memory_space<vmem>>, vector<144x10xf32>
      %173 = vector.broadcast %29 : vector<1x10xf32> to vector<144x10xf32>
      %174 = arith.subf %172, %173 : vector<144x10xf32>
      %175 = vector.broadcast %37 : vector<1x10xf32> to vector<144x10xf32>
      %176 = arith.mulf %174, %175 : vector<144x10xf32>
      %cst_84 = arith.constant 0.000000e+00 : f32
      %177 = vector.broadcast %cst_84 : f32 to vector<144x10xf32>
      %178 = arith.maximumf %176, %177 : vector<144x10xf32>
      %c130 = arith.constant 130 : index
      %c0_85 = arith.constant 0 : index
      %179 = vector.load %arg4[%c130, %c0_85] : memref<160x20xf32, #tpu.memory_space<vmem>>, vector<10x20xf32>
      %cst_86 = arith.constant dense<0.000000e+00> : vector<144x20xf32>
      %180 = tpu.matmul %178, %179, %cst_86 {dimension_numbers = #tpu.dot_dimension_numbers<[1], [0], [0], [1], [0, 0, 1, 1], [], []>} : vector<144x10xf32>, vector<10x20xf32>, vector<144x20xf32> -> vector<144x20xf32>
      %181 = arith.addf %141, %180 : vector<144x20xf32>
      %c2016 = arith.constant 2016 : index
      %c0_87 = arith.constant 0 : index
      %182 = vector.load %arg11[%c2016, %c0_87] : memref<2304x10xf32, #tpu.memory_space<vmem>>, vector<144x10xf32>
      %183 = vector.broadcast %29 : vector<1x10xf32> to vector<144x10xf32>
      %184 = arith.subf %182, %183 : vector<144x10xf32>
      %185 = vector.broadcast %37 : vector<1x10xf32> to vector<144x10xf32>
      %186 = arith.mulf %184, %185 : vector<144x10xf32>
      %cst_88 = arith.constant 0.000000e+00 : f32
      %187 = vector.broadcast %cst_88 : f32 to vector<144x10xf32>
      %188 = arith.maximumf %186, %187 : vector<144x10xf32>
      %c140 = arith.constant 140 : index
      %c0_89 = arith.constant 0 : index
      %189 = vector.load %arg4[%c140, %c0_89] : memref<160x20xf32, #tpu.memory_space<vmem>>, vector<10x20xf32>
      %cst_90 = arith.constant dense<0.000000e+00> : vector<144x20xf32>
      %190 = tpu.matmul %188, %189, %cst_90 {dimension_numbers = #tpu.dot_dimension_numbers<[1], [0], [0], [1], [0, 0, 1, 1], [], []>} : vector<144x10xf32>, vector<10x20xf32>, vector<144x20xf32> -> vector<144x20xf32>
      %191 = arith.addf %151, %190 : vector<144x20xf32>
      %c2160 = arith.constant 2160 : index
      %c0_91 = arith.constant 0 : index
      %192 = vector.load %arg11[%c2160, %c0_91] : memref<2304x10xf32, #tpu.memory_space<vmem>>, vector<144x10xf32>
      %193 = vector.broadcast %29 : vector<1x10xf32> to vector<144x10xf32>
      %194 = arith.subf %192, %193 : vector<144x10xf32>
      %195 = vector.broadcast %37 : vector<1x10xf32> to vector<144x10xf32>
      %196 = arith.mulf %194, %195 : vector<144x10xf32>
      %cst_92 = arith.constant 0.000000e+00 : f32
      %197 = vector.broadcast %cst_92 : f32 to vector<144x10xf32>
      %198 = arith.maximumf %196, %197 : vector<144x10xf32>
      %c150 = arith.constant 150 : index
      %c0_93 = arith.constant 0 : index
      %199 = vector.load %arg4[%c150, %c0_93] : memref<160x20xf32, #tpu.memory_space<vmem>>, vector<10x20xf32>
      %cst_94 = arith.constant dense<0.000000e+00> : vector<144x20xf32>
      %200 = tpu.matmul %198, %199, %cst_94 {dimension_numbers = #tpu.dot_dimension_numbers<[1], [0], [0], [1], [0, 0, 1, 1], [], []>} : vector<144x10xf32>, vector<10x20xf32>, vector<144x20xf32> -> vector<144x20xf32>
      %201 = arith.addf %161, %200 : vector<144x20xf32>
      %202 = arith.addf %171, %181 : vector<144x20xf32>
      %203 = arith.addf %191, %201 : vector<144x20xf32>
      %204 = arith.addf %202, %203 : vector<144x20xf32>
      %c0_95 = arith.constant 0 : index
      %c0_96 = arith.constant 0 : index
      %205 = vector.load %arg5[%c0_95, %c0_96] : memref<1x20xf32, #tpu.memory_space<vmem>>, vector<1x20xf32>
      %206 = vector.broadcast %205 : vector<1x20xf32> to vector<144x20xf32>
      %207 = arith.addf %204, %206 : vector<144x20xf32>
      %cst_97 = arith.constant dense<0.000000e+00> : vector<20xf32>
      %208 = vector.multi_reduction <add>, %207, %cst_97 [0] : vector<144x20xf32> to vector<20xf32>
      %209 = vector.shape_cast %208 : vector<20xf32> to vector<1x20xf32>
      %cst_98 = arith.constant 1.440000e+02 : f32
      %210 = vector.broadcast %cst_98 : f32 to vector<1x20xf32>
      %211 = arith.divf %209, %210 : vector<1x20xf32>
      %212 = vector.broadcast %211 : vector<1x20xf32> to vector<144x20xf32>
      %213 = arith.subf %207, %212 : vector<144x20xf32>
      %214 = arith.mulf %213, %213 : vector<144x20xf32>
      %cst_99 = arith.constant dense<0.000000e+00> : vector<20xf32>
      %215 = vector.multi_reduction <add>, %214, %cst_99 [0] : vector<144x20xf32> to vector<20xf32>
      %216 = vector.shape_cast %215 : vector<20xf32> to vector<1x20xf32>
      %cst_100 = arith.constant 1.440000e+02 : f32
      %217 = vector.broadcast %cst_100 : f32 to vector<1x20xf32>
      %218 = arith.divf %216, %217 : vector<1x20xf32>
      %219 = vector.broadcast %211 : vector<1x20xf32> to vector<144x20xf32>
      %220 = arith.subf %207, %219 : vector<144x20xf32>
      %cst_101 = arith.constant 9.99999974E-6 : f32
      %221 = vector.broadcast %cst_101 : f32 to vector<1x20xf32>
      %222 = arith.addf %218, %221 : vector<1x20xf32>
      %223 = math.rsqrt %222 : vector<1x20xf32>
      %224 = vector.broadcast %223 : vector<1x20xf32> to vector<144x20xf32>
      %225 = arith.mulf %220, %224 : vector<144x20xf32>
      %cst_102 = arith.constant 0.000000e+00 : f32
      %226 = vector.broadcast %cst_102 : f32 to vector<144x20xf32>
      %227 = arith.maximumf %225, %226 : vector<144x20xf32>
      %cst_103 = arith.constant 0.000000e+00 : f32
      %228 = vector.broadcast %cst_103 : f32 to vector<16x10xf32>
      %cst_104 = arith.constant 0.000000e+00 : f32
      %229 = vector.broadcast %cst_104 : f32 to vector<16x10xf32>
      %cst_105 = arith.constant 0.000000e+00 : f32
      %230 = vector.broadcast %cst_105 : f32 to vector<16x10xf32>
      %231 = vector.extract_strided_slice %227 {offsets = [0, 0], sizes = [16, 20], strides = [1, 1]} : vector<144x20xf32> to vector<16x20xf32>
      %c0_106 = arith.constant 0 : index
      %c0_107 = arith.constant 0 : index
      %232 = vector.load %arg6[%c0_106, %c0_107] : memref<180x10xf32, #tpu.memory_space<vmem>>, vector<20x10xf32>
      %cst_108 = arith.constant dense<0.000000e+00> : vector<16x10xf32>
      %233 = tpu.matmul %231, %232, %cst_108 {dimension_numbers = #tpu.dot_dimension_numbers<[1], [0], [0], [1], [0, 0, 1, 1], [], []>} : vector<16x20xf32>, vector<20x10xf32>, vector<16x10xf32> -> vector<16x10xf32>
      %234 = arith.addf %228, %233 : vector<16x10xf32>
      %235 = vector.extract_strided_slice %227 {offsets = [16, 0], sizes = [16, 20], strides = [1, 1]} : vector<144x20xf32> to vector<16x20xf32>
      %c20_109 = arith.constant 20 : index
      %c0_110 = arith.constant 0 : index
      %236 = vector.load %arg6[%c20_109, %c0_110] : memref<180x10xf32, #tpu.memory_space<vmem>>, vector<20x10xf32>
      %cst_111 = arith.constant dense<0.000000e+00> : vector<16x10xf32>
      %237 = tpu.matmul %235, %236, %cst_111 {dimension_numbers = #tpu.dot_dimension_numbers<[1], [0], [0], [1], [0, 0, 1, 1], [], []>} : vector<16x20xf32>, vector<20x10xf32>, vector<16x10xf32> -> vector<16x10xf32>
      %238 = arith.addf %229, %237 : vector<16x10xf32>
      %239 = vector.extract_strided_slice %227 {offsets = [32, 0], sizes = [16, 20], strides = [1, 1]} : vector<144x20xf32> to vector<16x20xf32>
      %c40_112 = arith.constant 40 : index
      %c0_113 = arith.constant 0 : index
      %240 = vector.load %arg6[%c40_112, %c0_113] : memref<180x10xf32, #tpu.memory_space<vmem>>, vector<20x10xf32>
      %cst_114 = arith.constant dense<0.000000e+00> : vector<16x10xf32>
      %241 = tpu.matmul %239, %240, %cst_114 {dimension_numbers = #tpu.dot_dimension_numbers<[1], [0], [0], [1], [0, 0, 1, 1], [], []>} : vector<16x20xf32>, vector<20x10xf32>, vector<16x10xf32> -> vector<16x10xf32>
      %242 = arith.addf %230, %241 : vector<16x10xf32>
      %243 = vector.extract_strided_slice %227 {offsets = [48, 0], sizes = [16, 20], strides = [1, 1]} : vector<144x20xf32> to vector<16x20xf32>
      %c60_115 = arith.constant 60 : index
      %c0_116 = arith.constant 0 : index
      %244 = vector.load %arg6[%c60_115, %c0_116] : memref<180x10xf32, #tpu.memory_space<vmem>>, vector<20x10xf32>
      %cst_117 = arith.constant dense<0.000000e+00> : vector<16x10xf32>
      %245 = tpu.matmul %243, %244, %cst_117 {dimension_numbers = #tpu.dot_dimension_numbers<[1], [0], [0], [1], [0, 0, 1, 1], [], []>} : vector<16x20xf32>, vector<20x10xf32>, vector<16x10xf32> -> vector<16x10xf32>
      %246 = arith.addf %234, %245 : vector<16x10xf32>
      %247 = vector.extract_strided_slice %227 {offsets = [64, 0], sizes = [16, 20], strides = [1, 1]} : vector<144x20xf32> to vector<16x20xf32>
      %c80_118 = arith.constant 80 : index
      %c0_119 = arith.constant 0 : index
      %248 = vector.load %arg6[%c80_118, %c0_119] : memref<180x10xf32, #tpu.memory_space<vmem>>, vector<20x10xf32>
      %cst_120 = arith.constant dense<0.000000e+00> : vector<16x10xf32>
      %249 = tpu.matmul %247, %248, %cst_120 {dimension_numbers = #tpu.dot_dimension_numbers<[1], [0], [0], [1], [0, 0, 1, 1], [], []>} : vector<16x20xf32>, vector<20x10xf32>, vector<16x10xf32> -> vector<16x10xf32>
      %250 = arith.addf %238, %249 : vector<16x10xf32>
      %251 = vector.extract_strided_slice %227 {offsets = [80, 0], sizes = [16, 20], strides = [1, 1]} : vector<144x20xf32> to vector<16x20xf32>
      %c100_121 = arith.constant 100 : index
      %c0_122 = arith.constant 0 : index
      %252 = vector.load %arg6[%c100_121, %c0_122] : memref<180x10xf32, #tpu.memory_space<vmem>>, vector<20x10xf32>
      %cst_123 = arith.constant dense<0.000000e+00> : vector<16x10xf32>
      %253 = tpu.matmul %251, %252, %cst_123 {dimension_numbers = #tpu.dot_dimension_numbers<[1], [0], [0], [1], [0, 0, 1, 1], [], []>} : vector<16x20xf32>, vector<20x10xf32>, vector<16x10xf32> -> vector<16x10xf32>
      %254 = arith.addf %242, %253 : vector<16x10xf32>
      %255 = vector.extract_strided_slice %227 {offsets = [96, 0], sizes = [16, 20], strides = [1, 1]} : vector<144x20xf32> to vector<16x20xf32>
      %c120_124 = arith.constant 120 : index
      %c0_125 = arith.constant 0 : index
      %256 = vector.load %arg6[%c120_124, %c0_125] : memref<180x10xf32, #tpu.memory_space<vmem>>, vector<20x10xf32>
      %cst_126 = arith.constant dense<0.000000e+00> : vector<16x10xf32>
      %257 = tpu.matmul %255, %256, %cst_126 {dimension_numbers = #tpu.dot_dimension_numbers<[1], [0], [0], [1], [0, 0, 1, 1], [], []>} : vector<16x20xf32>, vector<20x10xf32>, vector<16x10xf32> -> vector<16x10xf32>
      %258 = arith.addf %246, %257 : vector<16x10xf32>
      %259 = vector.extract_strided_slice %227 {offsets = [112, 0], sizes = [16, 20], strides = [1, 1]} : vector<144x20xf32> to vector<16x20xf32>
      %c140_127 = arith.constant 140 : index
      %c0_128 = arith.constant 0 : index
      %260 = vector.load %arg6[%c140_127, %c0_128] : memref<180x10xf32, #tpu.memory_space<vmem>>, vector<20x10xf32>
      %cst_129 = arith.constant dense<0.000000e+00> : vector<16x10xf32>
      %261 = tpu.matmul %259, %260, %cst_129 {dimension_numbers = #tpu.dot_dimension_numbers<[1], [0], [0], [1], [0, 0, 1, 1], [], []>} : vector<16x20xf32>, vector<20x10xf32>, vector<16x10xf32> -> vector<16x10xf32>
      %262 = arith.addf %250, %261 : vector<16x10xf32>
      %263 = vector.extract_strided_slice %227 {offsets = [128, 0], sizes = [16, 20], strides = [1, 1]} : vector<144x20xf32> to vector<16x20xf32>
      %c160 = arith.constant 160 : index
      %c0_130 = arith.constant 0 : index
      %264 = vector.load %arg6[%c160, %c0_130] : memref<180x10xf32, #tpu.memory_space<vmem>>, vector<20x10xf32>
      %cst_131 = arith.constant dense<0.000000e+00> : vector<16x10xf32>
      %265 = tpu.matmul %263, %264, %cst_131 {dimension_numbers = #tpu.dot_dimension_numbers<[1], [0], [0], [1], [0, 0, 1, 1], [], []>} : vector<16x20xf32>, vector<20x10xf32>, vector<16x10xf32> -> vector<16x10xf32>
      %266 = arith.addf %254, %265 : vector<16x10xf32>
      %267 = arith.addf %258, %262 : vector<16x10xf32>
      %268 = arith.addf %267, %266 : vector<16x10xf32>
      %c0_132 = arith.constant 0 : index
      %c0_133 = arith.constant 0 : index
      %269 = vector.load %arg7[%c0_132, %c0_133] : memref<1x10xf32, #tpu.memory_space<vmem>>, vector<1x10xf32>
      %270 = vector.broadcast %269 : vector<1x10xf32> to vector<16x10xf32>
      %271 = arith.addf %268, %270 : vector<16x10xf32>
      %cst_134 = arith.constant dense<0.000000e+00> : vector<10xf32>
      %272 = vector.multi_reduction <add>, %271, %cst_134 [0] : vector<16x10xf32> to vector<10xf32>
      %273 = vector.shape_cast %272 : vector<10xf32> to vector<1x10xf32>
      %cst_135 = arith.constant 1.600000e+01 : f32
      %274 = vector.broadcast %cst_135 : f32 to vector<1x10xf32>
      %275 = arith.divf %273, %274 : vector<1x10xf32>
      %276 = vector.broadcast %275 : vector<1x10xf32> to vector<16x10xf32>
      %277 = arith.subf %271, %276 : vector<16x10xf32>
      %278 = arith.mulf %277, %277 : vector<16x10xf32>
      %cst_136 = arith.constant dense<0.000000e+00> : vector<10xf32>
      %279 = vector.multi_reduction <add>, %278, %cst_136 [0] : vector<16x10xf32> to vector<10xf32>
      %280 = vector.shape_cast %279 : vector<10xf32> to vector<1x10xf32>
      %cst_137 = arith.constant 1.600000e+01 : f32
      %281 = vector.broadcast %cst_137 : f32 to vector<1x10xf32>
      %282 = arith.divf %280, %281 : vector<1x10xf32>
      %283 = vector.broadcast %275 : vector<1x10xf32> to vector<16x10xf32>
      %284 = arith.subf %271, %283 : vector<16x10xf32>
      %cst_138 = arith.constant 9.99999974E-6 : f32
      %285 = vector.broadcast %cst_138 : f32 to vector<1x10xf32>
      %286 = arith.addf %282, %285 : vector<1x10xf32>
      %287 = math.rsqrt %286 : vector<1x10xf32>
      %288 = vector.broadcast %287 : vector<1x10xf32> to vector<16x10xf32>
      %289 = arith.mulf %284, %288 : vector<16x10xf32>
      %cst_139 = arith.constant 0.000000e+00 : f32
      %290 = vector.broadcast %cst_139 : f32 to vector<16x10xf32>
      %291 = arith.maximumf %289, %290 : vector<16x10xf32>
      %c0_140 = arith.constant 0 : index
      %c0_141 = arith.constant 0 : index
      %c0_142 = arith.constant 0 : index
      %292 = vector.load %arg8[%c0_140, %c0_141, %c0_142] : memref<4x16x10xf32, #tpu.memory_space<vmem>>, vector<4x16x10xf32>
      %293 = vector.shape_cast %291 : vector<16x10xf32> to vector<1x16x10xf32>
      %294 = vector.broadcast %293 : vector<1x16x10xf32> to vector<4x16x10xf32>
      %295 = arith.mulf %292, %294 : vector<4x16x10xf32>
      %cst_143 = arith.constant dense<0.000000e+00> : vector<4x16xf32>
      %296 = vector.multi_reduction <add>, %295, %cst_143 [2] : vector<4x16x10xf32> to vector<4x16xf32>
      %cst_144 = arith.constant dense<0.000000e+00> : vector<4xf32>
      %297 = vector.multi_reduction <add>, %296, %cst_144 [1] : vector<4x16xf32> to vector<4xf32>
      %298 = vector.shape_cast %297 : vector<4xf32> to vector<4x1xf32>
      %c0_145 = arith.constant 0 : index
      %c0_146 = arith.constant 0 : index
      %299 = vector.load %arg9[%c0_145, %c0_146] : memref<4x1xf32, #tpu.memory_space<vmem>>, vector<4x1xf32>
      %300 = arith.addf %298, %299 : vector<4x1xf32>
      %c0_147 = arith.constant 0 : index
      %c0_148 = arith.constant 0 : index
      %301 = vector.load %arg10[%c0_147, %c0_148] : memref<4x1xf32, #tpu.memory_space<vmem>>, vector<4x1xf32>
      tpu.vector_store %arg10[%c0_147, %c0_148], %300 {strides = array<i32>} : memref<4x1xf32, #tpu.memory_space<vmem>>, vector<4x1xf32>,
    } else {
    }
    return
  }
  func.func @transform_0(%arg0: i32) -> (i32, i32) {
    %c0_i32 = arith.constant 0 : i32
    %c0_i32_0 = arith.constant 0 : i32
    return %arg0, %c0_i32 : i32, i32
  }
  func.func @transform_1(%arg0: i32) -> (i32, i32) {
    %c0_i32 = arith.constant 0 : i32
    %c0_i32_0 = arith.constant 0 : i32
    %c0_i32_1 = arith.constant 0 : i32
    return %c0_i32, %c0_i32_0 : i32, i32
  }
  func.func @transform_2(%arg0: i32) -> (i32, i32) {
    %c0_i32 = arith.constant 0 : i32
    %c0_i32_0 = arith.constant 0 : i32
    %c0_i32_1 = arith.constant 0 : i32
    return %c0_i32, %c0_i32_0 : i32, i32
  }
  func.func @transform_3(%arg0: i32) -> (i32, i32) {
    %c0_i32 = arith.constant 0 : i32
    %c0_i32_0 = arith.constant 0 : i32
    %c0_i32_1 = arith.constant 0 : i32
    return %c0_i32, %c0_i32_0 : i32, i32
  }
  func.func @transform_4(%arg0: i32) -> (i32, i32) {
    %c0_i32 = arith.constant 0 : i32
    %c0_i32_0 = arith.constant 0 : i32
    %c0_i32_1 = arith.constant 0 : i32
    return %c0_i32, %c0_i32_0 : i32, i32
  }
  func.func @transform_5(%arg0: i32) -> (i32, i32) {
    %c0_i32 = arith.constant 0 : i32
    %c0_i32_0 = arith.constant 0 : i32
    %c0_i32_1 = arith.constant 0 : i32
    return %c0_i32, %c0_i32_0 : i32, i32
  }
  func.func @transform_6(%arg0: i32) -> (i32, i32) {
    %c0_i32 = arith.constant 0 : i32
    %c0_i32_0 = arith.constant 0 : i32
    %c0_i32_1 = arith.constant 0 : i32
    return %c0_i32, %c0_i32_0 : i32, i32
  }
  func.func @transform_7(%arg0: i32) -> (i32, i32, i32) {
    %c0_i32 = arith.constant 0 : i32
    %c0_i32_0 = arith.constant 0 : i32
    %c0_i32_1 = arith.constant 0 : i32
    %c0_i32_2 = arith.constant 0 : i32
    return %c0_i32, %c0_i32_0, %c0_i32_1 : i32, i32, i32
  }
  func.func @transform_8(%arg0: i32) -> (i32, i32) {
    %c0_i32 = arith.constant 0 : i32
    %c0_i32_0 = arith.constant 0 : i32
    %c0_i32_1 = arith.constant 0 : i32
    return %c0_i32, %c0_i32_0 : i32, i32
  }
  func.func @transform_9(%arg0: i32) -> (i32, i32) {
    %c0_i32 = arith.constant 0 : i32
    %c0_i32_0 = arith.constant 0 : i32
    %c0_i32_1 = arith.constant 0 : i32
    return %c0_i32, %c0_i32_0 : i32, i32
  }
}

</mosaic_0001>

<bundles_post_ra>
// kernel: auto_player_forward.1
= control target key start
LH: loop header
LB: loop body
LE: loop exit
PB: predicated region body
PF: predicated region fallthrough
CT: control target
= control target key end

     0   :  { %s10216_s30 = smov 0   ;;  %s12834_s0 = inlined_call_operand.vmem [shape: f32[2304,300], index: 0, kind: input, shape index: {}]   ;;  %s12835_s1 = inlined_call_operand.vmem [shape: f32[300,10], index: 1, kind: input, shape index: {}]   ;;  %s12836_s2 = inlined_call_operand.vmem [shape: f32[1,10], index: 2, kind: input, shape index: {}]   ;;  %s12837_s3 = inlined_call_operand.vmem [shape: f32[160,20], index: 3, kind: input, shape index: {}]   ;;  %s12838_s4 = inlined_call_operand.vmem [shape: f32[1,20], index: 4, kind: input, shape index: {}]   ;;  %s12839_s5 = inlined_call_operand.vmem [shape: f32[180,10], index: 5, kind: input, shape index: {}]   ;;  %s12840_s6 = inlined_call_operand.vmem [shape: f32[1,10], index: 6, kind: input, shape index: {}]   ;;  %s12841_s7 = inlined_call_operand.vmem [shape: f32[4,16,10], index: 7, kind: input, shape index: {}]   ;;  %s12842_s8 = inlined_call_operand.vmem [shape: f32[4,1], index: 8, kind: input, shape index: {}]   ;;  %s12843_s9 = inlined_call_operand.vmem [shape: f32[4,1], index: 9, kind: output, shape index: {}]  }
   0x1 LB: > { %s10222_s10 = sadd.s32 4294967295, %s10160_s30   ;;  %p8067_p0 = scmp.ge.s32.totalorder %s10160_s30, 1  ;;  %s10160_s30 = sphi %s10216_s30, %s19_s30  }
   0x2   : > { %p284_p1 = scmp.lt.s32.totalorder %s10160_s30, 5 }
   0x4   : > { %p285_p2 = pnand %p8067_p0, %p284_p1 }
   0x5   : > { %s316_s11 = smul.u32 (!%p285_p2), 72, %s10222_s10  ;;  %p8069_p4 = scmp.ne.s32.totalorder (!%p285_p2), %s10222_s10, 0 }
   0x6   : > { %288 = sbr.rel (%p285_p2) target bundleno = 1863 (0x747), region = 56 }
   0x7   : > { %p317_p3 = scmp.lt.s32.totalorder (!%p285_p2), %s316_s11, 287 }
   0xd   : > { %s12849_s11 = smov (!%p317_p3, %s316_s11), 287  ;;  %326 = sbr.rel (%p8069_p4) target bundleno = 20 (0x14), region = 60 }
   0xe   : > { %s10134_s12 = smul.u32 24, %s12849_s11  ;;  %vm327_vm0 = vcmask (!%p8069_p4), 73728   ;;  %v10162_v0 = vmov (!%p8069_p4), 0.0  }
   0xf   : > { %328 = vst.msk [vmem:[#allocation3] sm:$0x1] (!%p8069_p4), %vm327_vm0, %v10162_v0  ;;  %329 = vst.msk [vmem:[#allocation4] sm:$0x1] (!%p8069_p4), %vm327_vm0, %v10162_v0 }
  0x10   : > { %s10230_s15 = scalar_lea.vmem %s12834_s0, %s10134_s12 }
  0x14 PF: > { %v546_v1 = vld [vmem:[%s12835_s1] sm:$0xff]  ;;  %v547_v2 = vld [vmem:[%s12835_s1 + $0x8] sm:$0xff]  ;;  %v548_v3 = vld [vmem:[%s12835_s1 + $0x10] sm:$0xff]  ;;  %v10163_v4 = vmov 0.0|0.0   ;;  %vm808_vm1 = vcmask 1043456   ;;  %vm10164_vm2 = vmmov 1  }
  0x15   : > { %9620 = vmatprep.subr.bf16.mxu0 %v10163_v4  ;;  %9814 = vmatprep.subr.bf16.mxu1 %v10163_v4  ;;  %v9621_v5 = vpack.c.bf16 %v547_v2, %v546_v1  ;;  %v549_v6 = vld [vmem:[%s12835_s1 + $0x18] sm:$0xff]  ;;  %v550_v8 = vld [vmem:[%s12835_s1 + $0x20] sm:$0xff]  ;;  %v551_v9 = vld [vmem:[%s12835_s1 + $0x28] sm:$0xff]  ;;  %vm591_vm4 = vcmask 359424   ;;  %vm1663_vm5 = vcmask 80896   ;;  %vm1814_vm6 = vcmask 73728  }
  0x16   : > { %v9624_v7 = vpack.c.bf16 %v549_v6, %v548_v3  ;;  %v9627_v10 = vpack.c.bf16 %v551_v9, %v550_v8  ;;  %v552_v11 = vld [vmem:[%s12835_s1 + $0x30] sm:$0xff]  ;;  %v553_v12 = vld [vmem:[%s12835_s1 + $0x38] sm:$0xff]  ;;  %v331_v13 = vld [vmem:[%s10230_s15 + $0x8] sm:$0xff]  ;;  %p8144_p5 = scmp.ne.s32.totalorder %s10222_s10, 3 }
  0x17   : > { %9622 = vmatpush1.bf16.msra.mxu0 %v9621_v5  ;;  %9830 = vmatpush1.bf16.msra.mxu1 %v9621_v5  ;;  %v9630_v14 = vpack.c.bf16 %v553_v12, %v552_v11  ;;  %v493_v15 = vld [vmem:[%s10230_s15 + $0x518] sm:$0xff]  ;;  %v554_v16 = vld [vmem:[%s12835_s1 + $0x40] sm:$0xff]  ;;  %v555_v17 = vld [vmem:[%s12835_s1 + $0x48] sm:$0xff]  ;;  %vm2562_vm7 = vcmask (!%p8144_p5), 1041408   ;;  %vm10165_vm8 = vmmov (!%p8144_p5), 1   ;;  %vm6938_vm10 = vcmask (!%p8144_p5), 162816  }
  0x18   : > { %9623 = vmatprep.subr.bf16.mxu0 %v10163_v4  ;;  %9815 = vmatprep.subr.bf16.mxu1 %v10163_v4  ;;  %v9633_v18 = vpack.c.bf16 %v555_v17, %v554_v16  ;;  %v556_v19 = vld [vmem:[%s12835_s1 + $0x50] sm:$0xff]  ;;  %v557_v20 = vld [vmem:[%s12835_s1 + $0x58] sm:$0xff]  ;;  %v558_v22 = vld [vmem:[%s12835_s1 + $0x60] sm:$0xff]  ;;  %vm7990_vm11 = vcmask (!%p8144_p5), 130112   ;;  %vm8019_vm12 = vcmask (!%p8144_p5), 1041409   ;;  %vm8021_vm13 = vcmask (!%p8144_p5), 1042434  }
  0x19   : > { %876 = vmatprep.mubr.f32.mxu0 %v331_v13  ;;  %1146 = vmatprep.mubr.f32.mxu1 %v493_v15  ;;  %v9636_v21 = vpack.c.bf16 %v557_v20, %v556_v19  ;;  %v559_v23 = vld [vmem:[%s12835_s1 + $0x68] sm:$0xff]  ;;  %v560_v25 = vld [vmem:[%s12835_s1 + $0x70] sm:$0xff]  ;;  %v561_v26 = vld [vmem:[%s12835_s1 + $0x78] sm:$0xff]  ;;  %vm8023_vm14 = vcmask (!%p8144_p5), 1043459   ;;  %vm8026_vm15 = vcmask (!%p8144_p5), 125952   ;;  %vm8032_vm0 = vcmask (!%p8144_p5), 3072  }
  0x1a   : > { %v9639_v24 = vpack.c.bf16 %v559_v23, %v558_v22  ;;  %v9642_v27 = vpack.c.bf16 %v561_v26, %v560_v25  ;;  %v562_v28 = vld [vmem:[%s12835_s1 + $0x80] sm:$0xff]  ;;  %v563_v29 = vld [vmem:[%s12835_s1 + $0x88] sm:$0xff]  ;;  %v564_v31 = vld [vmem:[%s12835_s1 + $0x90] sm:$0xff] }
  0x1b   : > { %9625 = vmatpush1.bf16.msra.mxu0 %v9624_v7  ;;  %9831 = vmatpush1.bf16.msra.mxu1 %v9624_v7  ;;  %v9645_v30 = vpack.c.bf16 %v563_v29, %v562_v28  ;;  %v565_v32 = vld [vmem:[%s12835_s1 + $0x98] sm:$0xff]  ;;  %v566_v34 = vld [vmem:[%s12835_s1 + $0xa0] sm:$0xff]  ;;  %v567_v35 = vld [vmem:[%s12835_s1 + $0xa8] sm:$0xff] }
  0x1c   : > { %9626 = vmatprep.subr.bf16.mxu0 %v10163_v4  ;;  %9816 = vmatprep.subr.bf16.mxu1 %v10163_v4  ;;  %v9648_v33 = vpack.c.bf16 %v565_v32, %v564_v31  ;;  %v9651_v36 = vpack.c.bf16 %v567_v35, %v566_v34  ;;  %v568_v37 = vld [vmem:[%s12835_s1 + $0xb0] sm:$0xff]  ;;  %v569_v38 = vld [vmem:[%s12835_s1 + $0xb8] sm:$0xff]  ;;  %v570_v40 = vld [vmem:[%s12835_s1 + $0xc0] sm:$0xff] }
  0x1d   : > { %v9654_v39 = vpack.c.bf16 %v569_v38, %v568_v37  ;;  %v571_v41 = vld [vmem:[%s12835_s1 + $0xc8] sm:$0xff]  ;;  %v572_v43 = vld [vmem:[%s12835_s1 + $0xd0] sm:$0xff]  ;;  %v573_v44 = vld [vmem:[%s12835_s1 + $0xd8] sm:$0xff] }
  0x1e   : > { %v9657_v42 = vpack.c.bf16 %v571_v41, %v570_v40  ;;  %v9660_v45 = vpack.c.bf16 %v573_v44, %v572_v43  ;;  %v574_v46 = vld [vmem:[%s12835_s1 + $0xe0] sm:$0xff]  ;;  %v575_v47 = vld [vmem:[%s12835_s1 + $0xe8] sm:$0xff]  ;;  %v576_v49 = vld [vmem:[%s12835_s1 + $0xf0] sm:$0xff] }
  0x1f   : > { %9628 = vmatpush1.bf16.msra.mxu0 %v9627_v10  ;;  %9832 = vmatpush1.bf16.msra.mxu1 %v9627_v10  ;;  %v9663_v48 = vpack.c.bf16 %v575_v47, %v574_v46  ;;  %v577_v50 = vld [vmem:[%s12835_s1 + $0xf8] sm:$0xff]  ;;  %v578_v51 = vld [vmem:[%s12835_s1 + $0x100] sm:$0xff]  ;;  %v579_v52 = vld [vmem:[%s12835_s1 + $0x108] sm:$0xff] }
  0x20   : > { %9629 = vmatprep.subr.bf16.mxu0 %v10163_v4  ;;  %9817 = vmatprep.subr.bf16.mxu1 %v10163_v4  ;;  %v9666_v53 = vpack.c.bf16 %v577_v50, %v576_v49  ;;  %v9668_v54 = vpack.c.bf16 %v579_v52, %v578_v51  ;;  %v580_v55 = vld [vmem:[%s12835_s1 + $0x110] sm:$0xff]  ;;  %v581_v56 = vld [vmem:[%s12835_s1 + $0x118] sm:$0xff]  ;;  %v330_v57 = vld [vmem:[%s10230_s15] sm:$0xff] }
  0x21   : > { %v492_v58 = vld [vmem:[%s10230_s15 + $0x510] sm:$0xff]  ;;  %v334_v59 = vld [vmem:[%s10230_s15 + $0x20] sm:$0xff]  ;;  %v9672_v61 = vpack.c.bf16 %v581_v56, %v580_v55  ;;  %v583_v63 = vld [vmem:[%s12835_s1 + $0x128] sm:$0xf] }
  0x22   : > { %v496_v60 = vld [vmem:[%s10230_s15 + $0x530] sm:$0xff]  ;;  %v582_v62 = vld [vmem:[%s12835_s1 + $0x120] sm:$0xff]  ;;  %v333_v0 = vld [vmem:[%s10230_s15 + $0x18] sm:$0xff] }
  0x23   : > { %9631 = vmatpush1.bf16.msra.mxu0 %v9630_v14  ;;  %9833 = vmatpush1.bf16.msra.mxu1 %v9630_v14  ;;  %v495_v1 = vld [vmem:[%s10230_s15 + $0x528] sm:$0xff]  ;;  %v337_v2 = vld [vmem:[%s10230_s15 + $0x38] sm:$0xff]  ;;  %vm10390_vm3 = vmpackc.low %vm808_vm1, %vm10164_vm2 }
  0x24   : > { %9632 = vmatprep.subr.bf16.mxu0 %v10163_v4  ;;  %9818 = vmatprep.subr.bf16.mxu1 %v10163_v4  ;;  %v499_v3 = vld [vmem:[%s10230_s15 + $0x548] sm:$0xff]  ;;  %v336_v6 = vld [vmem:[%s10230_s15 + $0x30] sm:$0xff]  ;;  %v498_v7 = vld [vmem:[%s10230_s15 + $0x540] sm:$0xff] }
  0x25   : > { %v340_v8 = vld [vmem:[%s10230_s15 + $0x50] sm:$0xff]  ;;  %v502_v9 = vld [vmem:[%s10230_s15 + $0x560] sm:$0xff]  ;;  %v339_v10 = vld [vmem:[%s10230_s15 + $0x48] sm:$0xff] }
  0x26   : > { %v501_v11 = vld [vmem:[%s10230_s15 + $0x558] sm:$0xff]  ;;  %v343_v12 = vld [vmem:[%s10230_s15 + $0x68] sm:$0xff]  ;;  %v342_v14 = vld [vmem:[%s10230_s15 + $0x60] sm:$0xff] }
  0x27   : > { %9634 = vmatpush1.bf16.msra.mxu0 %v9633_v18  ;;  %9834 = vmatpush1.bf16.msra.mxu1 %v9633_v18  ;;  %v505_v13 = vld [vmem:[%s10230_s15 + $0x578] sm:$0xff]  ;;  %v504_v15 = vld [vmem:[%s10230_s15 + $0x570] sm:$0xff]  ;;  %v346_v16 = vld [vmem:[%s10230_s15 + $0x80] sm:$0xff] }
  0x28   : > { %9635 = vmatprep.subr.bf16.mxu0 %v10163_v4  ;;  %9819 = vmatprep.subr.bf16.mxu1 %v10163_v4  ;;  %v508_v17 = vld [vmem:[%s10230_s15 + $0x590] sm:$0xff]  ;;  %v345_v18 = vld [vmem:[%s10230_s15 + $0x78] sm:$0xff]  ;;  %v507_v19 = vld [vmem:[%s10230_s15 + $0x588] sm:$0xff] }
  0x29   : > { %v349_v20 = vld [vmem:[%s10230_s15 + $0x98] sm:$0xff]  ;;  %v348_v22 = vld [vmem:[%s10230_s15 + $0x90] sm:$0xff]  ;;  %v510_v23 = vld [vmem:[%s10230_s15 + $0x5a0] sm:$0xff] }
  0x2a   : > { %v514_v25 = vld [vmem:[%s10230_s15 + $0x5c0] sm:$0xff]  ;;  %v351_v26 = vld [vmem:[%s10230_s15 + $0xa8] sm:$0xff]  ;;  %v517_v29 = vld [vmem:[%s10230_s15 + $0x5d8] sm:$0xff] }
  0x2b   : > { %9637 = vmatpush1.bf16.msra.mxu0 %v9636_v21  ;;  %9835 = vmatpush1.bf16.msra.mxu1 %v9636_v21  ;;  %v511_v21 = vld [vmem:[%s10230_s15 + $0x5a8] sm:$0xff]  ;;  %v516_v31 = vld [vmem:[%s10230_s15 + $0x5d0] sm:$0xff]  ;;  %v358_v32 = vld [vmem:[%s10230_s15 + $0xe0] sm:$0xff] }
  0x2c   : > { %9638 = vmatprep.subr.bf16.mxu0 %v10163_v4  ;;  %9820 = vmatprep.subr.bf16.mxu1 %v10163_v4  ;;  %v355_v28 = vld [vmem:[%s10230_s15 + $0xc8] sm:$0xff]  ;;  %v357_v34 = vld [vmem:[%s10230_s15 + $0xd8] sm:$0xff]  ;;  %v360_v38 = vld [vmem:[%s10230_s15 + $0xf0] sm:$0xff] }
  0x2d   : > { %v519_v35 = vld [vmem:[%s10230_s15 + $0x5e8] sm:$0xff]  ;;  %v364_v40 = vld [vmem:[%s10230_s15 + $0x110] sm:$0xff]  ;;  %v526_v41 = vld [vmem:[%s10230_s15 + $0x620] sm:$0xff] }
  0x2e   : > { %v523_v37 = vld [vmem:[%s10230_s15 + $0x608] sm:$0xff]  ;;  %v525_v43 = vld [vmem:[%s10230_s15 + $0x618] sm:$0xff]  ;;  %v366_v46 = vld [vmem:[%s10230_s15 + $0x120] sm:$0xff] }
  0x2f   : > { %9640 = vmatpush1.bf16.msra.mxu0 %v9639_v24  ;;  %9836 = vmatpush1.bf16.msra.mxu1 %v9639_v24  ;;  %v352_v24 = vld [vmem:[%s10230_s15 + $0xb0] sm:$0xff]  ;;  %v367_v44 = vld [vmem:[%s10230_s15 + $0x128] sm:$0xff]  ;;  %v369_v50 = vld [vmem:[%s10230_s15 + $0x138] sm:$0xff] }
  0x30   : > { %9641 = vmatprep.subr.bf16.mxu0 %v10163_v4  ;;  %9821 = vmatprep.subr.bf16.mxu1 %v10163_v4  ;;  %v528_v47 = vld [vmem:[%s10230_s15 + $0x630] sm:$0xff]  ;;  %v531_v51 = vld [vmem:[%s10230_s15 + $0x648] sm:$0xff]  ;;  %v373_v52 = vld [vmem:[%s10230_s15 + $0x158] sm:$0xff] }
  0x31   : > { %v532_v49 = vld [vmem:[%s10230_s15 + $0x650] sm:$0xff]  ;;  %v534_v55 = vld [vmem:[%s10230_s15 + $0x660] sm:$0xff]  ;;  %vm11335_vm9 = vmpackc.low (!%p8144_p5), %vm2562_vm7, %vm10165_vm8 }
  0x32   : > { %v376_v56 = vld [vmem:[%s10230_s15 + $0x170] sm:$0xff] }
  0x33   : > { %9643 = vmatpush1.bf16.msra.mxu0 %v9642_v27  ;;  %9837 = vmatpush1.bf16.msra.mxu1 %v9642_v27  ;;  %v513_v27 = vld [vmem:[%s10230_s15 + $0x5b8] sm:$0xff]  ;;  %v332_v5 = vld [vmem:[%s10230_s15 + $0x10] sm:$0xff] }
  0x34   : > { %9644 = vmatprep.subr.bf16.mxu0 %v10163_v4  ;;  %9822 = vmatprep.subr.bf16.mxu1 %v10163_v4 }
  0x37   : > { %9646 = vmatpush1.bf16.msra.mxu0 %v9645_v30  ;;  %9838 = vmatpush1.bf16.msra.mxu1 %v9645_v30  ;;  %v354_v30 = vld [vmem:[%s10230_s15 + $0xc0] sm:$0xff] }
  0x38   : > { %9647 = vmatprep.subr.bf16.mxu0 %v10163_v4  ;;  %9823 = vmatprep.subr.bf16.mxu1 %v10163_v4 }
  0x3b   : > { %9649 = vmatpush1.bf16.msra.mxu0 %v9648_v33  ;;  %9839 = vmatpush1.bf16.msra.mxu1 %v9648_v33  ;;  %v520_v33 = vld [vmem:[%s10230_s15 + $0x5f0] sm:$0xff] }
  0x3c   : > { %9650 = vmatprep.subr.bf16.mxu0 %v10163_v4  ;;  %9824 = vmatprep.subr.bf16.mxu1 %v10163_v4 }
  0x3f   : > { %9652 = vmatpush1.bf16.msra.mxu0 %v9651_v36  ;;  %9840 = vmatpush1.bf16.msra.mxu1 %v9651_v36  ;;  %v361_v36 = vld [vmem:[%s10230_s15 + $0xf8] sm:$0xff] }
  0x40   : > { %9653 = vmatprep.subr.bf16.mxu0 %v10163_v4  ;;  %9825 = vmatprep.subr.bf16.mxu1 %v10163_v4 }
  0x43   : > { %9655 = vmatpush1.bf16.msra.mxu0 %v9654_v39  ;;  %9841 = vmatpush1.bf16.msra.mxu1 %v9654_v39  ;;  %v522_v39 = vld [vmem:[%s10230_s15 + $0x600] sm:$0xff] }
  0x44   : > { %9656 = vmatprep.subr.bf16.mxu0 %v10163_v4  ;;  %9826 = vmatprep.subr.bf16.mxu1 %v10163_v4 }
  0x47   : > { %9658 = vmatpush1.bf16.msra.mxu0 %v9657_v42  ;;  %9842 = vmatpush1.bf16.msra.mxu1 %v9657_v42  ;;  %v363_v42 = vld [vmem:[%s10230_s15 + $0x108] sm:$0xff] }
  0x48   : > { %9659 = vmatprep.subr.bf16.mxu0 %v10163_v4  ;;  %9827 = vmatprep.subr.bf16.mxu1 %v10163_v4 }
  0x4b   : > { %9661 = vmatpush1.bf16.msra.mxu0 %v9660_v45  ;;  %9843 = vmatpush1.bf16.msra.mxu1 %v9660_v45  ;;  %v529_v45 = vld [vmem:[%s10230_s15 + $0x638] sm:$0xff] }
  0x4c   : > { %9662 = vmatprep.subr.bf16.mxu0 %v10163_v4  ;;  %9828 = vmatprep.subr.bf16.mxu1 %v10163_v4 }
  0x4f   : > { %9664 = vmatpush1.bf16.msra.mxu0 %v9663_v48  ;;  %9844 = vmatpush1.bf16.msra.mxu1 %v9663_v48  ;;  %v370_v48 = vld [vmem:[%s10230_s15 + $0x140] sm:$0xff] }
  0x50   : > { %9665 = vmatprep.subr.bf16.mxu0 %v10163_v4  ;;  %9829 = vmatprep.subr.bf16.mxu1 %v10163_v4  ;;  %v9676_v4 = vpack.c.bf16 %v583_v63, %v582_v62  ;;  %v378_v62 = vld [vmem:[%s10230_s15 + $0x180] sm:$0xff]  ;;  %v540_v63 = vld [vmem:[%s10230_s15 + $0x690] sm:$0xff] }
  0x53   : > { %9667 = vmatpush1.bf16.msra.mxu0 %v9666_v53  ;;  %9845 = vmatpush1.bf16.msra.mxu1 %v9666_v53  ;;  %v535_v53 = vld [vmem:[%s10230_s15 + $0x668] sm:$0xff] }
  0x54   : > { %9669 = vmatprep.subr.bf16.mxu1 %v9668_v54 }
  0x56   : > { %877 = vmatmul.mubr.f32.vlgmr.msra.gmra.mrb[0].mxu0 %v330_v57  ;;  %1147 = vmatmul.mubr.f32.vlgmr.msra.gmra.mrb[0].mxu1 %v492_v58  ;;  %v538_v57 = vld [vmem:[%s10230_s15 + $0x680] sm:$0xff]  ;;  %v375_v58 = vld [vmem:[%s10230_s15 + $0x168] sm:$0xff] }
  0x57   : > { %881 = vmatprep.mubr.f32.mxu0 %v334_v59  ;;  %1151 = vmatprep.mubr.f32.mxu1 %v496_v60  ;;  %v537_v59 = vld [vmem:[%s10230_s15 + $0x678] sm:$0xff]  ;;  %v379_v60 = vld [vmem:[%s10230_s15 + $0x188] sm:$0xff] }
  0x58   : > { %9671 = vmatpush3.bf16.msra.mxu1 %v9668_v54  ;;  %v372_v54 = vld [vmem:[%s10230_s15 + $0x150] sm:$0xff] }
  0x59   : > { %9673 = vmatprep.subr.bf16.mxu1 %v9672_v61 }
  0x5a   : > { %882 = vmatmul.mubr.f32.gmra.mrb[2].mxu0 %v333_v0  ;;  %1152 = vmatmul.mubr.f32.gmra.mrb[2].mxu1 %v495_v1  ;;  %v382_v0 = vld [vmem:[%s10230_s15 + $0x1a0] sm:$0xff]  ;;  %v544_v1 = vld [vmem:[%s10230_s15 + $0x6b0] sm:$0xff] }
  0x5b   : > { %886 = vmatprep.mubr.f32.mxu0 %v337_v2  ;;  %1156 = vmatprep.mubr.f32.mxu1 %v499_v3  ;;  %v381_v2 = vld [vmem:[%s10230_s15 + $0x198] sm:$0xff]  ;;  %v543_v3 = vld [vmem:[%s10230_s15 + $0x6a8] sm:$0xff] }
  0x5c   : > { %9675 = vmatpush3.bf16.msra.mxu1 %v9672_v61  ;;  %v541_v61 = vld [vmem:[%s10230_s15 + $0x698] sm:$0xff] }
  0x5d   : > { %9678 = vmatprep.subr.msk.bf16.mxu1 %vm10390_vm3, %v9676_v4 }
  0x5e   : > { %887 = vmatmul.mubr.f32.gmra.mrb[4].mxu0 %v336_v6  ;;  %1157 = vmatmul.mubr.f32.gmra.mrb[4].mxu1 %v498_v7  ;;  %v384_v6 = vld [vmem:[%s10230_s15 + $0x1b0] sm:$0xff]  ;;  %v335_v7 = vld [vmem:[%s10230_s15 + $0x28] sm:$0xff] }
  0x5f   : > { %891 = vmatprep.mubr.f32.mxu0 %v340_v8  ;;  %1161 = vmatprep.mubr.f32.mxu1 %v502_v9  ;;  %v388_v8 = vld [vmem:[%s10230_s15 + $0x1d0] sm:$0xff]  ;;  %v338_v9 = vld [vmem:[%s10230_s15 + $0x40] sm:$0xff] }
  0x60   : > { %9681 = vmatpush3.bf16.msk.msra.mxu1 %vm10390_vm3, %v9676_v4  ;;  %v385_v4 = vld [vmem:[%s10230_s15 + $0x1b8] sm:$0xff] }
  0x62   : > { %892 = vmatmul.mubr.f32.gmra.mrb[6].mxu0 %v339_v10  ;;  %1162 = vmatmul.mubr.f32.gmra.mrb[6].mxu1 %v501_v11  ;;  %v387_v10 = vld [vmem:[%s10230_s15 + $0x1c8] sm:$0xff]  ;;  %v341_v11 = vld [vmem:[%s10230_s15 + $0x58] sm:$0xff] }
  0x63   : > { %896 = vmatprep.mubr.f32.mxu0 %v343_v12  ;;  %1166 = vmatprep.mubr.f32.mxu1 %v505_v13  ;;  %v391_v12 = vld [vmem:[%s10230_s15 + $0x1e8] sm:$0xff]  ;;  %v344_v13 = vld [vmem:[%s10230_s15 + $0x70] sm:$0xff] }
  0x66   : > { %897 = vmatmul.mubr.f32.gmra.mrb[8].mxu0 %v342_v14  ;;  %1167 = vmatmul.mubr.f32.gmra.mrb[8].mxu1 %v504_v15  ;;  %v390_v14 = vld [vmem:[%s10230_s15 + $0x1e0] sm:$0xff]  ;;  %v347_v15 = vld [vmem:[%s10230_s15 + $0x88] sm:$0xff] }
  0x67   : > { %901 = vmatprep.mubr.f32.mxu0 %v346_v16  ;;  %1171 = vmatprep.mubr.f32.mxu1 %v508_v17  ;;  %v394_v16 = vld [vmem:[%s10230_s15 + $0x200] sm:$0xff] }
  0x68   : > { %v350_v17 = vld [vmem:[%s10230_s15 + $0xa0] sm:$0xff] }
  0x6a   : > { %902 = vmatmul.mubr.f32.gmra.mrb[10].mxu0 %v345_v18  ;;  %1172 = vmatmul.mubr.f32.gmra.mrb[10].mxu1 %v507_v19  ;;  %v393_v18 = vld [vmem:[%s10230_s15 + $0x1f8] sm:$0xff] }
  0x6b   : > { %906 = vmatprep.mubr.f32.mxu0 %v349_v20  ;;  %1176 = vmatprep.mubr.f32.mxu1 %v511_v21  ;;  %v353_v19 = vld [vmem:[%s10230_s15 + $0xb8] sm:$0xff]  ;;  %v356_v21 = vld [vmem:[%s10230_s15 + $0xd0] sm:$0xff] }
  0x6c   : > { %v397_v20 = vld [vmem:[%s10230_s15 + $0x218] sm:$0xff] }
  0x6e   : > { %907 = vmatmul.mubr.f32.gmra.mrb[12].mxu0 %v348_v22  ;;  %1177 = vmatmul.mubr.f32.gmra.mrb[12].mxu1 %v510_v23  ;;  %v396_v22 = vld [vmem:[%s10230_s15 + $0x210] sm:$0xff]  ;;  %v359_v23 = vld [vmem:[%s10230_s15 + $0xe8] sm:$0xff] }
  0x6f   : > { %911 = vmatprep.mubr.f32.mxu0 %v352_v24  ;;  %1181 = vmatprep.mubr.f32.mxu1 %v514_v25  ;;  %v400_v24 = vld [vmem:[%s10230_s15 + $0x230] sm:$0xff]  ;;  %v362_v25 = vld [vmem:[%s10230_s15 + $0x100] sm:$0xff] }
  0x72   : > { %912 = vmatmul.mubr.f32.gmra.mrb[14].mxu0 %v351_v26  ;;  %1182 = vmatmul.mubr.f32.gmra.mrb[14].mxu1 %v513_v27  ;;  %v399_v26 = vld [vmem:[%s10230_s15 + $0x228] sm:$0xff]  ;;  %v365_v27 = vld [vmem:[%s10230_s15 + $0x118] sm:$0xff] }
  0x73   : > { %916 = vmatprep.mubr.f32.mxu0 %v355_v28  ;;  %1186 = vmatprep.mubr.f32.mxu1 %v517_v29  ;;  %v403_v28 = vld [vmem:[%s10230_s15 + $0x248] sm:$0xff]  ;;  %v368_v29 = vld [vmem:[%s10230_s15 + $0x130] sm:$0xff] }
  0x76   : > { %917 = vmatmul.mubr.f32.gmra.mrb[16].mxu0 %v354_v30  ;;  %1187 = vmatmul.mubr.f32.gmra.mrb[16].mxu1 %v516_v31  ;;  %v402_v30 = vld [vmem:[%s10230_s15 + $0x240] sm:$0xff]  ;;  %v371_v31 = vld [vmem:[%s10230_s15 + $0x148] sm:$0xff] }
  0x77   : > { %921 = vmatprep.mubr.f32.mxu0 %v358_v32  ;;  %1191 = vmatprep.mubr.f32.mxu1 %v520_v33  ;;  %v406_v32 = vld [vmem:[%s10230_s15 + $0x260] sm:$0xff] }
  0x78   : > { %v374_v33 = vld [vmem:[%s10230_s15 + $0x160] sm:$0xff] }
  0x7a   : > { %922 = vmatmul.mubr.f32.gmra.mrb[18].mxu0 %v357_v34  ;;  %1192 = vmatmul.mubr.f32.gmra.mrb[18].mxu1 %v519_v35  ;;  %v405_v34 = vld [vmem:[%s10230_s15 + $0x258] sm:$0xff] }
  0x7b   : > { %926 = vmatprep.mubr.f32.mxu0 %v361_v36  ;;  %1196 = vmatprep.mubr.f32.mxu1 %v523_v37  ;;  %v377_v35 = vld [vmem:[%s10230_s15 + $0x178] sm:$0xff]  ;;  %v380_v37 = vld [vmem:[%s10230_s15 + $0x190] sm:$0xff] }
  0x7c   : > { %v409_v36 = vld [vmem:[%s10230_s15 + $0x278] sm:$0xff] }
  0x7e   : > { %927 = vmatmul.mubr.f32.gmra.mrb[20].mxu0 %v360_v38  ;;  %1197 = vmatmul.mubr.f32.gmra.mrb[20].mxu1 %v522_v39  ;;  %v408_v38 = vld [vmem:[%s10230_s15 + $0x270] sm:$0xff]  ;;  %v383_v39 = vld [vmem:[%s10230_s15 + $0x1a8] sm:$0xff] }
  0x7f   : > { %931 = vmatprep.mubr.f32.mxu0 %v364_v40  ;;  %1201 = vmatprep.mubr.f32.mxu1 %v526_v41  ;;  %v412_v40 = vld [vmem:[%s10230_s15 + $0x290] sm:$0xff]  ;;  %v386_v41 = vld [vmem:[%s10230_s15 + $0x1c0] sm:$0xff] }
  0x82   : > { %932 = vmatmul.mubr.f32.gmra.mrb[22].mxu0 %v363_v42  ;;  %1202 = vmatmul.mubr.f32.gmra.mrb[22].mxu1 %v525_v43  ;;  %v411_v42 = vld [vmem:[%s10230_s15 + $0x288] sm:$0xff]  ;;  %v389_v43 = vld [vmem:[%s10230_s15 + $0x1d8] sm:$0xff] }
  0x83   : > { %936 = vmatprep.mubr.f32.mxu0 %v367_v44  ;;  %1206 = vmatprep.mubr.f32.mxu1 %v529_v45  ;;  %v415_v44 = vld [vmem:[%s10230_s15 + $0x2a8] sm:$0xff]  ;;  %v392_v45 = vld [vmem:[%s10230_s15 + $0x1f0] sm:$0xff] }
  0x86   : > { %937 = vmatmul.mubr.f32.gmra.mrb[24].mxu0 %v366_v46  ;;  %1207 = vmatmul.mubr.f32.gmra.mrb[24].mxu1 %v528_v47  ;;  %v414_v46 = vld [vmem:[%s10230_s15 + $0x2a0] sm:$0xff]  ;;  %v395_v47 = vld [vmem:[%s10230_s15 + $0x208] sm:$0xff] }
  0x87   : > { %941 = vmatprep.mubr.f32.mxu0 %v370_v48  ;;  %1211 = vmatprep.mubr.f32.mxu1 %v532_v49  ;;  %v418_v48 = vld [vmem:[%s10230_s15 + $0x2c0] sm:$0xff] }
  0x88   : > { %v398_v49 = vld [vmem:[%s10230_s15 + $0x220] sm:$0xff] }
  0x8a   : > { %942 = vmatmul.mubr.f32.gmra.mrb[26].mxu0 %v369_v50  ;;  %1212 = vmatmul.mubr.f32.gmra.mrb[26].mxu1 %v531_v51  ;;  %v417_v50 = vld [vmem:[%s10230_s15 + $0x2b8] sm:$0xff] }
  0x8b   : > { %946 = vmatprep.mubr.f32.mxu0 %v373_v52  ;;  %1216 = vmatprep.mubr.f32.mxu1 %v535_v53  ;;  %v401_v51 = vld [vmem:[%s10230_s15 + $0x238] sm:$0xff]  ;;  %v404_v53 = vld [vmem:[%s10230_s15 + $0x250] sm:$0xff] }
  0x8c   : > { %v421_v52 = vld [vmem:[%s10230_s15 + $0x2d8] sm:$0xff] }
  0x8e   : > { %947 = vmatmul.mubr.f32.gmra.mrb[28].mxu0 %v372_v54  ;;  %1217 = vmatmul.mubr.f32.gmra.mrb[28].mxu1 %v534_v55  ;;  %v420_v54 = vld [vmem:[%s10230_s15 + $0x2d0] sm:$0xff]  ;;  %v407_v55 = vld [vmem:[%s10230_s15 + $0x268] sm:$0xff] }
  0x8f   : > { %951 = vmatprep.mubr.f32.mxu0 %v376_v56  ;;  %1221 = vmatprep.mubr.f32.mxu1 %v538_v57  ;;  %v424_v56 = vld [vmem:[%s10230_s15 + $0x2f0] sm:$0xff]  ;;  %v410_v57 = vld [vmem:[%s10230_s15 + $0x280] sm:$0xff] }
  0x92   : > { %952 = vmatmul.mubr.f32.gmra.mrb[30].mxu0 %v375_v58  ;;  %1222 = vmatmul.mubr.f32.gmra.mrb[30].mxu1 %v537_v59  ;;  %v423_v58 = vld [vmem:[%s10230_s15 + $0x2e8] sm:$0xff]  ;;  %v413_v59 = vld [vmem:[%s10230_s15 + $0x298] sm:$0xff] }
  0x93   : > { %956 = vmatprep.mubr.f32.mxu0 %v379_v60  ;;  %1226 = vmatprep.mubr.f32.mxu1 %v541_v61  ;;  %v427_v60 = vld [vmem:[%s10230_s15 + $0x308] sm:$0xff]  ;;  %v416_v61 = vld [vmem:[%s10230_s15 + $0x2b0] sm:$0xff] }
  0x96   : > { %957 = vmatmul.mubr.f32.gmra.mrb[32].mxu0 %v378_v62  ;;  %1227 = vmatmul.mubr.f32.gmra.mrb[32].mxu1 %v540_v63  ;;  %v426_v62 = vld [vmem:[%s10230_s15 + $0x300] sm:$0xff]  ;;  %v419_v63 = vld [vmem:[%s10230_s15 + $0x2c8] sm:$0xff] }
  0x97   : > { %961 = vmatprep.mubr.f32.mxu0 %v382_v0  ;;  %1231 = vmatprep.mubr.f32.mxu1 %v544_v1  ;;  %v430_v0 = vld [vmem:[%s10230_s15 + $0x320] sm:$0xff] }
  0x98   : > { %v422_v1 = vld [vmem:[%s10230_s15 + $0x2e0] sm:$0xff] }
  0x9a   : > { %962 = vmatmul.mubr.f32.gmra.mrb[34].mxu0 %v381_v2  ;;  %1232 = vmatmul.mubr.f32.gmra.mrb[34].mxu1 %v543_v3  ;;  %v429_v2 = vld [vmem:[%s10230_s15 + $0x318] sm:$0xff] }
  0x9b   : > { %966 = vmatprep.mubr.f32.mxu0 %v385_v4  ;;  %8935 = vmatprep.mubr.msk.f32.mxu1 %vm591_vm4, %v332_v5  ;;  %v425_v3 = vld [vmem:[%s10230_s15 + $0x2f8] sm:$0xff]  ;;  %v428_v5 = vld [vmem:[%s10230_s15 + $0x310] sm:$0xff] }
  0x9c   : > { %v433_v4 = vld [vmem:[%s10230_s15 + $0x338] sm:$0xff] }
  0x9e   : > { %967 = vmatmul.mubr.f32.gmra.mrb[36].mxu0 %v384_v6  ;;  %8936 = vmatmul.mubr.msk.f32.vlgmr.msra.gmra.mrb[36].mxu1 %vm591_vm4, %v335_v7  ;;  %v432_v6 = vld [vmem:[%s10230_s15 + $0x330] sm:$0xff]  ;;  %v431_v7 = vld [vmem:[%s10230_s15 + $0x328] sm:$0xff] }
  0x9f   : > { %971 = vmatprep.mubr.f32.mxu0 %v388_v8  ;;  %8938 = vmatprep.mubr.msk.f32.mxu1 %vm591_vm4, %v338_v9  ;;  %v436_v8 = vld [vmem:[%s10230_s15 + $0x350] sm:$0xff]  ;;  %v434_v9 = vld [vmem:[%s10230_s15 + $0x340] sm:$0xff] }
  0xa2   : > { %972 = vmatmul.mubr.f32.gmra.mrb[38].mxu0 %v387_v10  ;;  %8939 = vmatmul.mubr.msk.f32.gmra.mrb[38].mxu1 %vm591_vm4, %v341_v11  ;;  %v435_v10 = vld [vmem:[%s10230_s15 + $0x348] sm:$0xff]  ;;  %v437_v11 = vld [vmem:[%s10230_s15 + $0x358] sm:$0xff] }
  0xa3   : > { %976 = vmatprep.mubr.f32.mxu0 %v391_v12  ;;  %8941 = vmatprep.mubr.msk.f32.mxu1 %vm591_vm4, %v344_v13  ;;  %v439_v12 = vld [vmem:[%s10230_s15 + $0x368] sm:$0xff]  ;;  %v440_v13 = vld [vmem:[%s10230_s15 + $0x370] sm:$0xff] }
  0xa6   : > { %977 = vmatmul.mubr.f32.gmra.mrb[40].mxu0 %v390_v14  ;;  %8942 = vmatmul.mubr.msk.f32.gmra.mrb[40].mxu1 %vm591_vm4, %v347_v15  ;;  %v438_v14 = vld [vmem:[%s10230_s15 + $0x360] sm:$0xff]  ;;  %v443_v15 = vld [vmem:[%s10230_s15 + $0x388] sm:$0xff] }
  0xa7   : > { %981 = vmatprep.mubr.f32.mxu0 %v394_v16  ;;  %8944 = vmatprep.mubr.msk.f32.mxu1 %vm591_vm4, %v350_v17  ;;  %v442_v16 = vld [vmem:[%s10230_s15 + $0x380] sm:$0xff] }
  0xa8   : > { %v446_v17 = vld [vmem:[%s10230_s15 + $0x3a0] sm:$0xff] }
  0xaa   : > { %982 = vmatmul.mubr.f32.gmra.mrb[42].mxu0 %v393_v18  ;;  %8945 = vmatmul.mubr.msk.f32.gmra.mrb[42].mxu1 %vm591_vm4, %v353_v19  ;;  %v441_v18 = vld [vmem:[%s10230_s15 + $0x378] sm:$0xff] }
  0xab   : > { %986 = vmatprep.mubr.f32.mxu0 %v397_v20  ;;  %8947 = vmatprep.mubr.msk.f32.mxu1 %vm591_vm4, %v356_v21  ;;  %v449_v19 = vld [vmem:[%s10230_s15 + $0x3b8] sm:$0xff]  ;;  %v452_v21 = vld [vmem:[%s10230_s15 + $0x3d0] sm:$0xff] }
  0xac   : > { %v445_v20 = vld [vmem:[%s10230_s15 + $0x398] sm:$0xff] }
  0xae   : > { %987 = vmatmul.mubr.f32.gmra.mrb[44].mxu0 %v396_v22  ;;  %8948 = vmatmul.mubr.msk.f32.gmra.mrb[44].mxu1 %vm591_vm4, %v359_v23  ;;  %v444_v22 = vld [vmem:[%s10230_s15 + $0x390] sm:$0xff]  ;;  %v455_v23 = vld [vmem:[%s10230_s15 + $0x3e8] sm:$0xff] }
  0xaf   : > { %991 = vmatprep.mubr.f32.mxu0 %v400_v24  ;;  %8950 = vmatprep.mubr.msk.f32.mxu1 %vm591_vm4, %v362_v25  ;;  %v448_v24 = vld [vmem:[%s10230_s15 + $0x3b0] sm:$0xff]  ;;  %v458_v25 = vld [vmem:[%s10230_s15 + $0x400] sm:$0xff] }
  0xb2   : > { %992 = vmatmul.mubr.f32.gmra.mrb[46].mxu0 %v399_v26  ;;  %8951 = vmatmul.mubr.msk.f32.gmra.mrb[46].mxu1 %vm591_vm4, %v365_v27  ;;  %v447_v26 = vld [vmem:[%s10230_s15 + $0x3a8] sm:$0xff]  ;;  %v461_v27 = vld [vmem:[%s10230_s15 + $0x418] sm:$0xff] }
  0xb3   : > { %996 = vmatprep.mubr.f32.mxu0 %v403_v28  ;;  %8953 = vmatprep.mubr.msk.f32.mxu1 %vm591_vm4, %v368_v29  ;;  %v451_v28 = vld [vmem:[%s10230_s15 + $0x3c8] sm:$0xff]  ;;  %v464_v29 = vld [vmem:[%s10230_s15 + $0x430] sm:$0xff] }
  0xb6   : > { %997 = vmatmul.mubr.f32.gmra.mrb[48].mxu0 %v402_v30  ;;  %8954 = vmatmul.mubr.msk.f32.gmra.mrb[48].mxu1 %vm591_vm4, %v371_v31  ;;  %v450_v30 = vld [vmem:[%s10230_s15 + $0x3c0] sm:$0xff]  ;;  %v467_v31 = vld [vmem:[%s10230_s15 + $0x448] sm:$0xff] }
  0xb7   : > { %1001 = vmatprep.mubr.f32.mxu0 %v406_v32  ;;  %8956 = vmatprep.mubr.msk.f32.mxu1 %vm591_vm4, %v374_v33  ;;  %v454_v32 = vld [vmem:[%s10230_s15 + $0x3e0] sm:$0xff] }
  0xb8   : > { %v470_v33 = vld [vmem:[%s10230_s15 + $0x460] sm:$0xff] }
  0xba   : > { %1002 = vmatmul.mubr.f32.gmra.mrb[50].mxu0 %v405_v34  ;;  %8957 = vmatmul.mubr.msk.f32.gmra.mrb[50].mxu1 %vm591_vm4, %v377_v35  ;;  %v453_v34 = vld [vmem:[%s10230_s15 + $0x3d8] sm:$0xff] }
  0xbb   : > { %1006 = vmatprep.mubr.f32.mxu0 %v409_v36  ;;  %8959 = vmatprep.mubr.msk.f32.mxu1 %vm591_vm4, %v380_v37  ;;  %v473_v35 = vld [vmem:[%s10230_s15 + $0x478] sm:$0xff]  ;;  %v476_v37 = vld [vmem:[%s10230_s15 + $0x490] sm:$0xff] }
  0xbc   : > { %v457_v36 = vld [vmem:[%s10230_s15 + $0x3f8] sm:$0xff] }
  0xbe   : > { %1007 = vmatmul.mubr.f32.gmra.mrb[52].mxu0 %v408_v38  ;;  %8960 = vmatmul.mubr.msk.f32.gmra.mrb[52].mxu1 %vm591_vm4, %v383_v39  ;;  %v456_v38 = vld [vmem:[%s10230_s15 + $0x3f0] sm:$0xff]  ;;  %v479_v39 = vld [vmem:[%s10230_s15 + $0x4a8] sm:$0xff] }
  0xbf   : > { %1011 = vmatprep.mubr.f32.mxu0 %v412_v40  ;;  %8962 = vmatprep.mubr.msk.f32.mxu1 %vm591_vm4, %v386_v41  ;;  %v460_v40 = vld [vmem:[%s10230_s15 + $0x410] sm:$0xff]  ;;  %v482_v41 = vld [vmem:[%s10230_s15 + $0x4c0] sm:$0xff] }
  0xc2   : > { %1012 = vmatmul.mubr.f32.gmra.mrb[54].mxu0 %v411_v42  ;;  %8963 = vmatmul.mubr.msk.f32.gmra.mrb[54].mxu1 %vm591_vm4, %v389_v43  ;;  %v459_v42 = vld [vmem:[%s10230_s15 + $0x408] sm:$0xff]  ;;  %v485_v43 = vld [vmem:[%s10230_s15 + $0x4d8] sm:$0xff] }
  0xc3   : > { %1016 = vmatprep.mubr.f32.mxu0 %v415_v44  ;;  %8965 = vmatprep.mubr.msk.f32.mxu1 %vm591_vm4, %v392_v45  ;;  %v463_v44 = vld [vmem:[%s10230_s15 + $0x428] sm:$0xff]  ;;  %v488_v45 = vld [vmem:[%s10230_s15 + $0x4f0] sm:$0xff] }
  0xc6   : > { %1017 = vmatmul.mubr.f32.gmra.mrb[56].mxu0 %v414_v46  ;;  %8966 = vmatmul.mubr.msk.f32.gmra.mrb[56].mxu1 %vm591_vm4, %v395_v47  ;;  %v462_v46 = vld [vmem:[%s10230_s15 + $0x420] sm:$0xff]  ;;  %v491_v47 = vld [vmem:[%s10230_s15 + $0x508] sm:$0xff] }
  0xc7   : > { %1021 = vmatprep.mubr.f32.mxu0 %v418_v48  ;;  %8968 = vmatprep.mubr.msk.f32.mxu1 %vm591_vm4, %v398_v49  ;;  %v466_v48 = vld [vmem:[%s10230_s15 + $0x440] sm:$0xff] }
  0xc8   : > { %v494_v49 = vld [vmem:[%s10230_s15 + $0x520] sm:$0xff] }
  0xca   : > { %1022 = vmatmul.mubr.f32.gmra.mrb[58].mxu0 %v417_v50  ;;  %8969 = vmatmul.mubr.msk.f32.gmra.mrb[58].mxu1 %vm591_vm4, %v401_v51  ;;  %v465_v50 = vld [vmem:[%s10230_s15 + $0x438] sm:$0xff] }
  0xcb   : > { %1026 = vmatprep.mubr.f32.mxu0 %v421_v52  ;;  %8971 = vmatprep.mubr.msk.f32.mxu1 %vm591_vm4, %v404_v53  ;;  %v497_v51 = vld [vmem:[%s10230_s15 + $0x538] sm:$0xff]  ;;  %v500_v53 = vld [vmem:[%s10230_s15 + $0x550] sm:$0xff] }
  0xcc   : > { %v469_v52 = vld [vmem:[%s10230_s15 + $0x458] sm:$0xff] }
  0xce   : > { %1027 = vmatmul.mubr.f32.gmra.mrb[60].mxu0 %v420_v54  ;;  %8972 = vmatmul.mubr.msk.f32.gmra.mrb[60].mxu1 %vm591_vm4, %v407_v55  ;;  %v468_v54 = vld [vmem:[%s10230_s15 + $0x450] sm:$0xff]  ;;  %v503_v55 = vld [vmem:[%s10230_s15 + $0x568] sm:$0xff] }
  0xcf   : > { %1031 = vmatprep.mubr.f32.mxu0 %v424_v56  ;;  %8974 = vmatprep.mubr.msk.f32.mxu1 %vm591_vm4, %v410_v57  ;;  %v472_v56 = vld [vmem:[%s10230_s15 + $0x470] sm:$0xff]  ;;  %v506_v57 = vld [vmem:[%s10230_s15 + $0x580] sm:$0xff] }
  0xd2   : > { %1032 = vmatmul.mubr.f32.gmra.mrb[62].mxu0 %v423_v58  ;;  %8975 = vmatmul.mubr.msk.f32.gmra.mrb[62].mxu1 %vm591_vm4, %v413_v59  ;;  %v471_v58 = vld [vmem:[%s10230_s15 + $0x468] sm:$0xff]  ;;  %v509_v59 = vld [vmem:[%s10230_s15 + $0x598] sm:$0xff] }
  0xd3   : > { %1036 = vmatprep.mubr.f32.mxu0 %v427_v60  ;;  %8977 = vmatprep.mubr.msk.f32.mxu1 %vm591_vm4, %v416_v61  ;;  %v475_v60 = vld [vmem:[%s10230_s15 + $0x488] sm:$0xff]  ;;  %v512_v61 = vld [vmem:[%s10230_s15 + $0x5b0] sm:$0xff] }
  0xd6   : > { %1037 = vmatmul.mubr.f32.gmra.mrb[64].mxu0 %v426_v62  ;;  %8978 = vmatmul.mubr.msk.f32.gmra.mrb[64].mxu1 %vm591_vm4, %v419_v63  ;;  %v474_v62 = vld [vmem:[%s10230_s15 + $0x480] sm:$0xff]  ;;  %v515_v63 = vld [vmem:[%s10230_s15 + $0x5c8] sm:$0xff] }
  0xd7   : > { %1041 = vmatprep.mubr.f32.mxu0 %v430_v0  ;;  %8980 = vmatprep.mubr.msk.f32.mxu1 %vm591_vm4, %v422_v1  ;;  %v478_v0 = vld [vmem:[%s10230_s15 + $0x4a0] sm:$0xff] }
  0xd8   : > { %v518_v1 = vld [vmem:[%s10230_s15 + $0x5e0] sm:$0xff] }
  0xda   : > { %1042 = vmatmul.mubr.f32.gmra.mrb[66].mxu0 %v429_v2  ;;  %8981 = vmatmul.mubr.msk.f32.gmra.mrb[66].mxu1 %vm591_vm4, %v425_v3  ;;  %v477_v2 = vld [vmem:[%s10230_s15 + $0x498] sm:$0xff] }
  0xdb   : > { %1046 = vmatprep.mubr.f32.mxu0 %v433_v4  ;;  %8983 = vmatprep.mubr.msk.f32.mxu1 %vm591_vm4, %v428_v5  ;;  %v521_v3 = vld [vmem:[%s10230_s15 + $0x5f8] sm:$0xff]  ;;  %v524_v5 = vld [vmem:[%s10230_s15 + $0x610] sm:$0xff] }
  0xdc   : > { %v481_v4 = vld [vmem:[%s10230_s15 + $0x4b8] sm:$0xff] }
  0xde   : > { %1047 = vmatmul.mubr.f32.gmra.mrb[68].mxu0 %v432_v6  ;;  %8984 = vmatmul.mubr.msk.f32.gmra.mrb[68].mxu1 %vm591_vm4, %v431_v7  ;;  %v480_v6 = vld [vmem:[%s10230_s15 + $0x4b0] sm:$0xff]  ;;  %v527_v7 = vld [vmem:[%s10230_s15 + $0x628] sm:$0xff] }
  0xdf   : > { %1051 = vmatprep.mubr.f32.mxu0 %v436_v8  ;;  %8986 = vmatprep.mubr.msk.f32.mxu1 %vm591_vm4, %v434_v9  ;;  %v484_v8 = vld [vmem:[%s10230_s15 + $0x4d0] sm:$0xff]  ;;  %v530_v9 = vld [vmem:[%s10230_s15 + $0x640] sm:$0xff] }
  0xe2   : > { %1052 = vmatmul.mubr.f32.gmra.mrb[70].mxu0 %v435_v10  ;;  %8987 = vmatmul.mubr.msk.f32.gmra.mrb[70].mxu1 %vm591_vm4, %v437_v11  ;;  %v483_v10 = vld [vmem:[%s10230_s15 + $0x4c8] sm:$0xff]  ;;  %v533_v11 = vld [vmem:[%s10230_s15 + $0x658] sm:$0xff] }
  0xe3   : > { %1056 = vmatprep.mubr.f32.mxu0 %v439_v12  ;;  %8989 = vmatprep.mubr.msk.f32.mxu1 %vm591_vm4, %v440_v13  ;;  %v487_v12 = vld [vmem:[%s10230_s15 + $0x4e8] sm:$0xff]  ;;  %v536_v13 = vld [vmem:[%s10230_s15 + $0x670] sm:$0xff] }
  0xe6   : > { %1057 = vmatmul.mubr.f32.gmra.mrb[72].mxu0 %v438_v14  ;;  %8990 = vmatmul.mubr.msk.f32.gmra.mrb[72].mxu1 %vm591_vm4, %v443_v15  ;;  %v486_v14 = vld [vmem:[%s10230_s15 + $0x4e0] sm:$0xff]  ;;  %v539_v15 = vld [vmem:[%s10230_s15 + $0x688] sm:$0xff] }
  0xe7   : > { %1061 = vmatprep.mubr.f32.mxu0 %v442_v16  ;;  %8992 = vmatprep.mubr.msk.f32.mxu1 %vm591_vm4, %v446_v17  ;;  %v490_v16 = vld [vmem:[%s10230_s15 + $0x500] sm:$0xff] }
  0xe8   : > { %v542_v17 = vld [vmem:[%s10230_s15 + $0x6a0] sm:$0xff] }
  0xea   : > { %1062 = vmatmul.mubr.f32.gmra.mrb[74].mxu0 %v441_v18  ;;  %8993 = vmatmul.mubr.msk.f32.gmra.mrb[74].mxu1 %vm591_vm4, %v449_v19  ;;  %v489_v18 = vld [vmem:[%s10230_s15 + $0x4f8] sm:$0xff] }
  0xeb   : > { %1066 = vmatprep.mubr.f32.mxu0 %v445_v20  ;;  %8995 = vmatprep.mubr.msk.f32.mxu1 %vm591_vm4, %v452_v21  ;;  %v545_v19 = vld [vmem:[%s10230_s15 + $0x6b8] sm:$0xff]  ;;  %s2040_s15 = smul.u32 576, %s10222_s10 }
  0xed   : > { %s10763_s22 = scalar_lea.vmem [#allocation2], %s2040_s15 }
  0xee   : > { %1067 = vmatmul.mubr.f32.gmra.mrb[76].mxu0 %v444_v22  ;;  %8996 = vmatmul.mubr.msk.f32.gmra.mrb[76].mxu1 %vm591_vm4, %v455_v23 }
  0xef   : > { %1071 = vmatprep.mubr.f32.mxu0 %v448_v24  ;;  %8998 = vmatprep.mubr.msk.f32.mxu1 %vm591_vm4, %v458_v25 }
  0xf2   : > { %1072 = vmatmul.mubr.f32.gmra.mrb[78].mxu0 %v447_v26  ;;  %8999 = vmatmul.mubr.msk.f32.gmra.mrb[78].mxu1 %vm591_vm4, %v461_v27 }
  0xf3   : > { %1076 = vmatprep.mubr.f32.mxu0 %v451_v28  ;;  %9001 = vmatprep.mubr.msk.f32.mxu1 %vm591_vm4, %v464_v29 }
  0xf6   : > { %1077 = vmatmul.mubr.f32.gmra.mrb[80].mxu0 %v450_v30  ;;  %9002 = vmatmul.mubr.msk.f32.gmra.mrb[80].mxu1 %vm591_vm4, %v467_v31 }
  0xf7   : > { %1081 = vmatprep.mubr.f32.mxu0 %v454_v32  ;;  %9004 = vmatprep.mubr.msk.f32.mxu1 %vm591_vm4, %v470_v33 }
  0xfa   : > { %1082 = vmatmul.mubr.f32.gmra.mrb[82].mxu0 %v453_v34  ;;  %9005 = vmatmul.mubr.msk.f32.gmra.mrb[82].mxu1 %vm591_vm4, %v473_v35 }
  0xfb   : > { %1086 = vmatprep.mubr.f32.mxu0 %v457_v36  ;;  %9007 = vmatprep.mubr.msk.f32.mxu1 %vm591_vm4, %v476_v37 }
  0xfe   : > { %1087 = vmatmul.mubr.f32.gmra.mrb[84].mxu0 %v456_v38  ;;  %9008 = vmatmul.mubr.msk.f32.gmra.mrb[84].mxu1 %vm591_vm4, %v479_v39 }
  0xff   : > { %1091 = vmatprep.mubr.f32.mxu0 %v460_v40  ;;  %9010 = vmatprep.mubr.msk.f32.mxu1 %vm591_vm4, %v482_v41 }
 0x102   : > { %1092 = vmatmul.mubr.f32.gmra.mrb[86].mxu0 %v459_v42  ;;  %9011 = vmatmul.mubr.msk.f32.gmra.mrb[86].mxu1 %vm591_vm4, %v485_v43 }
 0x103   : > { %1096 = vmatprep.mubr.f32.mxu0 %v463_v44  ;;  %9013 = vmatprep.mubr.msk.f32.mxu1 %vm591_vm4, %v488_v45 }
 0x106   : > { %1097 = vmatmul.mubr.f32.gmra.mrb[88].mxu0 %v462_v46  ;;  %9014 = vmatmul.mubr.msk.f32.gmra.mrb[88].mxu1 %vm591_vm4, %v491_v47 }
 0x107   : > { %1101 = vmatprep.mubr.f32.mxu0 %v466_v48  ;;  %9016 = vmatprep.mubr.msk.f32.mxu1 %vm591_vm4, %v494_v49 }
 0x10a   : > { %1102 = vmatmul.mubr.f32.gmra.mrb[90].mxu0 %v465_v50  ;;  %9017 = vmatmul.mubr.msk.f32.gmra.mrb[90].mxu1 %vm591_vm4, %v497_v51 }
 0x10b   : > { %1106 = vmatprep.mubr.f32.mxu0 %v469_v52  ;;  %9019 = vmatprep.mubr.msk.f32.mxu1 %vm591_vm4, %v500_v53 }
 0x10e   : > { %1107 = vmatmul.mubr.f32.gmra.mrb[92].mxu0 %v468_v54  ;;  %9020 = vmatmul.mubr.msk.f32.gmra.mrb[92].mxu1 %vm591_vm4, %v503_v55 }
 0x10f   : > { %1111 = vmatprep.mubr.f32.mxu0 %v472_v56  ;;  %9022 = vmatprep.mubr.msk.f32.mxu1 %vm591_vm4, %v506_v57 }
 0x112   : > { %1112 = vmatmul.mubr.f32.gmra.mrb[94].mxu0 %v471_v58  ;;  %9023 = vmatmul.mubr.msk.f32.gmra.mrb[94].mxu1 %vm591_vm4, %v509_v59 }
 0x113   : > { %1116 = vmatprep.mubr.f32.mxu0 %v475_v60  ;;  %9025 = vmatprep.mubr.msk.f32.mxu1 %vm591_vm4, %v512_v61 }
 0x116   : > { %1117 = vmatmul.mubr.f32.gmra.mrb[96].mxu0 %v474_v62  ;;  %9026 = vmatmul.mubr.msk.f32.gmra.mrb[96].mxu1 %vm591_vm4, %v515_v63 }
 0x117   : > { %1121 = vmatprep.mubr.f32.mxu0 %v478_v0  ;;  %9028 = vmatprep.mubr.msk.f32.mxu1 %vm591_vm4, %v518_v1 }
 0x11a   : > { %1122 = vmatmul.mubr.f32.gmra.mrb[98].mxu0 %v477_v2  ;;  %9029 = vmatmul.mubr.msk.f32.gmra.mrb[98].mxu1 %vm591_vm4, %v521_v3 }
 0x11b   : > { %1126 = vmatprep.mubr.f32.mxu0 %v481_v4  ;;  %9031 = vmatprep.mubr.msk.f32.mxu1 %vm591_vm4, %v524_v5 }
 0x11e   : > { %1127 = vmatmul.mubr.f32.gmra.mrb[100].mxu0 %v480_v6  ;;  %9032 = vmatmul.mubr.msk.f32.gmra.mrb[100].mxu1 %vm591_vm4, %v527_v7 }
 0x11f   : > { %1131 = vmatprep.mubr.f32.mxu0 %v484_v8  ;;  %9034 = vmatprep.mubr.msk.f32.mxu1 %vm591_vm4, %v530_v9 }
 0x122   : > { %1132 = vmatmul.mubr.f32.gmra.mrb[102].mxu0 %v483_v10  ;;  %9035 = vmatmul.mubr.msk.f32.gmra.mrb[102].mxu1 %vm591_vm4, %v533_v11 }
 0x123   : > { %1136 = vmatprep.mubr.f32.mxu0 %v487_v12  ;;  %9037 = vmatprep.mubr.msk.f32.mxu1 %vm591_vm4, %v536_v13 }
 0x126   : > { %1137 = vmatmul.mubr.f32.gmra.mrb[104].mxu0 %v486_v14  ;;  %9038 = vmatmul.mubr.msk.f32.gmra.mrb[104].mxu1 %vm591_vm4, %v539_v15 }
 0x127   : > { %1141 = vmatprep.mubr.f32.mxu0 %v490_v16  ;;  %9040 = vmatprep.mubr.msk.f32.mxu1 %vm591_vm4, %v542_v17 }
 0x129   : > { %v10675_v20 = vpop.f32.mrb[0].mxu0  ;;  %v10677_v21 = vpop.f32.mrb[0].mxu1 }
 0x12a   : > { %v880_v22 = vpop.f32.mrb[1].mxu0  ;;  %1142 = vmatmul.mubr.f32.gmra.mrb[106].mxu0 %v489_v18  ;;  %9041 = vmatmul.mubr.msk.f32.gmra.mrb[106].mxu1 %vm591_vm4, %v545_v19  ;;  %v1150_v23 = vpop.f32.mrb[1].mxu1 }
 0x12d   : > { %v10680_v24 = vpop.f32.mrb[2].mxu0  ;;  %v10682_v25 = vpop.f32.mrb[2].mxu1 }
 0x12e   : > { %v885_v26 = vpop.f32.mrb[3].mxu0  ;;  %v1155_v27 = vpop.f32.mrb[3].mxu1 }
 0x131   : > { %v10684_v28 = vpop.f32.mrb[4].mxu0  ;;  %v10686_v29 = vpop.f32.mrb[4].mxu1 }
 0x132   : > { %v890_v30 = vpop.f32.mrb[5].mxu0  ;;  %v1160_v31 = vpop.f32.mrb[5].mxu1 }
 0x135   : > { %v10688_v32 = vpop.f32.mrb[6].mxu0  ;;  %v10690_v33 = vpop.f32.mrb[6].mxu1 }
 0x136   : > { %v895_v34 = vpop.f32.mrb[7].mxu0  ;;  %v1165_v35 = vpop.f32.mrb[7].mxu1 }
 0x137   : > { %v10752_v34 = vld [vmem:[%s12836_s2] ss:$0 sm:$0xff] }
 0x139   : > { %v10692_v36 = vpop.f32.mrb[8].mxu0  ;;  %v10694_v37 = vpop.f32.mrb[8].mxu1 }
 0x13a   : > { %v900_v38 = vpop.f32.mrb[9].mxu0  ;;  %v1170_v39 = vpop.f32.mrb[9].mxu1 }
 0x13b   : > { %v884_v39 = vadd.f32 %v10752_v34, %v10680_v24 }
 0x13d   : > { %v10696_v40 = vpop.f32.mrb[10].mxu0  ;;  %v10698_v41 = vpop.f32.mrb[10].mxu1 }
 0x13e   : > { %v905_v42 = vpop.f32.mrb[11].mxu0  ;;  %v1175_v43 = vpop.f32.mrb[11].mxu1 }
 0x13f   : > { %v879_v42 = vadd.f32 %v10752_v34, %v10675_v20  ;;  %v889_v20 = vadd.f32 %v10752_v34, %v10684_v28  ;;  %v904_v28 = vadd.f32 %v10752_v34, %v10696_v40 }
 0x141   : > { %v10700_v44 = vpop.f32.mrb[12].mxu0  ;;  %v10702_v45 = vpop.f32.mrb[12].mxu1 }
 0x142   : > { %v910_v46 = vpop.f32.mrb[13].mxu0  ;;  %v1180_v47 = vpop.f32.mrb[13].mxu1 }
 0x145   : > { %v10704_v48 = vpop.f32.mrb[14].mxu0  ;;  %v10706_v49 = vpop.f32.mrb[14].mxu1 }
 0x146   : > { %v915_v50 = vpop.f32.mrb[15].mxu0  ;;  %v1185_v51 = vpop.f32.mrb[15].mxu1 }
 0x149   : > { %v10708_v52 = vpop.f32.mrb[16].mxu0  ;;  %v10710_v53 = vpop.f32.mrb[16].mxu1 }
 0x14a   : > { %v920_v54 = vpop.f32.mrb[17].mxu0  ;;  %v1190_v55 = vpop.f32.mrb[17].mxu1 }
 0x14b   : > { %v894_v55 = vadd.f32 %v10752_v34, %v10688_v32 }
 0x14d   : > { %v10712_v56 = vpop.f32.mrb[18].mxu0  ;;  %v10714_v57 = vpop.f32.mrb[18].mxu1 }
 0x14e   : > { %v925_v58 = vpop.f32.mrb[19].mxu0  ;;  %v1195_v59 = vpop.f32.mrb[19].mxu1 }
 0x151   : > { %v10716_v60 = vpop.f32.mrb[20].mxu0  ;;  %v10718_v61 = vpop.f32.mrb[20].mxu1 }
 0x152   : > { %v930_v62 = vpop.f32.mrb[21].mxu0  ;;  %v1200_v63 = vpop.f32.mrb[21].mxu1 }
 0x155   : > { %v10720_v0 = vpop.f32.mrb[22].mxu0  ;;  %v10722_v1 = vpop.f32.mrb[22].mxu1 }
 0x156   : > { %v935_v2 = vpop.f32.mrb[23].mxu0  ;;  %v1205_v3 = vpop.f32.mrb[23].mxu1 }
 0x159   : > { %v10724_v4 = vpop.f32.mrb[24].mxu0  ;;  %v10726_v5 = vpop.f32.mrb[24].mxu1 }
 0x15a   : > { %v940_v6 = vpop.f32.mrb[25].mxu0  ;;  %v1210_v7 = vpop.f32.mrb[25].mxu1 }
 0x15d   : > { %v10728_v8 = vpop.f32.mrb[26].mxu0  ;;  %v10730_v9 = vpop.f32.mrb[26].mxu1 }
 0x15e   : > { %v945_v10 = vpop.f32.mrb[27].mxu0  ;;  %v1215_v11 = vpop.f32.mrb[27].mxu1 }
 0x161   : > { %v10732_v12 = vpop.f32.mrb[28].mxu0  ;;  %v10734_v13 = vpop.f32.mrb[28].mxu1 }
 0x162   : > { %v950_v14 = vpop.f32.mrb[29].mxu0  ;;  %v1220_v15 = vpop.f32.mrb[29].mxu1 }
 0x165   : > { %v10736_v16 = vpop.f32.mrb[30].mxu0  ;;  %v10738_v17 = vpop.f32.mrb[30].mxu1 }
 0x166   : > { %v955_v18 = vpop.f32.mrb[31].mxu0  ;;  %v1225_v19 = vpop.f32.mrb[31].mxu1 }
 0x167   : > { %v899_v18 = vadd.f32 %v10752_v34, %v10692_v36 }
 0x169   : > { %v10740_v22 = vpop.f32.mrb[32].mxu0  ;;  %v10742_v23 = vpop.f32.mrb[32].mxu1 }
 0x16a   : > { %v960_v26 = vpop.f32.mrb[33].mxu0  ;;  %v1230_v27 = vpop.f32.mrb[33].mxu1 }
 0x16d   : > { %v10744_v30 = vpop.f32.mrb[34].mxu0  ;;  %v10746_v31 = vpop.f32.mrb[34].mxu1 }
 0x16e   : > { %v965_v35 = vpop.f32.mrb[35].mxu0  ;;  %v1235_v38 = vpop.f32.mrb[35].mxu1 }
 0x171   : > { %v10758_v43 = vpop.f32.mrb[36].mxu0  ;;  %v8937_v46 = vpop.f32.mrb[36].mxu1 }
 0x172   : > { %v1309_v47 = vadd.f32 %v8937_v46, %v884_v39  ;;  %v970_v50 = vpop.f32.mrb[37].mxu0  ;;  %v1303_v51 = vpop.f32.mrb[37].mxu1 }
 0x173   : > { %v1304_v54 = vadd.f32 %v1303_v51, %v879_v42  ;;  %v909_v51 = vadd.f32 %v10752_v34, %v10700_v44 }
 0x174   : > { %v1665_v58 = vsel %vm1663_vm5, %v1309_v47, 0.0  ;;  %v1818_v59 = vmul.f32 %v1309_v47, %v1309_v47  ;;  %2043 = vst.msk [vmem:[%s10763_s22 + $0x8] sm:$0xff] %vm1663_vm5, %v1309_v47 }
 0x175   : > { %v1664_v24 = vsel %vm1663_vm5, %v1304_v54, 0.0  ;;  %v1817_v62 = vmul.f32 %v1304_v54, %v1304_v54  ;;  %2042 = vst.msk [vmem:[%s10763_s22] sm:$0xff] %vm1663_vm5, %v1304_v54  ;;  %v10772_v63 = vpop.f32.mrb[38].mxu0  ;;  %v8940_v32 = vpop.f32.mrb[38].mxu1  ;;  %v914_v54 = vadd.f32 %v10752_v34, %v10704_v48 }
 0x176   : > { %v1890_v2 = vsel %vm1663_vm5, %v1818_v59, 0.0  ;;  %v1666_v3 = vadd.f32 %v1665_v58, %v1664_v24  ;;  %v1319_v6 = vadd.f32 %v8940_v32, %v894_v55  ;;  %v975_v7 = vpop.f32.mrb[39].mxu0  ;;  %v1313_v10 = vpop.f32.mrb[39].mxu1 }
 0x177   : > { %v1889_v11 = vsel %vm1663_vm5, %v1817_v62, 0.0  ;;  %v1314_v14 = vadd.f32 %v1313_v10, %v889_v20 }
 0x178   : > { %v1891_v15 = vadd.f32 %v1890_v2, %v1889_v11  ;;  %2045 = vst.msk [vmem:[%s10763_s22 + $0x18] sm:$0xff] %vm1663_vm5, %v1319_v6  ;;  %v1820_v19 = vmul.f32 %v1319_v6, %v1319_v6  ;;  %v1669_v47 = vsel %vm1663_vm5, %v1319_v6, 0.0 }
 0x179   : > { %v1667_v26 = vsel %vm1663_vm5, %v1314_v14, 0.0  ;;  %v1819_v27 = vmul.f32 %v1314_v14, %v1314_v14  ;;  %2044 = vst.msk [vmem:[%s10763_s22 + $0x10] sm:$0xff] %vm1663_vm5, %v1314_v14  ;;  %v10785_v35 = vpop.f32.mrb[40].mxu0  ;;  %v8943_v38 = vpop.f32.mrb[40].mxu1 }
 0x17a   : > { %v1668_v39 = vadd.f32 %v1667_v26, %v1666_v3  ;;  %v1329_v42 = vadd.f32 %v8943_v38, %v904_v28  ;;  %v980_v40 = vpop.f32.mrb[41].mxu0  ;;  %v1323_v46 = vpop.f32.mrb[41].mxu1  ;;  %v1894_v59 = vsel %vm1663_vm5, %v1820_v19, 0.0  ;;  %v919_v28 = vadd.f32 %v10752_v34, %v10708_v52 }
 0x17b   : > { %v1892_v50 = vsel %vm1663_vm5, %v1819_v27, 0.0  ;;  %v1324_v36 = vadd.f32 %v1323_v46, %v899_v18 }
 0x17c   : > { %v1893_v55 = vadd.f32 %v1892_v50, %v1891_v15  ;;  %2047 = vst.msk [vmem:[%s10763_s22 + $0x28] sm:$0xff] %vm1663_vm5, %v1329_v42  ;;  %v1670_v58 = vadd.f32 %v1669_v47, %v1668_v39  ;;  %v1822_v20 = vmul.f32 %v1329_v42, %v1329_v42  ;;  %v1673_v7 = vsel %vm1663_vm5, %v1329_v42, 0.0 }
 0x17d   : > { %v1671_v24 = vsel %vm1663_vm5, %v1324_v36, 0.0  ;;  %v1821_v62 = vmul.f32 %v1324_v36, %v1324_v36  ;;  %2046 = vst.msk [vmem:[%s10763_s22 + $0x20] sm:$0xff] %vm1663_vm5, %v1324_v36  ;;  %v10799_v32 = vpop.f32.mrb[42].mxu0  ;;  %v8946_v2 = vpop.f32.mrb[42].mxu1  ;;  %v924_v15 = vadd.f32 %v10752_v34, %v10712_v56 }
 0x17e   : > { %v1672_v44 = vadd.f32 %v1671_v24, %v1670_v58  ;;  %v1895_v3 = vadd.f32 %v1894_v59, %v1893_v55  ;;  %v985_v48 = vpop.f32.mrb[43].mxu0  ;;  %v1333_v6 = vpop.f32.mrb[43].mxu1  ;;  %v1339_v11 = vadd.f32 %v8946_v2, %v914_v54  ;;  %v1898_v26 = vsel %vm1663_vm5, %v1822_v20, 0.0 }
 0x17f   : > { %v1896_v10 = vsel %vm1663_vm5, %v1821_v62, 0.0  ;;  %v1334_v14 = vadd.f32 %v1333_v6, %v909_v51  ;;  %v929_v55 = vadd.f32 %v10752_v34, %v10716_v60  ;;  %v934_v58 = vadd.f32 %v10752_v34, %v10720_v0 }
 0x180   : > { %v1897_v18 = vadd.f32 %v1896_v10, %v1895_v3  ;;  %v1674_v19 = vadd.f32 %v1673_v7, %v1672_v44  ;;  %v1824_v27 = vmul.f32 %v1339_v11, %v1339_v11  ;;  %2049 = vst.msk [vmem:[%s10763_s22 + $0x38] sm:$0xff] %vm1663_vm5, %v1339_v11  ;;  %v1677_v36 = vsel %vm1663_vm5, %v1339_v11, 0.0 }
 0x181   : > { %v1675_v38 = vsel %vm1663_vm5, %v1334_v14, 0.0  ;;  %v1823_v39 = vmul.f32 %v1334_v14, %v1334_v14  ;;  %2048 = vst.msk [vmem:[%s10763_s22 + $0x30] sm:$0xff] %vm1663_vm5, %v1334_v14  ;;  %v10813_v42 = vpop.f32.mrb[44].mxu0  ;;  %v8949_v40 = vpop.f32.mrb[44].mxu1 }
 0x182   : > { %v1676_v52 = vadd.f32 %v1675_v38, %v1674_v19  ;;  %v1899_v46 = vadd.f32 %v1898_v26, %v1897_v18  ;;  %v1349_v56 = vadd.f32 %v8949_v40, %v924_v15  ;;  %v990_v47 = vpop.f32.mrb[45].mxu0  ;;  %v1343_v50 = vpop.f32.mrb[45].mxu1  ;;  %v1902_v24 = vsel %vm1663_vm5, %v1824_v27, 0.0 }
 0x183   : > { %v1900_v51 = vsel %vm1663_vm5, %v1823_v39, 0.0  ;;  %v1344_v54 = vadd.f32 %v1343_v50, %v919_v28  ;;  %v939_v15 = vadd.f32 %v10752_v34, %v10724_v4  ;;  %v944_v18 = vadd.f32 %v10752_v34, %v10728_v8 }
 0x184   : > { %v1901_v59 = vadd.f32 %v1900_v51, %v1899_v46  ;;  %2051 = vst.msk [vmem:[%s10763_s22 + $0x48] sm:$0xff] %vm1663_vm5, %v1349_v56  ;;  %v1678_v20 = vadd.f32 %v1677_v36, %v1676_v52  ;;  %v1826_v62 = vmul.f32 %v1349_v56, %v1349_v56  ;;  %v1681_v10 = vsel %vm1663_vm5, %v1349_v56, 0.0 }
 0x185   : > { %v1679_v2 = vsel %vm1663_vm5, %v1344_v54, 0.0  ;;  %v1825_v44 = vmul.f32 %v1344_v54, %v1344_v54  ;;  %2050 = vst.msk [vmem:[%s10763_s22 + $0x40] sm:$0xff] %vm1663_vm5, %v1344_v54  ;;  %v10827_v3 = vpop.f32.mrb[46].mxu0  ;;  %v8952_v48 = vpop.f32.mrb[46].mxu1 }
 0x186   : > { %v1680_v60 = vadd.f32 %v1679_v2, %v1678_v20  ;;  %v1903_v6 = vadd.f32 %v1902_v24, %v1901_v59  ;;  %v995_v0 = vpop.f32.mrb[47].mxu0  ;;  %v1353_v7 = vpop.f32.mrb[47].mxu1  ;;  %v1359_v14 = vadd.f32 %v8952_v48, %v934_v58  ;;  %v1906_v27 = vsel %vm1663_vm5, %v1826_v62, 0.0 }
 0x187   : > { %v1904_v11 = vsel %vm1663_vm5, %v1825_v44, 0.0  ;;  %v1354_v28 = vadd.f32 %v1353_v7, %v929_v55  ;;  %v949_v55 = vadd.f32 %v10752_v34, %v10732_v12  ;;  %v954_v58 = vadd.f32 %v10752_v34, %v10736_v16 }
 0x188   : > { %v1905_v19 = vadd.f32 %v1904_v11, %v1903_v6  ;;  %v1682_v26 = vadd.f32 %v1681_v10, %v1680_v60  ;;  %v1828_v38 = vmul.f32 %v1359_v14, %v1359_v14  ;;  %2053 = vst.msk [vmem:[%s10763_s22 + $0x58] sm:$0xff] %vm1663_vm5, %v1359_v14  ;;  %v1685_v36 = vsel %vm1663_vm5, %v1359_v14, 0.0 }
 0x189   : > { %v1683_v39 = vsel %vm1663_vm5, %v1354_v28, 0.0  ;;  %v1827_v40 = vmul.f32 %v1354_v28, %v1354_v28  ;;  %2052 = vst.msk [vmem:[%s10763_s22 + $0x50] sm:$0xff] %vm1663_vm5, %v1354_v28  ;;  %v10841_v52 = vpop.f32.mrb[48].mxu0  ;;  %v8955_v46 = vpop.f32.mrb[48].mxu1  ;;  %v959_v28 = vadd.f32 %v10752_v34, %v10740_v22 }
 0x18a   : > { %v1684_v4 = vadd.f32 %v1683_v39, %v1682_v26  ;;  %v1907_v56 = vadd.f32 %v1906_v27, %v1905_v19  ;;  %v1369_v8 = vadd.f32 %v8955_v46, %v944_v18  ;;  %v1000_v47 = vpop.f32.mrb[49].mxu0  ;;  %v1363_v50 = vpop.f32.mrb[49].mxu1  ;;  %v1910_v24 = vsel %vm1663_vm5, %v1828_v38, 0.0 }
 0x18b   : > { %v1908_v51 = vsel %vm1663_vm5, %v1827_v40, 0.0  ;;  %v1364_v54 = vadd.f32 %v1363_v50, %v939_v15  ;;  %v964_v15 = vadd.f32 %v10752_v34, %v10744_v30 }
 0x18c   : > { %v1909_v59 = vadd.f32 %v1908_v51, %v1907_v56  ;;  %2055 = vst.msk [vmem:[%s10763_s22 + $0x68] sm:$0xff] %vm1663_vm5, %v1369_v8  ;;  %v1686_v20 = vadd.f32 %v1685_v36, %v1684_v4  ;;  %v1830_v62 = vmul.f32 %v1369_v8, %v1369_v8  ;;  %v1689_v7 = vsel %vm1663_vm5, %v1369_v8, 0.0 }
 0x18d   : > { %v1687_v2 = vsel %vm1663_vm5, %v1364_v54, 0.0  ;;  %v1829_v44 = vmul.f32 %v1364_v54, %v1364_v54  ;;  %2054 = vst.msk [vmem:[%s10763_s22 + $0x60] sm:$0xff] %vm1663_vm5, %v1364_v54  ;;  %v10855_v48 = vpop.f32.mrb[50].mxu0  ;;  %v8958_v60 = vpop.f32.mrb[50].mxu1  ;;  %v969_v51 = vadd.f32 %v10752_v34, %v10758_v43  ;;  %v974_v54 = vadd.f32 %v10752_v34, %v10772_v63 }
 0x18e   : > { %v1688_v12 = vadd.f32 %v1687_v2, %v1686_v20  ;;  %v1911_v6 = vadd.f32 %v1910_v24, %v1909_v59  ;;  %v1005_v16 = vpop.f32.mrb[51].mxu0  ;;  %v1373_v0 = vpop.f32.mrb[51].mxu1  ;;  %v1379_v11 = vadd.f32 %v8958_v60, %v954_v58  ;;  %v1914_v26 = vsel %vm1663_vm5, %v1830_v62, 0.0 }
 0x18f   : > { %v1912_v10 = vsel %vm1663_vm5, %v1829_v44, 0.0  ;;  %v1374_v14 = vadd.f32 %v1373_v0, %v949_v55 }
 0x190   : > { %v1913_v18 = vadd.f32 %v1912_v10, %v1911_v6  ;;  %v1690_v19 = vadd.f32 %v1689_v7, %v1688_v12  ;;  %v1832_v27 = vmul.f32 %v1379_v11, %v1379_v11  ;;  %2057 = vst.msk [vmem:[%s10763_s22 + $0x78] sm:$0xff] %vm1663_vm5, %v1379_v11  ;;  %v1693_v47 = vsel %vm1663_vm5, %v1379_v11, 0.0 }
 0x191   : > { %v1691_v38 = vsel %vm1663_vm5, %v1374_v14, 0.0  ;;  %v1831_v39 = vmul.f32 %v1374_v14, %v1374_v14  ;;  %2056 = vst.msk [vmem:[%s10763_s22 + $0x70] sm:$0xff] %vm1663_vm5, %v1374_v14  ;;  %v10869_v40 = vpop.f32.mrb[52].mxu0  ;;  %v8961_v46 = vpop.f32.mrb[52].mxu1  ;;  %v979_v10 = vadd.f32 %v10752_v34, %v10785_v35  ;;  %v984_v11 = vadd.f32 %v10752_v34, %v10799_v32 }
 0x192   : > { %v1692_v22 = vadd.f32 %v1691_v38, %v1690_v19  ;;  %v1915_v4 = vadd.f32 %v1914_v26, %v1913_v18  ;;  %v1389_v30 = vadd.f32 %v8961_v46, %v964_v15  ;;  %v1010_v56 = vpop.f32.mrb[53].mxu0  ;;  %v1383_v8 = vpop.f32.mrb[53].mxu1  ;;  %v1918_v59 = vsel %vm1663_vm5, %v1832_v27, 0.0 }
 0x193   : > { %v1916_v50 = vsel %vm1663_vm5, %v1831_v39, 0.0  ;;  %v1384_v36 = vadd.f32 %v1383_v8, %v959_v28  ;;  %v989_v8 = vadd.f32 %v10752_v34, %v10813_v42 }
 0x194   : > { %v1917_v55 = vadd.f32 %v1916_v50, %v1915_v4  ;;  %2059 = vst.msk [vmem:[%s10763_s22 + $0x88] sm:$0xff] %vm1663_vm5, %v1389_v30  ;;  %v1694_v58 = vadd.f32 %v1693_v47, %v1692_v22  ;;  %v1834_v20 = vmul.f32 %v1389_v30, %v1389_v30  ;;  %v1697_v6 = vsel %vm1663_vm5, %v1389_v30, 0.0 }
 0x195   : > { %v1695_v24 = vsel %vm1663_vm5, %v1384_v36, 0.0  ;;  %v1833_v62 = vmul.f32 %v1384_v36, %v1384_v36  ;;  %2058 = vst.msk [vmem:[%s10763_s22 + $0x80] sm:$0xff] %vm1663_vm5, %v1384_v36  ;;  %v10883_v2 = vpop.f32.mrb[54].mxu0  ;;  %v8964_v44 = vpop.f32.mrb[54].mxu1  ;;  %v994_v47 = vadd.f32 %v10752_v34, %v10827_v3 }
 0x196   : > { %v1696_v43 = vadd.f32 %v1695_v24, %v1694_v58  ;;  %v1919_v60 = vadd.f32 %v1918_v59, %v1917_v55  ;;  %v1015_v63 = vpop.f32.mrb[55].mxu0  ;;  %v1393_v12 = vpop.f32.mrb[55].mxu1  ;;  %v1399_v0 = vadd.f32 %v8964_v44, %v974_v54  ;;  %v1922_v15 = vsel %vm1663_vm5, %v1834_v20, 0.0 }
 0x197   : > { %v1920_v16 = vsel %vm1663_vm5, %v1833_v62, 0.0  ;;  %v1394_v7 = vadd.f32 %v1393_v12, %v969_v51  ;;  %v999_v12 = vadd.f32 %v10752_v34, %v10841_v52 }
 0x198   : > { %v1921_v14 = vadd.f32 %v1920_v16, %v1919_v60  ;;  %v1698_v28 = vadd.f32 %v1697_v6, %v1696_v43  ;;  %v1836_v18 = vmul.f32 %v1399_v0, %v1399_v0  ;;  %2061 = vst.msk [vmem:[%s10763_s22 + $0x98] sm:$0xff] %vm1663_vm5, %v1399_v0  ;;  %v1701_v4 = vsel %vm1663_vm5, %v1399_v0, 0.0 }
 0x199   : > { %v1699_v19 = vsel %vm1663_vm5, %v1394_v7, 0.0  ;;  %v1835_v26 = vmul.f32 %v1394_v7, %v1394_v7  ;;  %2060 = vst.msk [vmem:[%s10763_s22 + $0x90] sm:$0xff] %vm1663_vm5, %v1394_v7  ;;  %v10897_v27 = vpop.f32.mrb[56].mxu0  ;;  %v8967_v38 = vpop.f32.mrb[56].mxu1  ;;  %v1004_v6 = vadd.f32 %v10752_v34, %v10855_v48 }
 0x19a   : > { %v1700_v35 = vadd.f32 %v1699_v19, %v1698_v28  ;;  %v1923_v39 = vadd.f32 %v1922_v15, %v1921_v14  ;;  %v1409_v32 = vadd.f32 %v8967_v38, %v984_v11  ;;  %v1020_v46 = vpop.f32.mrb[57].mxu0  ;;  %v1403_v22 = vpop.f32.mrb[57].mxu1  ;;  %v1926_v51 = vsel %vm1663_vm5, %v1836_v18, 0.0 }
 0x19b   : > { %v1924_v30 = vsel %vm1663_vm5, %v1835_v26, 0.0  ;;  %v1404_v56 = vadd.f32 %v1403_v22, %v979_v10  ;;  %v1014_v46 = vadd.f32 %v10752_v34, %v10883_v2 }
 0x19c   : > { %v1925_v50 = vadd.f32 %v1924_v30, %v1923_v39  ;;  %2063 = vst.msk [vmem:[%s10763_s22 + $0xa8] sm:$0xff] %vm1663_vm5, %v1409_v32  ;;  %v1702_v36 = vadd.f32 %v1701_v4, %v1700_v35  ;;  %v1838_v54 = vmul.f32 %v1409_v32, %v1409_v32  ;;  %v1705_v44 = vsel %vm1663_vm5, %v1409_v32, 0.0 }
 0x19d   : > { %v1703_v55 = vsel %vm1663_vm5, %v1404_v56, 0.0  ;;  %v1837_v58 = vmul.f32 %v1404_v56, %v1404_v56  ;;  %2062 = vst.msk [vmem:[%s10763_s22 + $0xa0] sm:$0xff] %vm1663_vm5, %v1404_v56  ;;  %v1023_v59 = vpop.f32.mrb[58].mxu0  ;;  %v8970_v20 = vpop.f32.mrb[58].mxu1  ;;  %v1009_v32 = vadd.f32 %v10752_v34, %v10869_v40 }
 0x19e   : > { %v1704_v24 = vadd.f32 %v1703_v55, %v1702_v36  ;;  %v1927_v42 = vadd.f32 %v1926_v51, %v1925_v50  ;;  %v1025_v62 = vpop.f32.mrb[59].mxu0  ;;  %v1413_v3 = vpop.f32.mrb[59].mxu1  ;;  %v1419_v60 = vadd.f32 %v8970_v20, %v994_v47  ;;  %v1930_v7 = vsel %vm1663_vm5, %v1838_v54, 0.0 }
 0x19f   : > { %v1928_v43 = vsel %vm1663_vm5, %v1837_v58, 0.0  ;;  %v1414_v63 = vadd.f32 %v1413_v3, %v989_v8  ;;  %v1024_v62 = vadd.f32 %v10752_v34, %v1023_v59 }
 0x1a0   : > { %v1929_v16 = vadd.f32 %v1928_v43, %v1927_v42  ;;  %v1706_v0 = vadd.f32 %v1705_v44, %v1704_v24  ;;  %v1840_v10 = vmul.f32 %v1419_v60, %v1419_v60  ;;  %2065 = vst.msk [vmem:[%s10763_s22 + $0xb8] sm:$0xff] %vm1663_vm5, %v1419_v60  ;;  %v1709_v38 = vsel %vm1663_vm5, %v1419_v60, 0.0 }
 0x1a1   : > { %v1707_v11 = vsel %vm1663_vm5, %v1414_v63, 0.0  ;;  %v1839_v14 = vmul.f32 %v1414_v63, %v1414_v63  ;;  %2064 = vst.msk [vmem:[%s10763_s22 + $0xb0] sm:$0xff] %vm1663_vm5, %v1414_v63  ;;  %v1028_v28 = vpop.f32.mrb[60].mxu0  ;;  %v8973_v15 = vpop.f32.mrb[60].mxu1  ;;  %v1019_v42 = vadd.f32 %v10752_v34, %v10897_v27 }
 0x1a2   : > { %v1708_v18 = vadd.f32 %v1707_v11, %v1706_v0  ;;  %v1931_v52 = vadd.f32 %v1930_v7, %v1929_v16  ;;  %v1429_v19 = vadd.f32 %v8973_v15, %v1004_v6  ;;  %v1030_v48 = vpop.f32.mrb[61].mxu0  ;;  %v1423_v26 = vpop.f32.mrb[61].mxu1  ;;  %v1934_v30 = vsel %vm1663_vm5, %v1840_v10, 0.0 }
 0x1a3   : > { %v1932_v35 = vsel %vm1663_vm5, %v1839_v14, 0.0  ;;  %v1424_v39 = vadd.f32 %v1423_v26, %v999_v12 }
 0x1a4   : > { %v1933_v22 = vadd.f32 %v1932_v35, %v1931_v52  ;;  %2067 = vst.msk [vmem:[%s10763_s22 + $0xc8] sm:$0xff] %vm1663_vm5, %v1429_v19  ;;  %v1710_v4 = vadd.f32 %v1709_v38, %v1708_v18  ;;  %v1842_v56 = vmul.f32 %v1429_v19, %v1429_v19  ;;  %v1713_v55 = vsel %vm1663_vm5, %v1429_v19, 0.0 }
 0x1a5   : > { %v1711_v8 = vsel %vm1663_vm5, %v1424_v39, 0.0  ;;  %v1841_v47 = vmul.f32 %v1424_v39, %v1424_v39  ;;  %2066 = vst.msk [vmem:[%s10763_s22 + $0xc0] sm:$0xff] %vm1663_vm5, %v1424_v39  ;;  %v1033_v50 = vpop.f32.mrb[62].mxu0  ;;  %v8976_v36 = vpop.f32.mrb[62].mxu1  ;;  %v1029_v18 = vadd.f32 %v10752_v34, %v1028_v28 }
 0x1a6   : > { %v1712_v51 = vadd.f32 %v1711_v8, %v1710_v4  ;;  %v1935_v40 = vadd.f32 %v1934_v30, %v1933_v22  ;;  %v1035_v54 = vpop.f32.mrb[63].mxu0  ;;  %v1433_v2 = vpop.f32.mrb[63].mxu1  ;;  %v1439_v20 = vadd.f32 %v8976_v36, %v1014_v46  ;;  %v1938_v43 = vsel %vm1663_vm5, %v1842_v56, 0.0 }
 0x1a7   : > { %v1936_v58 = vsel %vm1663_vm5, %v1841_v47, 0.0  ;;  %v1434_v24 = vadd.f32 %v1433_v2, %v1009_v32  ;;  %v1034_v52 = vadd.f32 %v10752_v34, %v1033_v50 }
 0x1a8   : > { %v1937_v3 = vadd.f32 %v1936_v58, %v1935_v40  ;;  %v1714_v44 = vadd.f32 %v1713_v55, %v1712_v51  ;;  %v1844_v60 = vmul.f32 %v1439_v20, %v1439_v20  ;;  %2069 = vst.msk [vmem:[%s10763_s22 + $0xd8] sm:$0xff] %vm1663_vm5, %v1439_v20  ;;  %v1717_v11 = vsel %vm1663_vm5, %v1439_v20, 0.0 }
 0x1a9   : > { %v1715_v63 = vsel %vm1663_vm5, %v1434_v24, 0.0  ;;  %v1843_v12 = vmul.f32 %v1434_v24, %v1434_v24  ;;  %2068 = vst.msk [vmem:[%s10763_s22 + $0xd0] sm:$0xff] %vm1663_vm5, %v1434_v24  ;;  %v1038_v6 = vpop.f32.mrb[64].mxu0  ;;  %v8979_v16 = vpop.f32.mrb[64].mxu1 }
 0x1aa   : > { %v1716_v0 = vadd.f32 %v1715_v63, %v1714_v44  ;;  %v1939_v7 = vadd.f32 %v1938_v43, %v1937_v3  ;;  %v1449_v27 = vadd.f32 %v8979_v16, %v1024_v62  ;;  %v1040_v59 = vpop.f32.mrb[65].mxu0  ;;  %v1443_v10 = vpop.f32.mrb[65].mxu1  ;;  %v1942_v26 = vsel %vm1663_vm5, %v1844_v60, 0.0 }
 0x1ab   : > { %v1940_v14 = vsel %vm1663_vm5, %v1843_v12, 0.0  ;;  %v1444_v15 = vadd.f32 %v1443_v10, %v1019_v42  ;;  %v1039_v36 = vadd.f32 %v10752_v34, %v1038_v6 }
 0x1ac   : > { %v1941_v19 = vadd.f32 %v1940_v14, %v1939_v7  ;;  %2071 = vst.msk [vmem:[%s10763_s22 + $0xe8] sm:$0xff] %vm1663_vm5, %v1449_v27  ;;  %v1718_v48 = vadd.f32 %v1717_v11, %v1716_v0  ;;  %v1846_v38 = vmul.f32 %v1449_v27, %v1449_v27  ;;  %v1721_v56 = vsel %vm1663_vm5, %v1449_v27, 0.0 }
 0x1ad   : > { %v1719_v35 = vsel %vm1663_vm5, %v1444_v15, 0.0  ;;  %v1845_v39 = vmul.f32 %v1444_v15, %v1444_v15  ;;  %2070 = vst.msk [vmem:[%s10763_s22 + $0xe0] sm:$0xff] %vm1663_vm5, %v1444_v15  ;;  %v1043_v32 = vpop.f32.mrb[66].mxu0  ;;  %v8982_v46 = vpop.f32.mrb[66].mxu1 }
 0x1ae   : > { %v1720_v22 = vadd.f32 %v1719_v35, %v1718_v48  ;;  %v1943_v4 = vadd.f32 %v1942_v26, %v1941_v19  ;;  %v1045_v28 = vpop.f32.mrb[67].mxu0  ;;  %v1453_v30 = vpop.f32.mrb[67].mxu1  ;;  %v1459_v47 = vadd.f32 %v8982_v46, %v1034_v52  ;;  %v1044_v40 = vadd.f32 %v10752_v34, %v1043_v32 }
 0x1af   : > { %v1944_v8 = vsel %vm1663_vm5, %v1845_v39, 0.0  ;;  %v1454_v50 = vadd.f32 %v1453_v30, %v1029_v18  ;;  %v1946_v2 = vsel %vm1663_vm5, %v1846_v38, 0.0 }
 0x1b0   : > { %v1945_v51 = vadd.f32 %v1944_v8, %v1943_v4  ;;  %v1722_v54 = vadd.f32 %v1721_v56, %v1720_v22  ;;  %v1848_v55 = vmul.f32 %v1459_v47, %v1459_v47  ;;  %2073 = vst.msk [vmem:[%s10763_s22 + $0xf8] sm:$0xff] %vm1663_vm5, %v1459_v47  ;;  %v1725_v63 = vsel %vm1663_vm5, %v1459_v47, 0.0 }
 0x1b1   : > { %v1723_v58 = vsel %vm1663_vm5, %v1454_v50, 0.0  ;;  %v1847_v20 = vmul.f32 %v1454_v50, %v1454_v50  ;;  %2072 = vst.msk [vmem:[%s10763_s22 + $0xf0] sm:$0xff] %vm1663_vm5, %v1454_v50  ;;  %v1048_v24 = vpop.f32.mrb[68].mxu0  ;;  %v8985_v42 = vpop.f32.mrb[68].mxu1 }
 0x1b2   : > { %v1724_v62 = vadd.f32 %v1723_v58, %v1722_v54  ;;  %v1947_v3 = vadd.f32 %v1946_v2, %v1945_v51  ;;  %v1469_v44 = vadd.f32 %v8985_v42, %v1044_v40  ;;  %v1050_v43 = vpop.f32.mrb[69].mxu0  ;;  %v1463_v60 = vpop.f32.mrb[69].mxu1  ;;  %v1049_v0 = vadd.f32 %v10752_v34, %v1048_v24 }
 0x1b3   : > { %v1948_v12 = vsel %vm1663_vm5, %v1847_v20, 0.0  ;;  %v1464_v6 = vadd.f32 %v1463_v60, %v1039_v36  ;;  %v1950_v27 = vsel %vm1663_vm5, %v1848_v55, 0.0 }
 0x1b4   : > { %v1949_v16 = vadd.f32 %v1948_v12, %v1947_v3  ;;  %2075 = vst.msk [vmem:[%s10763_s22 + $0x108] sm:$0xff] %vm1663_vm5, %v1469_v44  ;;  %v1726_v7 = vadd.f32 %v1725_v63, %v1724_v62  ;;  %v1850_v59 = vmul.f32 %v1469_v44, %v1469_v44  ;;  %v1729_v38 = vsel %vm1663_vm5, %v1469_v44, 0.0 }
 0x1b5   : > { %v1727_v10 = vsel %vm1663_vm5, %v1464_v6, 0.0  ;;  %v1849_v11 = vmul.f32 %v1464_v6, %v1464_v6  ;;  %2074 = vst.msk [vmem:[%s10763_s22 + $0x100] sm:$0xff] %vm1663_vm5, %v1464_v6  ;;  %v1053_v14 = vpop.f32.mrb[70].mxu0  ;;  %v8988_v15 = vpop.f32.mrb[70].mxu1 }
 0x1b6   : > { %v1728_v18 = vadd.f32 %v1727_v10, %v1726_v7  ;;  %v1951_v52 = vadd.f32 %v1950_v27, %v1949_v16  ;;  %v1054_v19 = vadd.f32 %v10752_v34, %v1053_v14  ;;  %v1055_v48 = vpop.f32.mrb[71].mxu0  ;;  %v1473_v26 = vpop.f32.mrb[71].mxu1  ;;  %v1954_v4 = vsel %vm1663_vm5, %v1850_v59, 0.0 }
 0x1b7   : > { %v1952_v35 = vsel %vm1663_vm5, %v1849_v11, 0.0  ;;  %v1474_v39 = vadd.f32 %v1473_v26, %v1049_v0 }
 0x1b8   : > { %v1953_v32 = vadd.f32 %v1952_v35, %v1951_v52  ;;  %v1479_v46 = vadd.f32 %v8988_v15, %v1054_v19  ;;  %v1730_v22 = vadd.f32 %v1729_v38, %v1728_v18 }
 0x1b9   : > { %v1731_v28 = vsel %vm1663_vm5, %v1474_v39, 0.0  ;;  %v1851_v30 = vmul.f32 %v1474_v39, %v1474_v39  ;;  %2076 = vst.msk [vmem:[%s10763_s22 + $0x110] sm:$0xff] %vm1663_vm5, %v1474_v39  ;;  %v1058_v56 = vpop.f32.mrb[72].mxu0  ;;  %v8991_v8 = vpop.f32.mrb[72].mxu1 }
 0x1ba   : > { %v1733_v47 = vsel %vm1663_vm5, %v1479_v46, 0.0  ;;  %v1852_v50 = vmul.f32 %v1479_v46, %v1479_v46  ;;  %2077 = vst.msk [vmem:[%s10763_s22 + $0x118] sm:$0xff] %vm1663_vm5, %v1479_v46  ;;  %v1732_v36 = vadd.f32 %v1731_v28, %v1730_v22  ;;  %v1955_v51 = vadd.f32 %v1954_v4, %v1953_v32  ;;  %v1060_v40 = vpop.f32.mrb[73].mxu0  ;;  %v1483_v54 = vpop.f32.mrb[73].mxu1 }
 0x1bb   : > { %v1956_v2 = vsel %vm1663_vm5, %v1851_v30, 0.0  ;;  %v1059_v55 = vadd.f32 %v10752_v34, %v1058_v56 }
 0x1bc   : > { %v1958_v58 = vsel %vm1663_vm5, %v1852_v50, 0.0  ;;  %v1957_v20 = vadd.f32 %v1956_v2, %v1955_v51  ;;  %v1734_v24 = vadd.f32 %v1733_v47, %v1732_v36 }
 0x1bd   : > { %v1484_v42 = vadd.f32 %v1483_v54, %v1059_v55  ;;  %v1063_v62 = vpop.f32.mrb[74].mxu0  ;;  %v8994_v3 = vpop.f32.mrb[74].mxu1 }
 0x1be   : > { %v1959_v44 = vadd.f32 %v1958_v58, %v1957_v20  ;;  %v1064_v43 = vadd.f32 %v10752_v34, %v1063_v62  ;;  %v1065_v60 = vpop.f32.mrb[75].mxu0  ;;  %v1493_v63 = vpop.f32.mrb[75].mxu1 }
 0x1bf   : > { %v1735_v12 = vsel %vm1663_vm5, %v1484_v42, 0.0  ;;  %v1853_v6 = vmul.f32 %v1484_v42, %v1484_v42  ;;  %2078 = vst.msk [vmem:[%s10763_s22 + $0x120] sm:$0xff] %vm1663_vm5, %v1484_v42 }
 0x1c0   : > { %v1736_v16 = vadd.f32 %v1735_v12, %v1734_v24  ;;  %v1489_v0 = vadd.f32 %v8991_v8, %v1064_v43 }
 0x1c1   : > { %v1960_v7 = vsel %vm1663_vm5, %v1853_v6, 0.0  ;;  %v1068_v27 = vpop.f32.mrb[76].mxu0  ;;  %v8997_v59 = vpop.f32.mrb[76].mxu1 }
 0x1c2   : > { %v1961_v10 = vadd.f32 %v1960_v7, %v1959_v44  ;;  %v1737_v11 = vsel %vm1663_vm5, %v1489_v0, 0.0  ;;  %v1854_v14 = vmul.f32 %v1489_v0, %v1489_v0  ;;  %2079 = vst.msk [vmem:[%s10763_s22 + $0x128] sm:$0xff] %vm1663_vm5, %v1489_v0  ;;  %v1069_v15 = vadd.f32 %v10752_v34, %v1068_v27  ;;  %v1070_v18 = vpop.f32.mrb[77].mxu0  ;;  %v1503_v52 = vpop.f32.mrb[77].mxu1 }
 0x1c3   : > { %v1738_v19 = vadd.f32 %v1737_v11, %v1736_v16 }
 0x1c4   : > { %v1962_v48 = vsel %vm1663_vm5, %v1854_v14, 0.0  ;;  %v1494_v26 = vadd.f32 %v1493_v63, %v1069_v15 }
 0x1c5   : > { %v1963_v38 = vadd.f32 %v1962_v48, %v1961_v10  ;;  %v1073_v35 = vpop.f32.mrb[78].mxu0  ;;  %v9000_v39 = vpop.f32.mrb[78].mxu1 }
 0x1c6   : > { %v1739_v32 = vsel %vm1663_vm5, %v1494_v26, 0.0  ;;  %v1855_v46 = vmul.f32 %v1494_v26, %v1494_v26  ;;  %2080 = vst.msk [vmem:[%s10763_s22 + $0x130] sm:$0xff] %vm1663_vm5, %v1494_v26  ;;  %v1074_v22 = vadd.f32 %v10752_v34, %v1073_v35  ;;  %v1075_v4 = vpop.f32.mrb[79].mxu0  ;;  %v1513_v28 = vpop.f32.mrb[79].mxu1 }
 0x1c7   : > { %v1740_v30 = vadd.f32 %v1739_v32, %v1738_v19 }
 0x1c8   : > { %v1964_v56 = vsel %vm1663_vm5, %v1855_v46, 0.0  ;;  %v1499_v8 = vadd.f32 %v8994_v3, %v1074_v22 }
 0x1c9   : > { %v1965_v47 = vadd.f32 %v1964_v56, %v1963_v38  ;;  %v1078_v50 = vpop.f32.mrb[80].mxu0  ;;  %v11003_v36 = vpop.f32.mrb[80].mxu1 }
 0x1ca   : > { %v1741_v51 = vsel %vm1663_vm5, %v1499_v8, 0.0  ;;  %v1856_v40 = vmul.f32 %v1499_v8, %v1499_v8  ;;  %2081 = vst.msk [vmem:[%s10763_s22 + $0x138] sm:$0xff] %vm1663_vm5, %v1499_v8  ;;  %v1079_v54 = vadd.f32 %v10752_v34, %v1078_v50  ;;  %v1080_v2 = vpop.f32.mrb[81].mxu0  ;;  %v1523_v55 = vpop.f32.mrb[81].mxu1 }
 0x1cb   : > { %v1742_v58 = vadd.f32 %v1741_v51, %v1740_v30 }
 0x1cc   : > { %v1966_v20 = vsel %vm1663_vm5, %v1856_v40, 0.0  ;;  %v1504_v24 = vadd.f32 %v1503_v52, %v1079_v54 }
 0x1cd   : > { %v1967_v42 = vadd.f32 %v1966_v20, %v1965_v47  ;;  %v1083_v62 = vpop.f32.mrb[82].mxu0  ;;  %v11010_v3 = vpop.f32.mrb[82].mxu1 }
 0x1ce   : > { %v1743_v44 = vsel %vm1663_vm5, %v1504_v24, 0.0  ;;  %v1857_v43 = vmul.f32 %v1504_v24, %v1504_v24  ;;  %2082 = vst.msk [vmem:[%s10763_s22 + $0x140] sm:$0xff] %vm1663_vm5, %v1504_v24  ;;  %v1084_v60 = vadd.f32 %v10752_v34, %v1083_v62  ;;  %v1085_v63 = vpop.f32.mrb[83].mxu0  ;;  %v11016_v12 = vpop.f32.mrb[83].mxu1 }
 0x1cf   : > { %v1744_v6 = vadd.f32 %v1743_v44, %v1742_v58  ;;  %v1149_v44 = vadd.f32 %v10752_v34, %v10677_v21 }
 0x1d0   : > { %v1968_v16 = vsel %vm1663_vm5, %v1857_v43, 0.0  ;;  %v1509_v0 = vadd.f32 %v8997_v59, %v1084_v60 }
 0x1d1   : > { %v1969_v7 = vadd.f32 %v1968_v16, %v1967_v42  ;;  %v1088_v27 = vpop.f32.mrb[84].mxu0  ;;  %v11019_v10 = vpop.f32.mrb[84].mxu1  ;;  %v1154_v42 = vadd.f32 %v10752_v34, %v10682_v25 }
 0x1d2   : > { %v1745_v11 = vsel %vm1663_vm5, %v1509_v0, 0.0  ;;  %v1858_v14 = vmul.f32 %v1509_v0, %v1509_v0  ;;  %2083 = vst.msk [vmem:[%s10763_s22 + $0x148] sm:$0xff] %vm1663_vm5, %v1509_v0  ;;  %v1089_v15 = vadd.f32 %v10752_v34, %v1088_v27  ;;  %v1090_v18 = vpop.f32.mrb[85].mxu0  ;;  %v11025_v52 = vpop.f32.mrb[85].mxu1 }
 0x1d3   : > { %v1746_v19 = vadd.f32 %v1745_v11, %v1744_v6  ;;  %v1164_v18 = vadd.f32 %v10752_v34, %v10690_v33 }
 0x1d4   : > { %v1970_v48 = vsel %vm1663_vm5, %v1858_v14, 0.0  ;;  %v1514_v26 = vadd.f32 %v1513_v28, %v1089_v15  ;;  %v1159_v15 = vadd.f32 %v10752_v34, %v10686_v29 }
 0x1d5   : > { %v1971_v59 = vadd.f32 %v1970_v48, %v1969_v7  ;;  %v1093_v38 = vpop.f32.mrb[86].mxu0  ;;  %v11028_v35 = vpop.f32.mrb[86].mxu1 }
 0x1d6   : > { %v1747_v32 = vsel %vm1663_vm5, %v1514_v26, 0.0  ;;  %v1859_v46 = vmul.f32 %v1514_v26, %v1514_v26  ;;  %2084 = vst.msk [vmem:[%s10763_s22 + $0x150] sm:$0xff] %vm1663_vm5, %v1514_v26  ;;  %v1094_v22 = vadd.f32 %v10752_v34, %v1093_v38  ;;  %v1095_v4 = vpop.f32.mrb[87].mxu0  ;;  %v11034_v30 = vpop.f32.mrb[87].mxu1 }
 0x1d7   : > { %v1748_v56 = vadd.f32 %v1747_v32, %v1746_v19 }
 0x1d8   : > { %v1972_v8 = vsel %vm1663_vm5, %v1859_v46, 0.0  ;;  %v1519_v47 = vadd.f32 %v9000_v39, %v1094_v22 }
 0x1d9   : > { %v1973_v28 = vadd.f32 %v1972_v8, %v1971_v59  ;;  %v1098_v50 = vpop.f32.mrb[88].mxu0  ;;  %v11037_v51 = vpop.f32.mrb[88].mxu1  ;;  %v1169_v8 = vadd.f32 %v10752_v34, %v10694_v37 }
 0x1da   : > { %v1749_v40 = vsel %vm1663_vm5, %v1519_v47, 0.0  ;;  %v1860_v54 = vmul.f32 %v1519_v47, %v1519_v47  ;;  %2085 = vst.msk [vmem:[%s10763_s22 + $0x158] sm:$0xff] %vm1663_vm5, %v1519_v47  ;;  %v1099_v2 = vadd.f32 %v10752_v34, %v1098_v50  ;;  %v1100_v58 = vpop.f32.mrb[89].mxu0  ;;  %v11043_v20 = vpop.f32.mrb[89].mxu1  ;;  %v1174_v47 = vadd.f32 %v10752_v34, %v10698_v41 }
 0x1db   : > { %v1750_v24 = vadd.f32 %v1749_v40, %v1748_v56 }
 0x1dc   : > { %v1974_v39 = vsel %vm1663_vm5, %v1860_v54, 0.0  ;;  %v1524_v62 = vadd.f32 %v1523_v55, %v1099_v2 }
 0x1dd   : > { %v1975_v43 = vadd.f32 %v1974_v39, %v1973_v28  ;;  %v1103_v60 = vpop.f32.mrb[90].mxu0  ;;  %v9018_v63 = vpop.f32.mrb[90].mxu1 }
 0x1de   : > { %v1751_v6 = vsel %vm1663_vm5, %v1524_v62, 0.0  ;;  %v1861_v16 = vmul.f32 %v1524_v62, %v1524_v62  ;;  %2086 = vst.msk [vmem:[%s10763_s22 + $0x160] sm:$0xff] %vm1663_vm5, %v1524_v62  ;;  %v1104_v0 = vadd.f32 %v10752_v34, %v1103_v60  ;;  %v11054_v7 = vadd.f32 %v9018_v63, %v1154_v42  ;;  %v1105_v25 = vpop.f32.mrb[91].mxu0  ;;  %v1573_v55 = vpop.f32.mrb[91].mxu1 }
 0x1df   : > { %v1752_v27 = vadd.f32 %v1751_v6, %v1750_v24  ;;  %v11056_v11 = vadd.f32 %v1573_v55, %v1149_v44  ;;  %v11103_v44 = vld [vmem:[%s12836_s2] ss:$0 sm:$0xff] }
 0x1e0   : > { %v1976_v21 = vsel %vm1663_vm5, %v1861_v16, 0.0  ;;  %v1529_v14 = vadd.f32 %v11003_v36, %v1104_v0  ;;  %2097 = vst.msk [vmem:[%s10763_s22 + $0x1b8] sm:$0xff] %vm1663_vm5, %v11054_v7 }
 0x1e1   : > { %v1977_v19 = vadd.f32 %v1976_v21, %v1975_v43  ;;  %2096 = vst.msk [vmem:[%s10763_s22 + $0x1b0] sm:$0xff] %vm1663_vm5, %v11056_v11  ;;  %v1108_v48 = vpop.f32.mrb[92].mxu0  ;;  %v9021_v26 = vpop.f32.mrb[92].mxu1  ;;  %v1184_v43 = vadd.f32 %v11103_v44, %v10706_v49 }
 0x1e2   : > { %v1753_v59 = vsel %vm1663_vm5, %v1529_v14, 0.0  ;;  %v1862_v36 = vmul.f32 %v1529_v14, %v1529_v14  ;;  %2087 = vst.msk [vmem:[%s10763_s22 + $0x168] sm:$0xff] %vm1663_vm5, %v1529_v14  ;;  %v1109_v38 = vadd.f32 %v10752_v34, %v1108_v48  ;;  %v1110_v32 = vpop.f32.mrb[93].mxu0  ;;  %v1583_v29 = vpop.f32.mrb[93].mxu1  ;;  %v11074_v33 = vadd.f32 %v9021_v26, %v1164_v18 }
 0x1e3   : > { %v1754_v46 = vadd.f32 %v1753_v59, %v1752_v27  ;;  %v11076_v22 = vadd.f32 %v1583_v29, %v1159_v15  ;;  %v1189_v15 = vadd.f32 %v11103_v44, %v10710_v53  ;;  %v1194_v18 = vadd.f32 %v11103_v44, %v10714_v57 }
 0x1e4   : > { %v1978_v4 = vsel %vm1663_vm5, %v1862_v36, 0.0  ;;  %v1534_v56 = vadd.f32 %v11016_v12, %v1109_v38  ;;  %2099 = vst.msk [vmem:[%s10763_s22 + $0x1c8] sm:$0xff] %vm1663_vm5, %v11074_v33 }
 0x1e5   : > { %v1979_v28 = vadd.f32 %v1978_v4, %v1977_v19  ;;  %2098 = vst.msk [vmem:[%s10763_s22 + $0x1c0] sm:$0xff] %vm1663_vm5, %v11076_v22  ;;  %v1113_v50 = vpop.f32.mrb[94].mxu0  ;;  %v9024_v40 = vpop.f32.mrb[94].mxu1 }
 0x1e6   : > { %v1755_v54 = vsel %vm1663_vm5, %v1534_v56, 0.0  ;;  %v1863_v12 = vmul.f32 %v1534_v56, %v1534_v56  ;;  %2088 = vst.msk [vmem:[%s10763_s22 + $0x170] sm:$0xff] %vm1663_vm5, %v1534_v56  ;;  %v1114_v37 = vadd.f32 %v10752_v34, %v1113_v50  ;;  %v1115_v2 = vpop.f32.mrb[95].mxu0  ;;  %v1593_v41 = vpop.f32.mrb[95].mxu1  ;;  %v11094_v24 = vadd.f32 %v9024_v40, %v1174_v47 }
 0x1e7   : > { %v1756_v58 = vadd.f32 %v1755_v54, %v1754_v46  ;;  %v11096_v42 = vadd.f32 %v1593_v41, %v1169_v8  ;;  %v1179_v34 = vadd.f32 %v11103_v44, %v10702_v45  ;;  %v1199_v56 = vadd.f32 %v11103_v44, %v10718_v61 }
 0x1e8   : > { %v1980_v39 = vsel %vm1663_vm5, %v1863_v12, 0.0  ;;  %v1539_v62 = vadd.f32 %v11010_v3, %v1114_v37  ;;  %2101 = vst.msk [vmem:[%s10763_s22 + $0x1d8] sm:$0xff] %vm1663_vm5, %v11094_v24  ;;  %v1204_v8 = vadd.f32 %v11103_v44, %v10722_v1 }
 0x1e9   : > { %v1981_v60 = vadd.f32 %v1980_v39, %v1979_v28  ;;  %2100 = vst.msk [vmem:[%s10763_s22 + $0x1d0] sm:$0xff] %vm1663_vm5, %v11096_v42  ;;  %v1118_v63 = vpop.f32.mrb[96].mxu0  ;;  %v9027_v3 = vpop.f32.mrb[96].mxu1  ;;  %v1209_v39 = vadd.f32 %v11103_v44, %v10726_v5 }
 0x1ea   : > { %v1757_v6 = vsel %vm1663_vm5, %v1539_v62, 0.0  ;;  %v1864_v16 = vmul.f32 %v1539_v62, %v1539_v62  ;;  %2089 = vst.msk [vmem:[%s10763_s22 + $0x178] sm:$0xff] %vm1663_vm5, %v1539_v62  ;;  %v1119_v45 = vadd.f32 %v11103_v44, %v1118_v63  ;;  %v1120_v0 = vpop.f32.mrb[97].mxu0  ;;  %v1603_v49 = vpop.f32.mrb[97].mxu1  ;;  %v11119_v55 = vadd.f32 %v9027_v3, %v1184_v43 }
 0x1eb   : > { %v1758_v25 = vadd.f32 %v1757_v6, %v1756_v58  ;;  %v11121_v27 = vadd.f32 %v1603_v49, %v1179_v34  ;;  %v1214_v62 = vadd.f32 %v11103_v44, %v10730_v9 }
 0x1ec   : > { %v1982_v21 = vsel %vm1663_vm5, %v1864_v16, 0.0  ;;  %v1544_v14 = vadd.f32 %v11025_v52, %v1119_v45  ;;  %2103 = vst.msk [vmem:[%s10763_s22 + $0x1e8] sm:$0xff] %vm1663_vm5, %v11119_v55 }
 0x1ed   : > { %v1983_v19 = vadd.f32 %v1982_v21, %v1981_v60  ;;  %2102 = vst.msk [vmem:[%s10763_s22 + $0x1e0] sm:$0xff] %vm1663_vm5, %v11121_v27  ;;  %v1123_v48 = vpop.f32.mrb[98].mxu0  ;;  %v9030_v26 = vpop.f32.mrb[98].mxu1  ;;  %v1224_v21 = vadd.f32 %v11103_v44, %v10738_v17 }
 0x1ee   : > { %v1759_v59 = vsel %vm1663_vm5, %v1544_v14, 0.0  ;;  %v1865_v52 = vmul.f32 %v1544_v14, %v1544_v14  ;;  %2090 = vst.msk [vmem:[%s10763_s22 + $0x180] sm:$0xff] %vm1663_vm5, %v1544_v14  ;;  %v1124_v53 = vadd.f32 %v11103_v44, %v1123_v48  ;;  %v1125_v36 = vpop.f32.mrb[99].mxu0  ;;  %v1613_v57 = vpop.f32.mrb[99].mxu1  ;;  %v11139_v32 = vadd.f32 %v9030_v26, %v1194_v18 }
 0x1ef   : > { %v1760_v38 = vadd.f32 %v1759_v59, %v1758_v25  ;;  %v11141_v29 = vadd.f32 %v1613_v57, %v1189_v15  ;;  %v1219_v25 = vadd.f32 %v11103_v44, %v10734_v13  ;;  %v1229_v57 = vadd.f32 %v11103_v44, %v10742_v23 }
 0x1f0   : > { %v1984_v46 = vsel %vm1663_vm5, %v1865_v52, 0.0  ;;  %v1549_v4 = vadd.f32 %v11019_v10, %v1124_v53  ;;  %2105 = vst.msk [vmem:[%s10763_s22 + $0x1f8] sm:$0xff] %vm1663_vm5, %v11139_v32 }
 0x1f1   : > { %v1985_v47 = vadd.f32 %v1984_v46, %v1983_v19  ;;  %2104 = vst.msk [vmem:[%s10763_s22 + $0x1f0] sm:$0xff] %vm1663_vm5, %v11141_v29  ;;  %v1128_v28 = vpop.f32.mrb[100].mxu0  ;;  %v9033_v50 = vpop.f32.mrb[100].mxu1 }
 0x1f2   : > { %v1761_v40 = vsel %vm1663_vm5, %v1549_v4, 0.0  ;;  %v1866_v10 = vmul.f32 %v1549_v4, %v1549_v4  ;;  %2091 = vst.msk [vmem:[%s10763_s22 + $0x188] sm:$0xff] %vm1663_vm5, %v1549_v4  ;;  %v1129_v61 = vadd.f32 %v11103_v44, %v1128_v28  ;;  %v1130_v54 = vpop.f32.mrb[101].mxu0  ;;  %v1623_v1 = vpop.f32.mrb[101].mxu1  ;;  %v11159_v37 = vadd.f32 %v9033_v50, %v1204_v8 }
 0x1f3   : > { %v1762_v12 = vadd.f32 %v1761_v40, %v1760_v38  ;;  %v11161_v2 = vadd.f32 %v1623_v1, %v1199_v56  ;;  %v1234_v38 = vadd.f32 %v11103_v44, %v10746_v31 }
 0x1f4   : > { %v1986_v41 = vsel %vm1663_vm5, %v1866_v10, 0.0  ;;  %v1554_v58 = vadd.f32 %v11034_v30, %v1129_v61  ;;  %2107 = vst.msk [vmem:[%s10763_s22 + $0x208] sm:$0xff] %vm1663_vm5, %v11159_v37 }
 0x1f5   : > { %v1987_v34 = vadd.f32 %v1986_v41, %v1985_v47  ;;  %2106 = vst.msk [vmem:[%s10763_s22 + $0x200] sm:$0xff] %vm1663_vm5, %v11161_v2  ;;  %v1133_v43 = vpop.f32.mrb[102].mxu0  ;;  %v9036_v60 = vpop.f32.mrb[102].mxu1 }
 0x1f6   : > { %v1763_v63 = vsel %vm1663_vm5, %v1554_v58, 0.0  ;;  %v1867_v30 = vmul.f32 %v1554_v58, %v1554_v58  ;;  %2092 = vst.msk [vmem:[%s10763_s22 + $0x190] sm:$0xff] %vm1663_vm5, %v1554_v58  ;;  %v1134_v5 = vadd.f32 %v11103_v44, %v1133_v43  ;;  %v1135_v3 = vpop.f32.mrb[103].mxu0  ;;  %v1633_v9 = vpop.f32.mrb[103].mxu1  ;;  %v11179_v16 = vadd.f32 %v9036_v60, %v1214_v62 }
 0x1f7   : > { %v1764_v6 = vadd.f32 %v1763_v63, %v1762_v12  ;;  %v11181_v45 = vadd.f32 %v1633_v9, %v1209_v39  ;;  %v1872_v58 = vmul.f32 %v11054_v7, %v11054_v7  ;;  %v1773_v43 = vsel %vm1663_vm5, %v11054_v7, 0.0 }
 0x1f8   : > { %v1988_v0 = vsel %vm1663_vm5, %v1867_v30, 0.0  ;;  %v1559_v49 = vadd.f32 %v11028_v35, %v1134_v5  ;;  %2109 = vst.msk [vmem:[%s10763_s22 + $0x218] sm:$0xff] %vm1663_vm5, %v11179_v16  ;;  %v1873_v63 = vmul.f32 %v11076_v22, %v11076_v22  ;;  %v1874_v9 = vmul.f32 %v11074_v33, %v11074_v33 }
 0x1f9   : > { %v1989_v14 = vadd.f32 %v1988_v0, %v1987_v34  ;;  %2108 = vst.msk [vmem:[%s10763_s22 + $0x210] sm:$0xff] %vm1663_vm5, %v11181_v45  ;;  %v1138_v15 = vpop.f32.mrb[104].mxu0  ;;  %v9039_v18 = vpop.f32.mrb[104].mxu1  ;;  %v1998_v3 = vsel %vm1663_vm5, %v1872_v58, 0.0  ;;  %v1777_v7 = vsel %vm1663_vm5, %v11074_v33, 0.0  ;;  %v1781_v33 = vsel %vm1663_vm5, %v11094_v24, 0.0 }
 0x1fa   : > { %v1765_v19 = vsel %vm1663_vm5, %v1559_v49, 0.0  ;;  %v1868_v35 = vmul.f32 %v1559_v49, %v1559_v49  ;;  %2093 = vst.msk [vmem:[%s10763_s22 + $0x198] sm:$0xff] %vm1663_vm5, %v1559_v49  ;;  %v1139_v13 = vadd.f32 %v11103_v44, %v1138_v15  ;;  %v1140_v48 = vpop.f32.mrb[105].mxu0  ;;  %v1643_v17 = vpop.f32.mrb[105].mxu1  ;;  %v11199_v59 = vadd.f32 %v9039_v18, %v1224_v21 }
 0x1fb   : > { %v1766_v26 = vadd.f32 %v1765_v19, %v1764_v6  ;;  %v11201_v52 = vadd.f32 %v1643_v17, %v1219_v25  ;;  %v2000_v49 = vsel %vm1663_vm5, %v1873_v63, 0.0  ;;  %v1875_v25 = vmul.f32 %v11096_v42, %v11096_v42 }
 0x1fc   : > { %v1990_v53 = vsel %vm1663_vm5, %v1868_v35, 0.0  ;;  %v1564_v36 = vadd.f32 %v11043_v20, %v1139_v13  ;;  %2111 = vst.msk [vmem:[%s10763_s22 + $0x228] sm:$0xff] %vm1663_vm5, %v11199_v59  ;;  %v2002_v15 = vsel %vm1663_vm5, %v1874_v9, 0.0  ;;  %v1876_v18 = vmul.f32 %v11094_v24, %v11094_v24 }
 0x1fd   : > { %v1991_v46 = vadd.f32 %v1990_v53, %v1989_v14  ;;  %2110 = vst.msk [vmem:[%s10763_s22 + $0x220] sm:$0xff] %vm1663_vm5, %v11201_v52  ;;  %v1143_v4 = vpop.f32.mrb[106].mxu0  ;;  %v9042_v56 = vpop.f32.mrb[106].mxu1  ;;  %v2004_v13 = vsel %vm1663_vm5, %v1875_v25, 0.0  ;;  %v1877_v48 = vmul.f32 %v11121_v27, %v11121_v27  ;;  %v1785_v24 = vsel %vm1663_vm5, %v11119_v55, 0.0 }
 0x1fe   : > { %v1767_v8 = vsel %vm1663_vm5, %v1564_v36, 0.0  ;;  %v1869_v20 = vmul.f32 %v1564_v36, %v1564_v36  ;;  %2094 = vst.msk [vmem:[%s10763_s22 + $0x1a0] sm:$0xff] %vm1663_vm5, %v1564_v36  ;;  %v1144_v23 = vadd.f32 %v11103_v44, %v1143_v4  ;;  %v1145_v31 = vpop.f32.mrb[107].mxu0  ;;  %v1653_v47 = vpop.f32.mrb[107].mxu1  ;;  %v11219_v50 = vadd.f32 %v9042_v56, %v1234_v38 }
 0x1ff   : > { %v1768_v28 = vadd.f32 %v1767_v8, %v1766_v26  ;;  %v11221_v40 = vadd.f32 %v1653_v47, %v1229_v57  ;;  %v1871_v44 = vmul.f32 %v11056_v11, %v11056_v11  ;;  %v2006_v53 = vsel %vm1663_vm5, %v1876_v18, 0.0 }
 0x200   : > { %v1992_v10 = vsel %vm1663_vm5, %v1869_v20, 0.0  ;;  %v1569_v61 = vadd.f32 %v11037_v51, %v1144_v23  ;;  %2113 = vst.msk [vmem:[%s10763_s22 + $0x238] sm:$0xff] %vm1663_vm5, %v11219_v50  ;;  %v1771_v51 = vsel %vm1663_vm5, %v11056_v11, 0.0  ;;  %v1775_v11 = vsel %vm1663_vm5, %v11076_v22, 0.0 }
 0x201   : > { %v1993_v54 = vadd.f32 %v1992_v10, %v1991_v46  ;;  %2112 = vst.msk [vmem:[%s10763_s22 + $0x230] sm:$0xff] %vm1663_vm5, %v11221_v40  ;;  %v1996_v60 = vsel %vm1663_vm5, %v1871_v44, 0.0  ;;  %v1779_v22 = vsel %vm1663_vm5, %v11096_v42, 0.0  ;;  %v1878_v36 = vmul.f32 %v11119_v55, %v11119_v55 }
 0x202   : > { %v1769_v1 = vsel %vm1663_vm5, %v1569_v61, 0.0  ;;  %v1870_v12 = vmul.f32 %v1569_v61, %v1569_v61  ;;  %2095 = vst.msk [vmem:[%s10763_s22 + $0x1a8] sm:$0xff] %vm1663_vm5, %v1569_v61  ;;  %v1783_v42 = vsel %vm1663_vm5, %v11121_v27, 0.0  ;;  %v2008_v46 = vsel %vm1663_vm5, %v1877_v48, 0.0 }
 0x203   : > { %v1770_v41 = vadd.f32 %v1769_v1, %v1768_v28  ;;  %v1879_v4 = vmul.f32 %v11141_v29, %v11141_v29  ;;  %v2010_v20 = vsel %vm1663_vm5, %v1878_v36, 0.0  ;;  %v1880_v23 = vmul.f32 %v11139_v32, %v11139_v32 }
 0x204   : > { %v1994_v39 = vsel %vm1663_vm5, %v1870_v12, 0.0  ;;  %v1787_v27 = vsel %vm1663_vm5, %v11141_v29, 0.0  ;;  %v1789_v55 = vsel %vm1663_vm5, %v11139_v32, 0.0  ;;  %v1881_v10 = vmul.f32 %v11161_v2, %v11161_v2 }
 0x205   : > { %v1772_v62 = vadd.f32 %v1771_v51, %v1770_v41  ;;  %v1995_v34 = vadd.f32 %v1994_v39, %v1993_v54  ;;  %v2012_v28 = vsel %vm1663_vm5, %v1879_v4, 0.0  ;;  %v2014_v44 = vsel %vm1663_vm5, %v1880_v23, 0.0  ;;  %v1662_v4 = vld [vmem:[#allocation3] sm:$0x1] }
 0x206   : > { %v1882_v1 = vmul.f32 %v11159_v37, %v11159_v37  ;;  %v1791_v29 = vsel %vm1663_vm5, %v11161_v2, 0.0  ;;  %v1793_v32 = vsel %vm1663_vm5, %v11159_v37, 0.0  ;;  %v2016_v58 = vsel %vm1663_vm5, %v1881_v10, 0.0 }
 0x207   : > { %v1774_v30 = vadd.f32 %v1773_v43, %v1772_v62  ;;  %v1997_v5 = vadd.f32 %v1996_v60, %v1995_v34  ;;  %v1883_v51 = vmul.f32 %v11181_v45, %v11181_v45  ;;  %v1884_v43 = vmul.f32 %v11179_v16, %v11179_v16 }
 0x208   : > { %v2018_v34 = vsel %vm1663_vm5, %v1882_v1, 0.0  ;;  %v1795_v2 = vsel %vm1663_vm5, %v11181_v45, 0.0  ;;  %v1797_v37 = vsel %vm1663_vm5, %v11179_v16, 0.0  ;;  %v1799_v45 = vsel %vm1663_vm5, %v11201_v52, 0.0 }
 0x209   : > { %v1776_v6 = vadd.f32 %v1775_v11, %v1774_v30  ;;  %v1999_v0 = vadd.f32 %v1998_v3, %v1997_v5  ;;  %v2020_v30 = vsel %vm1663_vm5, %v1883_v51, 0.0  ;;  %v1885_v5 = vmul.f32 %v11201_v52, %v11201_v52 }
 0x20a   : > { %v2022_v11 = vsel %vm1663_vm5, %v1884_v43, 0.0  ;;  %v1801_v16 = vsel %vm1663_vm5, %v11199_v59, 0.0  ;;  %v1887_v25 = vmul.f32 %v11221_v40, %v11221_v40  ;;  %v1888_v18 = vmul.f32 %v11219_v50, %v11219_v50 }
 0x20b   : > { %v1778_v21 = vadd.f32 %v1777_v7, %v1776_v6  ;;  %v2001_v14 = vadd.f32 %v2000_v49, %v1999_v0  ;;  %v1886_v6 = vmul.f32 %v11199_v59, %v11199_v59  ;;  %v2024_v49 = vsel %vm1663_vm5, %v1885_v5, 0.0  ;;  %v2361_v5 = vld [vmem:[#allocation2 + $0x1b8] sm:$0xff] (!%p8144_p5) }
 0x20c   : > { %v1803_v52 = vsel %vm1663_vm5, %v11221_v40, 0.0  ;;  %v1805_v59 = vsel %vm1663_vm5, %v11219_v50, 0.0  ;;  %v2030_v48 = vsel %vm1663_vm5, %v1888_v18, 0.0  ;;  %v1816_v50 = vld [vmem:[#allocation4] sm:$0x1] }
 0x20d   : > { %v1780_v19 = vadd.f32 %v1779_v22, %v1778_v21  ;;  %v2003_v35 = vadd.f32 %v2002_v15, %v2001_v14  ;;  %v2026_v15 = vsel %vm1663_vm5, %v1886_v6, 0.0  ;;  %v2437_v6 = vld [vmem:[#allocation2 + $0x258] sm:$0xff] (!%p8144_p5) }
 0x20f   : > { %v1782_v17 = vadd.f32 %v1781_v33, %v1780_v19  ;;  %v2005_v26 = vadd.f32 %v2004_v13, %v2003_v35  ;;  %v2028_v35 = vsel %vm1663_vm5, %v1887_v25, 0.0 }
 0x211   : > { %v1784_v57 = vadd.f32 %v1783_v42, %v1782_v17  ;;  %v2007_v38 = vadd.f32 %v2006_v53, %v2005_v26 }
 0x213   : > { %v2009_v56 = vadd.f32 %v2008_v46, %v2007_v38  ;;  %v1786_v8 = vadd.f32 %v1785_v24, %v1784_v57 }
 0x215   : > { %v1788_v31 = vadd.f32 %v1787_v27, %v1786_v8  ;;  %v2011_v47 = vadd.f32 %v2010_v20, %v2009_v56 }
 0x217   : > { %v1790_v61 = vadd.f32 %v1789_v55, %v1788_v31  ;;  %v2013_v54 = vadd.f32 %v2012_v28, %v2011_v47  ;;  %v2432_v31 = vld [vmem:[%s12837_s3 + $0x1e] sm:$0xff] (!%p8144_p5)  ;;  %v2433_v47 = vld [vmem:[%s12837_s3 + $0x26] sm:$0x3] (!%p8144_p5)  ;;  %v2506_v55 = vld [vmem:[%s12837_s3 + $0x28] sm:$0xff] (!%p8144_p5) }
 0x218   : > { %v11339_v10 = vpack.c.bf16 (!%p8144_p5), %v2433_v47, %v2432_v31  ;;  %v4804_v31 = vld [vmem:[%s12837_s3 + $0x62] sm:$0x3] (!%p8144_p5) }
 0x219   : > { %v1792_v12 = vadd.f32 %v1791_v29, %v1790_v61  ;;  %v2015_v41 = vadd.f32 %v2014_v44, %v2013_v54  ;;  %v2507_v61 = vld [vmem:[%s12837_s3 + $0x30] sm:$0x3] (!%p8144_p5) }
 0x21a   : > { %v9682_v44 = vpack.c.bf16 (!%p8144_p5), %v2507_v61, %v2506_v55  ;;  %9726 = vmatprep.subr.msk.bf16.mxu0 (!%p8144_p5), %vm11335_vm9, %v11339_v10 }
 0x21b   : > { %v1794_v39 = vadd.f32 %v1793_v32, %v1792_v12  ;;  %v2017_v62 = vadd.f32 %v2016_v58, %v2015_v41  ;;  %v2145_v12 = vlaneseq (!%p8144_p5)  ;;  %v4499_v32 = vld [vmem:[%s12837_s3 + $0x50] sm:$0xff] (!%p8144_p5)  ;;  %v4500_v58 = vld [vmem:[%s12837_s3 + $0x58] sm:$0x3] (!%p8144_p5)  ;;  %9729 = vmatpush3.bf16.msk.msra.mxu0 (!%p8144_p5), %vm11335_vm9, %v11339_v10 }
 0x21c   : > { %9684 = vmatprep.subr.msk.bf16.mxu1 (!%p8144_p5), %vm11335_vm9, %v9682_v44 }
 0x21d   : > { %v1796_v60 = vadd.f32 %v1795_v2, %v1794_v39  ;;  %v2019_v63 = vadd.f32 %v2018_v34, %v2017_v62  ;;  %v11358_v39 = vpack.c.bf16 (!%p8144_p5), %v4500_v58, %v4499_v32  ;;  %9687 = vmatpush3.bf16.msk.msra.mxu1 (!%p8144_p5), %vm11335_vm9, %v9682_v44  ;;  %v11363_v34 = vshrl.u32 (!%p8144_p5), %v2145_v12, 7  ;;  %v2368_v44 = vld [vmem:[#allocation2 + $0x1f0] sm:$0xff] (!%p8144_p5) }
 0x21f   : > { %v1798_v3 = vadd.f32 %v1797_v37, %v1796_v60  ;;  %v2021_v9 = vadd.f32 %v2020_v30, %v2019_v63  ;;  %9732 = vmatprep.subr.msk.bf16.mxu0 (!%p8144_p5), %vm11335_vm9, %v11358_v39  ;;  %v2147_v2 = vsub.s32 (!%p8144_p5), 0, %v11363_v34  ;;  %v2434_v63 = vld [vmem:[#allocation2 + $0x240] sm:$0xff] (!%p8144_p5)  ;;  %v2360_v37 = vld [vmem:[#allocation2 + $0x1b0] sm:$0xff] (!%p8144_p5)  ;;  %v2435_v30 = vld [vmem:[#allocation2 + $0x248] sm:$0xff] (!%p8144_p5) }
 0x221   : > { %v1800_v0 = vadd.f32 %v1799_v45, %v1798_v3  ;;  %v2023_v7 = vadd.f32 %v2022_v11, %v2021_v9  ;;  %v2436_v3 = vld [vmem:[#allocation2 + $0x250] sm:$0xff] (!%p8144_p5)  ;;  %v2210_v9 = vld [vmem:[%s12837_s3] sm:$0xff] (!%p8144_p5)  ;;  %v2211_v45 = vld [vmem:[%s12837_s3 + $0x8] sm:$0x3] (!%p8144_p5) }
 0x222   : > { %v2362_v11 = vld [vmem:[#allocation2 + $0x1c0] sm:$0xff] (!%p8144_p5) }
 0x223   : > { %v1802_v21 = vadd.f32 %v1801_v16, %v1800_v0  ;;  %v2025_v14 = vadd.f32 %v2024_v49, %v2023_v7  ;;  %v2363_v0 = vld [vmem:[#allocation2 + $0x1c8] sm:$0xff] (!%p8144_p5)  ;;  %v2438_v7 = vld [vmem:[#allocation2 + $0x260] sm:$0xff] (!%p8144_p5)  ;;  %v2364_v16 = vld [vmem:[#allocation2 + $0x1d0] sm:$0xff] (!%p8144_p5)  ;;  %v11377_v49 = vpack.c.bf16 (!%p8144_p5), %v2211_v45, %v2210_v9 }
 0x224   : > { %v2444_v45 = vld [vmem:[#allocation2 + $0x290] sm:$0xff] (!%p8144_p5) }
 0x225   : > { %v1804_v22 = vadd.f32 %v1803_v52, %v1802_v21  ;;  %v2027_v19 = vadd.f32 %v2026_v15, %v2025_v14  ;;  %v2439_v21 = vld [vmem:[#allocation2 + $0x268] sm:$0xff] (!%p8144_p5)  ;;  %v2365_v14 = vld [vmem:[#allocation2 + $0x1d8] sm:$0xff] (!%p8144_p5)  ;;  %v2440_v15 = vld [vmem:[#allocation2 + $0x270] sm:$0xff] (!%p8144_p5)  ;;  %9690 = vmatprep.subr.msk.bf16.mxu1 (!%p8144_p5), %vm11335_vm9, %v11377_v49 }
 0x227   : > { %v1806_v33 = vadd.f32 %v1805_v59, %v1804_v22  ;;  %v2029_v13 = vadd.f32 %v2028_v35, %v2027_v19  ;;  %v2366_v59 = vld [vmem:[#allocation2 + $0x1e0] sm:$0xff] (!%p8144_p5)  ;;  %v11384_v35 = vld [vmem:[#allocation2 + $0x278] sm:$0xff] (!%p8144_p5) }
 0x229   : > { %v1807_v17 = vrot.slane %v1806_v33, 4  ;;  %v2031_v26 = vadd.f32 %v2030_v48, %v2029_v13 }
 0x22b   : > { %v1808_v53 = vadd.f32 %v1807_v17, %v1806_v33  ;;  %v2032_v36 = vrot.slane %v2031_v26, 4  ;;  %v11386_v33 = vld [vmem:[#allocation2 + $0x1e8] sm:$0xff] (!%p8144_p5) }
 0x22d   : > { %v1809_v42 = vrot.slane %v1808_v53, 2  ;;  %v2033_v57 = vadd.f32 %v2032_v36, %v2031_v26 }
 0x22f   : > { %v1810_v38 = vadd.f32 %v1809_v42, %v1808_v53  ;;  %v2034_v24 = vrot.slane %v2033_v57, 2 }
 0x231   : > { %v1811_v40 = vrot.slane %v1810_v38, 1  ;;  %v2035_v46 = vadd.f32 %v2034_v24, %v2033_v57 }
 0x233   : > { %v1812_v56 = vadd.f32 %v1811_v40, %v1810_v38  ;;  %v2036_v8 = vrot.slane %v2035_v46, 1  ;;  %2117 = sbr.rel (%p8144_p5) target bundleno = 1863 (0x747), region = 64 }
 0x235   : > { %v1813_v20 = vadd.f32 %v1812_v56, %v1662_v4  ;;  %v2037_v23 = vadd.f32 %v2036_v8, %v2035_v46 }
 0x237   : > { %1815 = vst.msk [vmem:[#allocation3] sm:$0x1] %vm1814_vm6, %v1813_v20  ;;  %v2038_v27 = vadd.f32 %v2037_v23, %v1816_v50  ;;  %v2442_v23 = vld [vmem:[#allocation2 + $0x280] sm:$0xff] (!%p8144_p5) }
 0x239   : > { %2039 = vst.msk [vmem:[#allocation4] sm:$0x1] %vm1814_vm6, %v2038_v27  ;;  %v4803_v27 = vld [vmem:[%s12837_s3 + $0x5a] sm:$0xff] (!%p8144_p5) }
 0x23e   : > { %v2118_v54 = vld [vmem:[#allocation3] sm:$0x1] }
 0x23f   : > { %v2119_v1 = vmul.f32 0.00043402778, %v2118_v54 }
 0x240   : > { %v2120_v29 = vld [vmem:[#allocation4] sm:$0x1] }
 0x241   : > { %v2121_v41 = vmul.f32 0.00043402778, %v2120_v29  ;;  %v2122_v51 = vmul.f32 %v2119_v1, %v2119_v1  ;;  %v11369_v60 = vrot.slane %v2119_v1, %v2147_v2 }
 0x243   : > { %v2123_v62 = vsub.f32 %v2121_v41, %v2122_v51  ;;  %v2452_v25 = vsub.f32 %v2434_v63, %v11369_v60  ;;  %v2378_v18 = vsub.f32 %v2360_v37, %v11369_v60  ;;  %v2453_v52 = vsub.f32 %v2435_v30, %v11369_v60  ;;  %v2443_v30 = vld [vmem:[#allocation2 + $0x288] sm:$0xff] }
 0x244   : > { %v2379_v22 = vsub.f32 %v2361_v5, %v11369_v60  ;;  %v2454_v19 = vsub.f32 %v2436_v3, %v11369_v60  ;;  %v2380_v48 = vsub.f32 %v2362_v11, %v11369_v60  ;;  %v2455_v17 = vsub.f32 %v2437_v6, %v11369_v60  ;;  %v2369_v6 = vld [vmem:[#allocation2 + $0x1f8] sm:$0xff] }
 0x245   : > { %v2124_v43 = vadd.f32 1e-05, %v2123_v62  ;;  %v2381_v26 = vsub.f32 %v2363_v0, %v11369_v60  ;;  %v2456_v53 = vsub.f32 %v2438_v7, %v11369_v60  ;;  %v2382_v42 = vsub.f32 %v2364_v16, %v11369_v60  ;;  %v2370_v0 = vld [vmem:[#allocation2 + $0x200] sm:$0xff] }
 0x246   : > { %v2457_v57 = vsub.f32 %v2439_v21, %v11369_v60  ;;  %v2383_v38 = vsub.f32 %v2365_v14, %v11369_v60  ;;  %v2458_v24 = vsub.f32 %v2440_v15, %v11369_v60  ;;  %v2384_v40 = vsub.f32 %v2366_v59, %v11369_v60 }
 0x247   : > { %10148 = vrsqrt.f32 %v2124_v43  ;;  %v2459_v46 = vsub.f32 %v11384_v35, %v11369_v60  ;;  %v2385_v4 = vsub.f32 %v11386_v33, %v11369_v60  ;;  %v2460_v62 = vsub.f32 %v2442_v23, %v11369_v60  ;;  %v2371_v33 = vld [vmem:[#allocation2 + $0x208] sm:$0xff]  ;;  %v4427_v23 = vld [vmem:[#allocation2 + $0x480] sm:$0xff] }
 0x248   : > { %v11421_v43 = vpack.c.bf16 %v4804_v31, %v4803_v27  ;;  %v2386_v37 = vsub.f32 %v2368_v44, %v11369_v60  ;;  %v2461_v14 = vsub.f32 %v2443_v30, %v11369_v60  ;;  %v2387_v15 = vsub.f32 %v2369_v6, %v11369_v60  ;;  %v4429_v6 = vld [vmem:[#allocation2 + $0x490] sm:$0xff] }
 0x251   : > { %v10149_v13 = vpop.eup %10148 }
 0x252   : > { %v11395_v36 = vrot.slane %v10149_v13, %v2147_v2  ;;  %v2446_v13 = vld [vmem:[#allocation2 + $0x2a0] sm:$0xff] }
 0x254   : > { %v2470_v56 = vmul.f32 %v2452_v25, %v11395_v36  ;;  %v2396_v8 = vmul.f32 %v2378_v18, %v11395_v36  ;;  %v2471_v50 = vmul.f32 %v2453_v52, %v11395_v36  ;;  %v2397_v20 = vmul.f32 %v2379_v22, %v11395_v36  ;;  %v2445_v52 = vld [vmem:[#allocation2 + $0x298] sm:$0xff] }
 0x255   : > { %v2472_v47 = vmul.f32 %v2454_v19, %v11395_v36  ;;  %v2398_v55 = vmul.f32 %v2380_v48, %v11395_v36  ;;  %v2473_v61 = vmul.f32 %v2455_v17, %v11395_v36  ;;  %v2399_v54 = vmul.f32 %v2381_v26, %v11395_v36  ;;  %v2372_v48 = vld [vmem:[#allocation2 + $0x210] sm:$0xff] }
 0x256   : > { %v2488_v1 = vmax.f32 %v2470_v56, 0.0  ;;  %v2414_v29 = vmax.f32 %v2396_v8, 0.0  ;;  %v2489_v41 = vmax.f32 %v2471_v50, 0.0  ;;  %v2415_v32 = vmax.f32 %v2397_v20, 0.0  ;;  %v2373_v50 = vld [vmem:[#allocation2 + $0x218] sm:$0xff]  ;;  %v2448_v20 = vld [vmem:[#allocation2 + $0x2b0] sm:$0xff] }
 0x257   : > { %v2490_v58 = vmax.f32 %v2472_v47, 0.0  ;;  %v2416_v51 = vmax.f32 %v2398_v55, 0.0  ;;  %v2474_v2 = vmul.f32 %v2456_v53, %v11395_v36  ;;  %v2400_v63 = vmul.f32 %v2382_v42, %v11395_v36 }
 0x258   : > { %9047 = vmatprep.mubr.msk.f32.mxu1 %vm1663_vm5, %v2488_v1  ;;  %9264 = vmatprep.mubr.msk.f32.mxu0 %vm1663_vm5, %v2414_v29  ;;  %v2491_v5 = vmax.f32 %v2473_v61, 0.0  ;;  %v2417_v3 = vmax.f32 %v2399_v54, 0.0  ;;  %v2475_v9 = vmul.f32 %v2457_v57, %v11395_v36  ;;  %v2401_v11 = vmul.f32 %v2383_v38, %v11395_v36 }
 0x259   : > { %9048 = vmatmul.mubr.msk.f32.vlgmr.msra.gmra.mrb[0].mxu1 %vm1663_vm5, %v2489_v41  ;;  %9265 = vmatmul.mubr.msk.f32.vlgmr.msra.gmra.mrb[0].mxu0 %vm1663_vm5, %v2415_v32  ;;  %v2492_v7 = vmax.f32 %v2474_v2, 0.0  ;;  %v2418_v16 = vmax.f32 %v2400_v63, 0.0  ;;  %v2476_v25 = vmul.f32 %v2458_v24, %v11395_v36  ;;  %v2402_v21 = vmul.f32 %v2384_v40, %v11395_v36  ;;  %v2447_v40 = vld [vmem:[#allocation2 + $0x2a8] sm:$0xff]  ;;  %v2450_v2 = vld [vmem:[#allocation2 + $0x2c0] sm:$0xff] }
 0x25a   : > { %9735 = vmatpush3.bf16.msk.msra.mxu0 %vm11335_vm9, %v11358_v39  ;;  %9050 = vmatprep.mubr.msk.f32.mxu1 %vm1663_vm5, %v2490_v58  ;;  %v2462_v39 = vsub.f32 %v2444_v45, %v11369_v60  ;;  %v2388_v18 = vsub.f32 %v2370_v0, %v11369_v60  ;;  %v2493_v22 = vmax.f32 %v2475_v9, 0.0  ;;  %v2419_v19 = vmax.f32 %v2401_v11, 0.0 }
 0x25b   : > { %9267 = vmatprep.mubr.msk.f32.mxu0 %vm1663_vm5, %v2416_v51  ;;  %9738 = vmatprep.subr.msk.bf16.mxu0 %vm11335_vm9, %v11421_v43  ;;  %v2477_v59 = vmul.f32 %v2459_v46, %v11395_v36  ;;  %v2403_v35 = vmul.f32 %v2385_v4, %v11395_v36  ;;  %v2494_v17 = vmax.f32 %v2476_v25, 0.0  ;;  %v2420_v26 = vmax.f32 %v2402_v21, 0.0  ;;  %v2449_v51 = vld [vmem:[#allocation2 + $0x2b8] sm:$0xff]  ;;  %v2451_v25 = vld [vmem:[#allocation2 + $0x2c8] sm:$0xff] }
 0x25c   : > { %9693 = vmatpush3.bf16.msk.msra.mxu1 %vm11335_vm9, %v11377_v49  ;;  %v2478_v49 = vmul.f32 %v2460_v62, %v11395_v36  ;;  %v2404_v53 = vmul.f32 %v2386_v37, %v11395_v36  ;;  %v2463_v42 = vsub.f32 %v2445_v52, %v11369_v60  ;;  %v2389_v57 = vsub.f32 %v2371_v33, %v11369_v60  ;;  %v4428_v62 = vld [vmem:[#allocation2 + $0x488] sm:$0xff]  ;;  %v4430_v21 = vld [vmem:[#allocation2 + $0x498] sm:$0xff] }
 0x25d   : > { %9051 = vmatmul.mubr.msk.f32.gmra.mrb[2].mxu1 %vm1663_vm5, %v2491_v5  ;;  %9268 = vmatmul.mubr.msk.f32.gmra.mrb[2].mxu0 %vm1663_vm5, %v2417_v3  ;;  %v2464_v38 = vsub.f32 %v2446_v13, %v11369_v60  ;;  %v2390_v24 = vsub.f32 %v2372_v48, %v11369_v60  ;;  %v2495_v46 = vmax.f32 %v2477_v59, 0.0  ;;  %v2421_v4 = vmax.f32 %v2403_v35, 0.0 }
 0x25e   : > { %9053 = vmatprep.mubr.msk.f32.mxu1 %vm1663_vm5, %v2492_v7  ;;  %9270 = vmatprep.mubr.msk.f32.mxu0 %vm1663_vm5, %v2418_v16  ;;  %v2479_v56 = vmul.f32 %v2461_v14, %v11395_v36  ;;  %v2405_v8 = vmul.f32 %v2387_v15, %v11395_v36  ;;  %v2496_v27 = vmax.f32 %v2478_v49, 0.0  ;;  %v2422_v31 = vmax.f32 %v2404_v53, 0.0  ;;  %v2126_v14 = vld [vmem:[#allocation2] sm:$0xff]  ;;  %v2127_v49 = vld [vmem:[#allocation2 + $0x8] sm:$0xff] }
 0x25f   : > { %v2480_v47 = vmul.f32 %v2462_v39, %v11395_v36  ;;  %v2406_v55 = vmul.f32 %v2388_v18, %v11395_v36  ;;  %v2465_v61 = vsub.f32 %v2447_v40, %v11369_v60  ;;  %v2391_v54 = vsub.f32 %v2373_v50, %v11369_v60  ;;  %v4432_v53 = vld [vmem:[#allocation2 + $0x4a8] sm:$0xff] }
 0x260   : > { %v2466_v44 = vsub.f32 %v2448_v20, %v11369_v60  ;;  %v4445_v1 = vsub.f32 %v4427_v23, %v11369_v60  ;;  %v2497_v29 = vmax.f32 %v2479_v56, 0.0  ;;  %v2423_v41 = vmax.f32 %v2405_v8, 0.0  ;;  %v2129_v20 = vld [vmem:[#allocation2 + $0x18] sm:$0xff] }
 0x261   : > { %9054 = vmatmul.mubr.msk.f32.gmra.mrb[4].mxu1 %vm1663_vm5, %v2493_v22  ;;  %9271 = vmatmul.mubr.msk.f32.gmra.mrb[4].mxu0 %vm1663_vm5, %v2419_v19  ;;  %v2481_v32 = vmul.f32 %v2463_v42, %v11395_v36  ;;  %v2407_v58 = vmul.f32 %v2389_v57, %v11395_v36  ;;  %v2498_v63 = vmax.f32 %v2480_v47, 0.0  ;;  %v2424_v37 = vmax.f32 %v2406_v55, 0.0  ;;  %v4431_v19 = vld [vmem:[#allocation2 + $0x4a0] sm:$0xff]  ;;  %v2128_v42 = vld [vmem:[#allocation2 + $0x10] sm:$0xff]  ;;  %v4434_v55 = vld [vmem:[#allocation2 + $0x4b8] sm:$0xff] }
 0x262   : > { %9056 = vmatprep.mubr.msk.f32.mxu1 %vm1663_vm5, %v2494_v17  ;;  %9273 = vmatprep.mubr.msk.f32.mxu0 %vm1663_vm5, %v2420_v26  ;;  %v2482_v30 = vmul.f32 %v2464_v38, %v11395_v36  ;;  %v2408_v5 = vmul.f32 %v2390_v24, %v11395_v36  ;;  %v2467_v3 = vsub.f32 %v2449_v51, %v11369_v60 }
 0x263   : > { %v4446_v9 = vsub.f32 %v4428_v62, %v11369_v60  ;;  %v2468_v11 = vsub.f32 %v2450_v2, %v11369_v60  ;;  %v2499_v45 = vmax.f32 %v2481_v32, 0.0  ;;  %v2425_v0 = vmax.f32 %v2407_v58, 0.0 }
 0x264   : > { %v2483_v7 = vmul.f32 %v2465_v61, %v11395_v36  ;;  %v2409_v16 = vmul.f32 %v2391_v54, %v11395_v36  ;;  %v2500_v15 = vmax.f32 %v2482_v30, 0.0  ;;  %v2426_v39 = vmax.f32 %v2408_v5, 0.0  ;;  %v2130_v61 = vld [vmem:[#allocation2 + $0x20] sm:$0xff] }
 0x265   : > { %9057 = vmatmul.mubr.msk.f32.gmra.mrb[6].mxu1 %vm1663_vm5, %v2495_v46  ;;  %9274 = vmatmul.mubr.msk.f32.gmra.mrb[6].mxu0 %vm1663_vm5, %v2421_v4  ;;  %v2484_v18 = vmul.f32 %v2466_v44, %v11395_v36  ;;  %v4463_v52 = vmul.f32 %v4445_v1, %v11395_v36  ;;  %v4447_v22 = vsub.f32 %v4429_v6, %v11369_v60  ;;  %v4433_v4 = vld [vmem:[#allocation2 + $0x4b0] sm:$0xff]  ;;  %v4435_v54 = vld [vmem:[#allocation2 + $0x4c0] sm:$0xff]  ;;  %v4436_v6 = vld [vmem:[#allocation2 + $0x4c8] sm:$0xff] }
 0x266   : > { %9059 = vmatprep.mubr.msk.f32.mxu1 %vm1663_vm5, %v2496_v27  ;;  %9276 = vmatprep.mubr.msk.f32.mxu0 %vm1663_vm5, %v2422_v31  ;;  %v2469_v59 = vsub.f32 %v2451_v25, %v11369_v60  ;;  %v4448_v35 = vsub.f32 %v4430_v21, %v11369_v60  ;;  %v2150_v33 = vsub.f32 %v2126_v14, %v11369_v60  ;;  %v2501_v13 = vmax.f32 %v2483_v7, 0.0  ;;  %v4437_v21 = vld [vmem:[#allocation2 + $0x4d0] sm:$0xff] }
 0x267   : > { %v2427_v48 = vmax.f32 %v2409_v16, 0.0  ;;  %v2485_v17 = vmul.f32 %v2467_v3, %v11395_v36  ;;  %v4464_v26 = vmul.f32 %v4446_v9, %v11395_v36  ;;  %v2502_v57 = vmax.f32 %v2484_v18, 0.0 }
 0x268   : > { %v4481_v38 = vmax.f32 %v4463_v52, 0.0  ;;  %v2486_v24 = vmul.f32 %v2468_v11, %v11395_v36  ;;  %v4449_v40 = vsub.f32 %v4431_v19, %v11369_v60  ;;  %v4465_v46 = vmul.f32 %v4447_v22, %v11395_v36  ;;  %v2131_v11 = vld [vmem:[#allocation2 + $0x28] sm:$0xff]  ;;  %v3005_v52 = vld [vmem:[%s12837_s3 + $0x32] sm:$0xff]  ;;  %v3006_v22 = vld [vmem:[%s12837_s3 + $0x3a] sm:$0x3] }
 0x269   : > { %9060 = vmatmul.mubr.msk.f32.gmra.mrb[8].mxu1 %vm1663_vm5, %v2497_v29  ;;  %9277 = vmatmul.mubr.msk.f32.gmra.mrb[8].mxu0 %vm1663_vm5, %v2423_v41  ;;  %v2151_v56 = vsub.f32 %v2127_v49, %v11369_v60  ;;  %v4450_v8 = vsub.f32 %v4432_v53, %v11369_v60  ;;  %v2152_v50 = vsub.f32 %v2128_v42, %v11369_v60  ;;  %v2503_v23 = vmax.f32 %v2485_v17, 0.0  ;;  %v2134_v42 = vld [vmem:[#allocation2 + $0x40] sm:$0xff] }
 0x26a   : > { %9062 = vmatprep.mubr.msk.f32.mxu1 %vm1663_vm5, %v2498_v63  ;;  %9279 = vmatprep.mubr.msk.f32.mxu0 %vm1663_vm5, %v2424_v37  ;;  %v4482_v27 = vmax.f32 %v4464_v26, 0.0  ;;  %v2487_v31 = vmul.f32 %v2469_v59, %v11395_v36  ;;  %v4466_v47 = vmul.f32 %v4448_v35, %v11395_v36  ;;  %v2504_v44 = vmax.f32 %v2486_v24, 0.0  ;;  %v5107_v63 = vld [vmem:[%s12837_s3 + $0x64] sm:$0xff]  ;;  %v5108_v37 = vld [vmem:[%s12837_s3 + $0x6c] sm:$0x3] }
 0x26b   : > { %v2174_v1 = vmul.f32 %v11395_v36, %v2150_v33  ;;  %v4467_v29 = vmul.f32 %v4449_v40, %v11395_v36  ;;  %v4451_v41 = vsub.f32 %v4433_v4, %v11369_v60  ;;  %v4483_v32 = vmax.f32 %v4465_v46, 0.0 }
 0x26c   : > { %v2153_v58 = vsub.f32 %v2129_v20, %v11369_v60  ;;  %v4452_v51 = vsub.f32 %v4434_v55, %v11369_v60  ;;  %v2154_v62 = vsub.f32 %v2130_v61, %v11369_v60  ;;  %v4453_v2 = vsub.f32 %v4435_v54, %v11369_v60  ;;  %v4440_v61 = vld [vmem:[#allocation2 + $0x4e8] sm:$0xff]  ;;  %v2136_v54 = vld [vmem:[#allocation2 + $0x50] sm:$0xff] }
 0x26d   : > { %9063 = vmatmul.mubr.msk.f32.gmra.mrb[10].mxu1 %vm1663_vm5, %v2499_v45  ;;  %9280 = vmatmul.mubr.msk.f32.gmra.mrb[10].mxu0 %vm1663_vm5, %v2425_v0  ;;  %v2505_v30 = vmax.f32 %v2487_v31, 0.0  ;;  %v4484_v5 = vmax.f32 %v4466_v47, 0.0  ;;  %v2175_v3 = vmul.f32 %v11395_v36, %v2151_v56  ;;  %v4468_v9 = vmul.f32 %v4450_v8, %v11395_v36  ;;  %v2132_v45 = vld [vmem:[#allocation2 + $0x30] sm:$0xff] }
 0x26e   : > { %9065 = vmatprep.mubr.msk.f32.mxu1 %vm1663_vm5, %v2500_v15  ;;  %9282 = vmatprep.mubr.msk.f32.mxu0 %vm1663_vm5, %v2426_v39  ;;  %v2192_v0 = vmax.f32 %v2174_v1, 0.0  ;;  %v4485_v7 = vmax.f32 %v4467_v29, 0.0  ;;  %v2176_v16 = vmul.f32 %v11395_v36, %v2152_v50  ;;  %v4469_v25 = vmul.f32 %v4451_v41, %v11395_v36 }
 0x26f   : > { %v11538_v14 = vpack.c.bf16 %v5108_v37, %v5107_v63  ;;  %v2177_v15 = vmul.f32 %v11395_v36, %v2153_v58  ;;  %v2155_v39 = vsub.f32 %v2131_v11, %v11369_v60  ;;  %v4454_v18 = vsub.f32 %v4436_v6, %v11369_v60  ;;  %v2137_v63 = vld [vmem:[#allocation2 + $0x58] sm:$0xff]  ;;  %v2138_v11 = vld [vmem:[#allocation2 + $0x60] sm:$0xff] }
 0x270   : > { %v2193_v19 = vmax.f32 %v2175_v3, 0.0  ;;  %v4486_v59 = vmax.f32 %v4468_v9, 0.0  ;;  %v4470_v35 = vmul.f32 %v4452_v51, %v11395_v36  ;;  %v2178_v33 = vmul.f32 %v11395_v36, %v2154_v62  ;;  %v4442_v9 = vld [vmem:[#allocation2 + $0x4f8] sm:$0xff]  ;;  %v4443_v6 = vld [vmem:[#allocation2 + $0x500] sm:$0xff] }
 0x271   : > { %9066 = vmatmul.mubr.msk.f32.gmra.mrb[12].mxu1 %vm1663_vm5, %v2501_v13  ;;  %9283 = vmatmul.mubr.msk.f32.gmra.mrb[12].mxu0 %vm1663_vm5, %v2427_v48  ;;  %v2133_v13 = vld [vmem:[#allocation2 + $0x38] sm:$0xff]  ;;  %v2194_v17 = vmax.f32 %v2176_v16, 0.0  ;;  %v4487_v26 = vmax.f32 %v4469_v25, 0.0  ;;  %v4471_v49 = vmul.f32 %v4453_v2, %v11395_v36  ;;  %v4455_v53 = vsub.f32 %v4437_v21, %v11369_v60 }
 0x272   : > { %9068 = vmatprep.mubr.msk.f32.mxu1 %vm1663_vm5, %v2502_v57  ;;  %9295 = vmatprep.mubr.msk.f32.mxu0 %vm1663_vm5, %v4481_v38  ;;  %v4438_v48 = vld [vmem:[#allocation2 + $0x4d8] sm:$0xff]  ;;  %v4439_v57 = vld [vmem:[#allocation2 + $0x4e0] sm:$0xff]  ;;  %v9694_v38 = vpack.c.bf16 %v3006_v22, %v3005_v52  ;;  %v2195_v24 = vmax.f32 %v2177_v15, 0.0  ;;  %v2179_v40 = vmul.f32 %v11395_v36, %v2155_v39  ;;  %v2157_v46 = vsub.f32 %v2133_v13, %v11369_v60 }
 0x273   : > { %v4456_v4 = vsub.f32 %v4438_v48, %v11369_v60  ;;  %v4488_v56 = vmax.f32 %v4470_v35, 0.0  ;;  %v2196_v8 = vmax.f32 %v2178_v33, 0.0  ;;  %v4472_v50 = vmul.f32 %v4454_v18, %v11395_v36  ;;  %v2139_v18 = vld [vmem:[#allocation2 + $0x68] sm:$0xff]  ;;  %v2140_v35 = vld [vmem:[#allocation2 + $0x70] sm:$0xff] }
 0x274   : > { %v2158_v20 = vsub.f32 %v2134_v42, %v11369_v60  ;;  %v4473_v47 = vmul.f32 %v4455_v53, %v11395_v36  ;;  %v4457_v55 = vsub.f32 %v4439_v57, %v11369_v60  ;;  %9696 = vmatprep.subr.msk.bf16.mxu1 %vm11335_vm9, %v9694_v38  ;;  %v2197_v1 = vmax.f32 %v2179_v40, 0.0  ;;  %v4731_v33 = vld [vmem:[#allocation2 + $0x510] sm:$0xff] }
 0x275   : > { %9069 = vmatmul.mubr.msk.f32.gmra.mrb[14].mxu1 %vm1663_vm5, %v2503_v23  ;;  %9296 = vmatmul.mubr.msk.f32.vlgmr.msra.gmra.mrb[0].mxu0 %vm1663_vm5, %v4482_v27  ;;  %v2135_v23 = vld [vmem:[#allocation2 + $0x48] sm:$0xff]  ;;  %v4489_v27 = vmax.f32 %v4471_v49, 0.0  ;;  %v2181_v29 = vmul.f32 %v11395_v36, %v2157_v46  ;;  %v4474_v41 = vmul.f32 %v4456_v4, %v11395_v36  ;;  %v4490_v58 = vmax.f32 %v4472_v50, 0.0  ;;  %v2141_v4 = vld [vmem:[#allocation2 + $0x78] sm:$0xff] }
 0x276   : > { %9741 = vmatpush3.bf16.msk.msra.mxu0 %vm11335_vm9, %v11421_v43  ;;  %9071 = vmatprep.mubr.msk.f32.mxu1 %vm1663_vm5, %v2504_v44  ;;  %v2156_v43 = vsub.f32 %v2132_v45, %v11369_v60  ;;  %v4441_v44 = vld [vmem:[#allocation2 + $0x4f0] sm:$0xff]  ;;  %v2182_v51 = vmul.f32 %v11395_v36, %v2158_v20  ;;  %v4458_v62 = vsub.f32 %v4440_v61, %v11369_v60 }
 0x277   : > { %9298 = vmatprep.mubr.msk.f32.mxu0 %vm1663_vm5, %v4483_v32  ;;  %9744 = vmatprep.subr.msk.bf16.mxu0 %vm11335_vm9, %v11538_v14  ;;  %v2159_v32 = vsub.f32 %v2135_v23, %v11369_v60  ;;  %v2160_v2 = vsub.f32 %v2136_v54, %v11369_v60  ;;  %v4459_v3 = vsub.f32 %v4441_v44, %v11369_v60  ;;  %v2199_v45 = vmax.f32 %v2181_v29, 0.0 }
 0x278   : > { %v2180_v31 = vmul.f32 %v11395_v36, %v2156_v43  ;;  %v2161_v16 = vsub.f32 %v2137_v63, %v11369_v60  ;;  %v2200_v25 = vmax.f32 %v2182_v51, 0.0  ;;  %v4476_v21 = vmul.f32 %v4458_v62, %v11395_v36  ;;  %v4444_v43 = vld [vmem:[#allocation2 + $0x508] sm:$0xff]  ;;  %v2933_v62 = vld [vmem:[#allocation2 + $0x2d0] sm:$0xff] }
 0x279   : > { %9072 = vmatmul.mubr.msk.f32.gmra.mrb[16].mxu1 %vm1663_vm5, %v2505_v30  ;;  %9299 = vmatmul.mubr.msk.f32.gmra.mrb[2].mxu0 %vm1663_vm5, %v4484_v5  ;;  %v4491_v30 = vmax.f32 %v4473_v47, 0.0  ;;  %v4475_v5 = vmul.f32 %v4457_v55, %v11395_v36  ;;  %v2184_v15 = vmul.f32 %v11395_v36, %v2160_v2  ;;  %v4460_v39 = vsub.f32 %v4442_v9, %v11369_v60  ;;  %v4735_v2 = vld [vmem:[#allocation2 + $0x530] sm:$0xff] }
 0x27a   : > { %9078 = vmatprep.mubr.msk.f32.mxu1 %vm1663_vm5, %v2192_v0  ;;  %9301 = vmatprep.mubr.msk.f32.mxu0 %vm1663_vm5, %v4485_v7  ;;  %v2198_v37 = vmax.f32 %v2180_v31, 0.0  ;;  %v4492_v0 = vmax.f32 %v4474_v41, 0.0  ;;  %v2183_v7 = vmul.f32 %v11395_v36, %v2159_v32  ;;  %v4477_v22 = vmul.f32 %v4459_v3, %v11395_v36  ;;  %v2143_v31 = vld [vmem:[#allocation2 + $0x88] sm:$0xff] }
 0x27b   : > { %v4493_v52 = vmax.f32 %v4475_v5, 0.0  ;;  %v2185_v48 = vmul.f32 %v11395_v36, %v2161_v16  ;;  %v4494_v49 = vmax.f32 %v4476_v21, 0.0  ;;  %v2202_v53 = vmax.f32 %v2184_v15, 0.0  ;;  %v4734_v32 = vld [vmem:[#allocation2 + $0x528] sm:$0xff] }
 0x27c   : > { %v2201_v13 = vmax.f32 %v2183_v7, 0.0  ;;  %v4478_v42 = vmul.f32 %v4460_v39, %v11395_v36  ;;  %v2164_v57 = vsub.f32 %v2140_v35, %v11369_v60  ;;  %v4749_v46 = vsub.f32 %v4731_v33, %v11369_v60  ;;  %v4737_v39 = vld [vmem:[#allocation2 + $0x540] sm:$0xff] }
 0x27d   : > { %9079 = vmatmul.mubr.msk.f32.vlgmr.msra.gmra.mrb[0].mxu1 %vm1663_vm5, %v2193_v19  ;;  %9302 = vmatmul.mubr.msk.f32.gmra.mrb[4].mxu0 %vm1663_vm5, %v4486_v59  ;;  %v2162_v19 = vsub.f32 %v2138_v11, %v11369_v60  ;;  %v4461_v59 = vsub.f32 %v4443_v6, %v11369_v60  ;;  %v2203_v50 = vmax.f32 %v2185_v48, 0.0  ;;  %v2165_v61 = vsub.f32 %v2141_v4, %v11369_v60  ;;  %v2934_v11 = vld [vmem:[#allocation2 + $0x2d8] sm:$0xff]  ;;  %v2284_v48 = vld [vmem:[%s12837_s3 + $0xa] sm:$0xff] }
 0x27e   : > { %9081 = vmatprep.mubr.msk.f32.mxu1 %vm1663_vm5, %v2194_v17  ;;  %9304 = vmatprep.mubr.msk.f32.mxu0 %vm1663_vm5, %v4487_v26  ;;  %v2163_v17 = vsub.f32 %v2139_v18, %v11369_v60  ;;  %v4462_v26 = vsub.f32 %v4444_v43, %v11369_v60  ;;  %v4496_v47 = vmax.f32 %v4478_v42, 0.0  ;;  %v2188_v55 = vmul.f32 %v11395_v36, %v2164_v57  ;;  %v4736_v6 = vld [vmem:[#allocation2 + $0x538] sm:$0xff]  ;;  %v4738_v57 = vld [vmem:[#allocation2 + $0x548] sm:$0xff] }
 0x27f   : > { %9699 = vmatpush3.bf16.msk.msra.mxu1 %vm11335_vm9, %v9694_v38  ;;  %v4495_v38 = vmax.f32 %v4477_v22, 0.0  ;;  %v4479_v40 = vmul.f32 %v4461_v59, %v11395_v36  ;;  %v4767_v29 = vmul.f32 %v4749_v46, %v11395_v36  ;;  %v2167_v51 = vsub.f32 %v2143_v31, %v11369_v60  ;;  %v5412_v22 = vld [vmem:[%s12837_s3 + $0x76] sm:$0x3] }
 0x280   : > { %v2187_v20 = vmul.f32 %v11395_v36, %v2163_v17  ;;  %v4480_v23 = vmul.f32 %v4462_v26, %v11395_v36  ;;  %v2189_v5 = vmul.f32 %v11395_v36, %v2165_v61  ;;  %v4752_v9 = vsub.f32 %v4734_v32, %v11369_v60  ;;  %v2285_v17 = vld [vmem:[%s12837_s3 + $0x12] sm:$0x3]  ;;  %v4741_v32 = vld [vmem:[#allocation2 + $0x560] sm:$0xff] }
 0x281   : > { %9082 = vmatmul.mubr.msk.f32.gmra.mrb[2].mxu1 %vm1663_vm5, %v2195_v24  ;;  %9305 = vmatmul.mubr.msk.f32.gmra.mrb[6].mxu0 %vm1663_vm5, %v4488_v56  ;;  %v2186_v24 = vmul.f32 %v11395_v36, %v2162_v19  ;;  %v4732_v56 = vld [vmem:[#allocation2 + $0x518] sm:$0xff]  ;;  %v2951_v7 = vsub.f32 %v2933_v62, %v11369_v60  ;;  %v4753_v16 = vsub.f32 %v4735_v2, %v11369_v60  ;;  %v4739_v46 = vld [vmem:[#allocation2 + $0x550] sm:$0xff] }
 0x282   : > { %9084 = vmatprep.mubr.msk.f32.mxu1 %vm1663_vm5, %v2196_v8  ;;  %9307 = vmatprep.mubr.msk.f32.mxu0 %vm1663_vm5, %v4489_v27  ;;  %v2142_v8 = vld [vmem:[#allocation2 + $0x80] sm:$0xff]  ;;  %v4750_v54 = vsub.f32 %v4732_v56, %v11369_v60  ;;  %v2205_v63 = vmax.f32 %v2187_v20, 0.0  ;;  %v2191_v15 = vmul.f32 %v11395_v36, %v2167_v51  ;;  %v2952_v18 = vsub.f32 %v2934_v11, %v11369_v60 }
 0x283   : > { %v4733_v27 = vld [vmem:[#allocation2 + $0x520] sm:$0xff]  ;;  %v2204_v44 = vmax.f32 %v2186_v24, 0.0  ;;  %v2166_v41 = vsub.f32 %v2142_v8, %v11369_v60  ;;  %v4754_v43 = vsub.f32 %v4736_v6, %v11369_v60  ;;  %v2207_v19 = vmax.f32 %v2189_v5, 0.0  ;;  %v2940_v5 = vld [vmem:[#allocation2 + $0x308] sm:$0xff] }
 0x284   : > { %v4768_v3 = vmul.f32 %v4750_v54, %v11395_v36  ;;  %v4770_v35 = vmul.f32 %v4752_v9, %v11395_v36  ;;  %v4755_v42 = vsub.f32 %v4737_v39, %v11369_v60  ;;  %v2970_v56 = vmul.f32 %v2952_v18, %v11395_v36 }
 0x285   : > { %9085 = vmatmul.mubr.msk.f32.gmra.mrb[4].mxu1 %vm1663_vm5, %v2197_v1  ;;  %9308 = vmatmul.mubr.msk.f32.gmra.mrb[8].mxu0 %vm1663_vm5, %v4490_v58  ;;  %v4497_v1 = vmax.f32 %v4479_v40, 0.0  ;;  %v4751_v58 = vsub.f32 %v4733_v27, %v11369_v60  ;;  %v2209_v40 = vmax.f32 %v2191_v15, 0.0  ;;  %v4772_v8 = vmul.f32 %v4754_v43, %v11395_v36 }
 0x286   : > { %9087 = vmatprep.mubr.msk.f32.mxu1 %vm1663_vm5, %v2198_v37  ;;  %9310 = vmatprep.mubr.msk.f32.mxu0 %vm1663_vm5, %v4491_v30  ;;  %v4498_v37 = vmax.f32 %v4480_v23, 0.0  ;;  %v2206_v30 = vmax.f32 %v2188_v55, 0.0  ;;  %v4786_v59 = vmax.f32 %v4768_v3, 0.0  ;;  %v9700_v20 = vpack.c.bf16 %v2285_v17, %v2284_v48  ;;  %v2938_v55 = vld [vmem:[#allocation2 + $0x2f8] sm:$0xff]  ;;  %v4742_v3 = vld [vmem:[#allocation2 + $0x568] sm:$0xff]  ;;  %v2943_v48 = vld [vmem:[#allocation2 + $0x320] sm:$0xff] }
 0x287   : > { %v4769_v21 = vmul.f32 %v4751_v58, %v11395_v36  ;;  %v4788_v23 = vmax.f32 %v4770_v35, 0.0  ;;  %v4756_v31 = vsub.f32 %v4738_v57, %v11369_v60  ;;  %v2988_v58 = vmax.f32 %v2970_v56, 0.0  ;;  %v4745_v17 = vld [vmem:[#allocation2 + $0x580] sm:$0xff] }
 0x288   : > { %v4790_v51 = vmax.f32 %v4772_v8, 0.0  ;;  %v2956_v62 = vsub.f32 %v2938_v55, %v11369_v60  ;;  %9702 = vmatprep.subr.msk.bf16.mxu1 %vm11335_vm9, %v9700_v20  ;;  %v4760_v15 = vsub.f32 %v4742_v3, %v11369_v60 }
 0x289   : > { %9088 = vmatmul.mubr.msk.f32.gmra.mrb[6].mxu1 %vm1663_vm5, %v2199_v45  ;;  %9311 = vmatmul.mubr.msk.f32.gmra.mrb[10].mxu0 %vm1663_vm5, %v4492_v0  ;;  %v4785_v45 = vmax.f32 %v4767_v29, 0.0  ;;  %v2190_v0 = vmul.f32 %v11395_v36, %v2166_v41  ;;  %v4787_v24 = vmax.f32 %v4769_v21, 0.0  ;;  %v4740_v29 = vld [vmem:[#allocation2 + $0x558] sm:$0xff]  ;;  %v2939_v41 = vld [vmem:[#allocation2 + $0x300] sm:$0xff]  ;;  %v2958_v21 = vsub.f32 %v2940_v5, %v11369_v60 }
 0x28a   : > { %9090 = vmatprep.mubr.msk.f32.mxu1 %vm1663_vm5, %v2200_v25  ;;  %9313 = vmatprep.mubr.msk.f32.mxu0 %vm1663_vm5, %v4493_v52  ;;  %v2935_v25 = vld [vmem:[#allocation2 + $0x2e0] sm:$0xff]  ;;  %v5411_v52 = vld [vmem:[%s12837_s3 + $0x6e] sm:$0xff]  ;;  %v2957_v6 = vsub.f32 %v2939_v41, %v11369_v60 }
 0x28b   : > { %v2953_v33 = vsub.f32 %v2935_v25, %v11369_v60  ;;  %v2208_v26 = vmax.f32 %v2190_v0, 0.0  ;;  %v11661_v4 = vpack.c.bf16 %v5412_v22, %v5411_v52  ;;  %v2941_v0 = vld [vmem:[#allocation2 + $0x310] sm:$0xff]  ;;  %v2974_v25 = vmul.f32 %v2956_v62, %v11395_v36  ;;  %v2942_v22 = vld [vmem:[#allocation2 + $0x318] sm:$0xff] }
 0x28c   : > { %v2959_v52 = vsub.f32 %v2941_v0, %v11369_v60 }
 0x28d   : > { %9091 = vmatmul.mubr.msk.f32.gmra.mrb[8].mxu1 %vm1663_vm5, %v2201_v13  ;;  %9314 = vmatmul.mubr.msk.f32.gmra.mrb[12].mxu0 %vm1663_vm5, %v4494_v49  ;;  %v2936_v13 = vld [vmem:[#allocation2 + $0x2e8] sm:$0xff]  ;;  %v2969_v49 = vmul.f32 %v2951_v7, %v11395_v36  ;;  %v2971_v27 = vmul.f32 %v2953_v33, %v11395_v36  ;;  %v4743_v7 = vld [vmem:[#allocation2 + $0x570] sm:$0xff] }
 0x28e   : > { %9093 = vmatprep.mubr.msk.f32.mxu1 %vm1663_vm5, %v2202_v53  ;;  %9316 = vmatprep.mubr.msk.f32.mxu0 %vm1663_vm5, %v4495_v38  ;;  %v4771_v53 = vmul.f32 %v4753_v16, %v11395_v36  ;;  %v2937_v38 = vld [vmem:[#allocation2 + $0x2f0] sm:$0xff]  ;;  %v4761_v33 = vsub.f32 %v4743_v7, %v11369_v60 }
 0x28f   : > { %v2987_v61 = vmax.f32 %v2969_v49, 0.0  ;;  %v2989_v2 = vmax.f32 %v2971_v27, 0.0  ;;  %v2976_v49 = vmul.f32 %v2958_v21, %v11395_v36  ;;  %v2945_v27 = vld [vmem:[#allocation2 + $0x330] sm:$0xff] }
 0x290   : > { %v4789_v54 = vmax.f32 %v4771_v53, 0.0  ;;  %v4778_v53 = vmul.f32 %v4760_v15, %v11395_v36  ;;  %v2963_v62 = vsub.f32 %v2945_v27, %v11369_v60  ;;  %v2948_v15 = vld [vmem:[#allocation2 + $0x348] sm:$0xff] }
 0x291   : > { %9094 = vmatmul.mubr.msk.f32.gmra.mrb[10].mxu1 %vm1663_vm5, %v2203_v50  ;;  %9317 = vmatmul.mubr.msk.f32.gmra.mrb[14].mxu0 %vm1663_vm5, %v4496_v47  ;;  %v2954_v50 = vsub.f32 %v2936_v13, %v11369_v60  ;;  %v2955_v47 = vsub.f32 %v2937_v38, %v11369_v60  ;;  %v4744_v13 = vld [vmem:[#allocation2 + $0x578] sm:$0xff]  ;;  %v2977_v38 = vmul.f32 %v2959_v52, %v11395_v36 }
 0x292   : > { %9096 = vmatprep.mubr.msk.f32.mxu1 %vm1663_vm5, %v2204_v44  ;;  %9319 = vmatprep.mubr.msk.f32.mxu0 %vm1663_vm5, %v4497_v1  ;;  %v4773_v44 = vmul.f32 %v4755_v42, %v11395_v36  ;;  %v4757_v1 = vsub.f32 %v4739_v46, %v11369_v60  ;;  %v2960_v42 = vsub.f32 %v2942_v22, %v11369_v60  ;;  %v2944_v46 = vld [vmem:[#allocation2 + $0x328] sm:$0xff]  ;;  %v4796_v55 = vmax.f32 %v4778_v53, 0.0 }
 0x294   : > { %v4791_v9 = vmax.f32 %v4773_v44, 0.0  ;;  %v4775_v11 = vmul.f32 %v4757_v1, %v11395_v36  ;;  %v2995_v44 = vmax.f32 %v2977_v38, 0.0  ;;  %v5038_v38 = vld [vmem:[#allocation2 + $0x5b8] sm:$0xff] }
 0x295   : > { %9097 = vmatmul.mubr.msk.f32.gmra.mrb[12].mxu1 %vm1663_vm5, %v2205_v63  ;;  %9320 = vmatmul.mubr.msk.f32.gmra.mrb[16].mxu0 %vm1663_vm5, %v4498_v37  ;;  %v4774_v63 = vmul.f32 %v4756_v31, %v11395_v36  ;;  %v2973_v37 = vmul.f32 %v2955_v47, %v11395_v36  ;;  %v4747_v31 = vld [vmem:[#allocation2 + $0x590] sm:$0xff]  ;;  %v2994_v47 = vmax.f32 %v2976_v49, 0.0 }
 0x296   : > { %9099 = vmatprep.mubr.msk.f32.mxu1 %vm1663_vm5, %v2206_v30  ;;  %9326 = vmatprep.mubr.msk.f32.mxu0 %vm1663_vm5, %v4785_v45  ;;  %v4758_v30 = vsub.f32 %v4740_v29, %v11369_v60  ;;  %v4759_v45 = vsub.f32 %v4741_v32, %v11369_v60  ;;  %v2946_v32 = vld [vmem:[#allocation2 + $0x338] sm:$0xff] }
 0x297   : > { %v4792_v39 = vmax.f32 %v4774_v63, 0.0  ;;  %v2991_v18 = vmax.f32 %v2973_v37, 0.0  ;;  %v2947_v63 = vld [vmem:[#allocation2 + $0x340] sm:$0xff]  ;;  %v2964_v3 = vsub.f32 %v2946_v32, %v11369_v60 }
 0x298   : > { %v4776_v43 = vmul.f32 %v4758_v30, %v11395_v36  ;;  %v4777_v35 = vmul.f32 %v4759_v45, %v11395_v36  ;;  %v5035_v37 = vld [vmem:[#allocation2 + $0x5a0] sm:$0xff]  ;;  %v2965_v0 = vsub.f32 %v2947_v63, %v11369_v60 }
 0x299   : > { %9100 = vmatmul.mubr.msk.f32.gmra.mrb[14].mxu1 %vm1663_vm5, %v2207_v19  ;;  %9327 = vmatmul.mubr.msk.f32.vlgmr.msra.gmra.mrb[0].mxu0 %vm1663_vm5, %v4786_v59  ;;  %v4793_v19 = vmax.f32 %v4775_v11, 0.0  ;;  %v2975_v59 = vmul.f32 %v2957_v6, %v11395_v36  ;;  %v5053_v21 = vsub.f32 %v5035_v37, %v11369_v60  ;;  %v2982_v52 = vmul.f32 %v2964_v3, %v11395_v36  ;;  %v5716_v63 = vld [vmem:[%s12837_s3 + $0x80] sm:$0x3] }
 0x29a   : > { %9747 = vmatpush3.bf16.msk.msra.mxu0 %vm11335_vm9, %v11538_v14  ;;  %9102 = vmatprep.mubr.msk.f32.mxu1 %vm1663_vm5, %v2208_v26  ;;  %v2972_v14 = vmul.f32 %v2954_v50, %v11395_v36  ;;  %v2992_v26 = vmax.f32 %v2974_v25, 0.0  ;;  %v4794_v57 = vmax.f32 %v4776_v43, 0.0  ;;  %v4795_v8 = vmax.f32 %v4777_v35, 0.0  ;;  %v3504_v35 = vld [vmem:[%s12837_s3 + $0x44] sm:$0x3] }
 0x29b   : > { %9329 = vmatprep.mubr.msk.f32.mxu0 %vm1663_vm5, %v4787_v24  ;;  %9750 = vmatprep.subr.msk.bf16.mxu0 %vm11335_vm9, %v11661_v4  ;;  %v4762_v24 = vsub.f32 %v4744_v13, %v11369_v60  ;;  %v2993_v56 = vmax.f32 %v2975_v59, 0.0  ;;  %v4779_v50 = vmul.f32 %v4761_v33, %v11395_v36  ;;  %v3503_v59 = vld [vmem:[%s12837_s3 + $0x3c] sm:$0xff]  ;;  %v2983_v13 = vmul.f32 %v2965_v0, %v11395_v36 }
 0x29c   : > { %v2990_v16 = vmax.f32 %v2972_v14, 0.0 }
 0x29d   : > { %9103 = vmatmul.mubr.msk.f32.gmra.mrb[16].mxu1 %vm1663_vm5, %v2209_v40  ;;  %9330 = vmatmul.mubr.msk.f32.gmra.mrb[2].mxu0 %vm1663_vm5, %v4788_v23  ;;  %v2961_v40 = vsub.f32 %v2943_v48, %v11369_v60  ;;  %v4746_v23 = vld [vmem:[#allocation2 + $0x588] sm:$0xff]  ;;  %v4780_v1 = vmul.f32 %v4762_v24, %v11395_v36  ;;  %v2966_v48 = vsub.f32 %v2948_v15, %v11369_v60 }
 0x29e   : > { %9109 = vmatprep.mubr.msk.f32.mxu1 %vm1663_vm5, %v2987_v61  ;;  %9332 = vmatprep.mubr.msk.f32.mxu0 %vm1663_vm5, %v4789_v54  ;;  %v2978_v61 = vmul.f32 %v2960_v42, %v11395_v36  ;;  %v2962_v54 = vsub.f32 %v2944_v46, %v11369_v60  ;;  %v4764_v41 = vsub.f32 %v4746_v23, %v11369_v60  ;;  %v5039_v46 = vld [vmem:[#allocation2 + $0x5c0] sm:$0xff]  ;;  %v3001_v23 = vmax.f32 %v2983_v13, 0.0 }
 0x29f   : > { %v2979_v29 = vmul.f32 %v2961_v40, %v11395_v36  ;;  %v4798_v11 = vmax.f32 %v4780_v1, 0.0  ;;  %v5071_v42 = vmul.f32 %v5053_v21, %v11395_v36  ;;  %v2212_v40 = vld [vmem:[#allocation2 + $0x90] sm:$0xff]  ;;  %v2984_v27 = vmul.f32 %v2966_v48, %v11395_v36  ;;  %v5043_v21 = vld [vmem:[#allocation2 + $0x5e0] sm:$0xff] }
 0x2a0   : > { %v2996_v30 = vmax.f32 %v2978_v61, 0.0  ;;  %v2980_v5 = vmul.f32 %v2962_v54, %v11395_v36  ;;  %v4782_v45 = vmul.f32 %v4764_v41, %v11395_v36  ;;  %v5040_v61 = vld [vmem:[#allocation2 + $0x5c8] sm:$0xff]  ;;  %v2230_v1 = vsub.f32 %v2212_v40, %v11369_v60  ;;  %v2214_v41 = vld [vmem:[#allocation2 + $0xa0] sm:$0xff] }
 0x2a1   : > { %9110 = vmatmul.mubr.msk.f32.vlgmr.msra.gmra.mrb[0].mxu1 %vm1663_vm5, %v2988_v58  ;;  %9333 = vmatmul.mubr.msk.f32.gmra.mrb[4].mxu0 %vm1663_vm5, %v4790_v51  ;;  %v4748_v58 = vld [vmem:[#allocation2 + $0x598] sm:$0xff]  ;;  %v4797_v51 = vmax.f32 %v4779_v50, 0.0  ;;  %v2997_v6 = vmax.f32 %v2979_v29, 0.0  ;;  %v5089_v54 = vmax.f32 %v5071_v42, 0.0  ;;  %v5057_v29 = vsub.f32 %v5039_v46, %v11369_v60  ;;  %v5045_v42 = vld [vmem:[#allocation2 + $0x5f0] sm:$0xff]  ;;  %v2219_v40 = vld [vmem:[#allocation2 + $0xc8] sm:$0xff] }
 0x2a2   : > { %9112 = vmatprep.mubr.msk.f32.mxu1 %vm1663_vm5, %v2989_v2  ;;  %9335 = vmatprep.mubr.msk.f32.mxu0 %vm1663_vm5, %v4791_v9  ;;  %v4765_v2 = vsub.f32 %v4747_v31, %v11369_v60  ;;  %v4766_v9 = vsub.f32 %v4748_v58, %v11369_v60  ;;  %v2998_v43 = vmax.f32 %v2980_v5, 0.0  ;;  %v4800_v33 = vmax.f32 %v4782_v45, 0.0  ;;  %v5041_v58 = vld [vmem:[#allocation2 + $0x5d0] sm:$0xff] }
 0x2a3   : > { %9705 = vmatpush3.bf16.msk.msra.mxu1 %vm11335_vm9, %v9700_v20  ;;  %v4763_v20 = vsub.f32 %v4745_v17, %v11369_v60  ;;  %v3002_v37 = vmax.f32 %v2984_v27, 0.0  ;;  %v2232_v3 = vsub.f32 %v2214_v41, %v11369_v60  ;;  %v5075_v45 = vmul.f32 %v5057_v29, %v11395_v36 }
 0x2a4   : > { %v4783_v25 = vmul.f32 %v4765_v2, %v11395_v36  ;;  %v4784_v22 = vmul.f32 %v4766_v9, %v11395_v36  ;;  %v5715_v2 = vld [vmem:[%s12837_s3 + $0x78] sm:$0xff]  ;;  %v2215_v9 = vld [vmem:[#allocation2 + $0xa8] sm:$0xff]  ;;  %v5059_v0 = vsub.f32 %v5041_v58, %v11369_v60 }
 0x2a5   : > { %9113 = vmatmul.mubr.msk.f32.gmra.mrb[2].mxu1 %vm1663_vm5, %v2990_v16  ;;  %9336 = vmatmul.mubr.msk.f32.gmra.mrb[6].mxu0 %vm1663_vm5, %v4792_v39  ;;  %v4781_v14 = vmul.f32 %v4763_v20, %v11395_v36  ;;  %v2981_v16 = vmul.f32 %v2963_v62, %v11395_v36  ;;  %v5036_v39 = vld [vmem:[#allocation2 + $0x5a8] sm:$0xff]  ;;  %v5058_v62 = vsub.f32 %v5040_v61, %v11369_v60  ;;  %v5093_v48 = vmax.f32 %v5075_v45, 0.0  ;;  %v2220_v61 = vld [vmem:[#allocation2 + $0xd0] sm:$0xff] }
 0x2a6   : > { %9115 = vmatprep.mubr.msk.f32.mxu1 %vm1663_vm5, %v2991_v18  ;;  %9338 = vmatprep.mubr.msk.f32.mxu0 %vm1663_vm5, %v4793_v19  ;;  %v2949_v18 = vld [vmem:[#allocation2 + $0x350] sm:$0xff]  ;;  %v5054_v17 = vsub.f32 %v5036_v39, %v11369_v60  ;;  %v4801_v53 = vmax.f32 %v4783_v25, 0.0  ;;  %v4802_v50 = vmax.f32 %v4784_v22, 0.0  ;;  %v11798_v15 = vpack.c.bf16 %v5716_v63, %v5715_v2 }
 0x2a7   : > { %v4799_v7 = vmax.f32 %v4781_v14, 0.0  ;;  %v5037_v19 = vld [vmem:[#allocation2 + $0x5b0] sm:$0xff]  ;;  %v2999_v49 = vmax.f32 %v2981_v16, 0.0 }
 0x2a8   : > { %v5055_v24 = vsub.f32 %v5037_v19, %v11369_v60  ;;  %v5072_v31 = vmul.f32 %v5054_v17, %v11395_v36  ;;  %v2216_v16 = vld [vmem:[#allocation2 + $0xb0] sm:$0xff]  ;;  %v2250_v19 = vmul.f32 %v2232_v3, %v11395_v36  ;;  %v5077_v17 = vmul.f32 %v5059_v0, %v11395_v36  ;;  %v2222_v3 = vld [vmem:[#allocation2 + $0xe0] sm:$0xff] }
 0x2a9   : > { %9116 = vmatmul.mubr.msk.f32.gmra.mrb[4].mxu1 %vm1663_vm5, %v2992_v26  ;;  %9339 = vmatmul.mubr.msk.f32.gmra.mrb[8].mxu0 %vm1663_vm5, %v4794_v57  ;;  %v2950_v26 = vld [vmem:[#allocation2 + $0x358] sm:$0xff]  ;;  %v2967_v57 = vsub.f32 %v2949_v18, %v11369_v60 }
 0x2aa   : > { %9118 = vmatprep.mubr.msk.f32.mxu1 %vm1663_vm5, %v2993_v56  ;;  %9341 = vmatprep.mubr.msk.f32.mxu0 %vm1663_vm5, %v4795_v8  ;;  %v11763_v56 = vpack.c.bf16 %v3504_v35, %v3503_v59  ;;  %v3000_v8 = vmax.f32 %v2982_v52, 0.0  ;;  %v2968_v20 = vsub.f32 %v2950_v26, %v11369_v60  ;;  %v5073_v32 = vmul.f32 %v5055_v24, %v11395_v36 }
 0x2ab   : > { %v2233_v52 = vsub.f32 %v2215_v9, %v11369_v60  ;;  %v2234_v35 = vsub.f32 %v2216_v16, %v11369_v60  ;;  %v5061_v26 = vsub.f32 %v5043_v21, %v11369_v60  ;;  %v2268_v46 = vmax.f32 %v2250_v19, 0.0  ;;  %v2224_v19 = vld [vmem:[#allocation2 + $0xf0] sm:$0xff] }
 0x2ac   : > { %9708 = vmatprep.subr.msk.bf16.mxu1 %vm11335_vm9, %v11763_v56  ;;  %v5091_v25 = vmax.f32 %v5073_v32, 0.0  ;;  %v5095_v27 = vmax.f32 %v5077_v17, 0.0  ;;  %v2240_v21 = vsub.f32 %v2222_v3, %v11369_v60 }
 0x2ad   : > { %9119 = vmatmul.mubr.msk.f32.gmra.mrb[6].mxu1 %vm1663_vm5, %v2994_v47  ;;  %9342 = vmatmul.mubr.msk.f32.gmra.mrb[10].mxu0 %vm1663_vm5, %v4796_v55  ;;  %v5056_v47 = vsub.f32 %v5038_v38, %v11369_v60  ;;  %v2213_v55 = vld [vmem:[#allocation2 + $0x98] sm:$0xff] }
 0x2ae   : > { %9121 = vmatprep.mubr.msk.f32.mxu1 %vm1663_vm5, %v2995_v44  ;;  %9344 = vmatprep.mubr.msk.f32.mxu0 %vm1663_vm5, %v4797_v51  ;;  %v2985_v44 = vmul.f32 %v2967_v57, %v11395_v36  ;;  %v2986_v51 = vmul.f32 %v2968_v20, %v11395_v36  ;;  %v2231_v14 = vsub.f32 %v2213_v55, %v11369_v60 }
 0x2af   : > { %v5074_v5 = vmul.f32 %v5056_v47, %v11395_v36  ;;  %v5063_v55 = vsub.f32 %v5045_v42, %v11369_v60 }
 0x2b0   : > { %v3004_v39 = vmax.f32 %v2986_v51, 0.0  ;;  %v2249_v18 = vmul.f32 %v2231_v14, %v11395_v36  ;;  %v2238_v14 = vsub.f32 %v2220_v61, %v11369_v60 }
 0x2b1   : > { %9122 = vmatmul.mubr.msk.f32.gmra.mrb[8].mxu1 %vm1663_vm5, %v2996_v30  ;;  %9345 = vmatmul.mubr.msk.f32.gmra.mrb[12].mxu0 %vm1663_vm5, %v4798_v11  ;;  %v5090_v30 = vmax.f32 %v5072_v31, 0.0  ;;  %v3003_v11 = vmax.f32 %v2985_v44, 0.0  ;;  %v5092_v22 = vmax.f32 %v5074_v5, 0.0  ;;  %v5079_v31 = vmul.f32 %v5061_v26, %v11395_v36  ;;  %v5047_v44 = vld [vmem:[#allocation2 + $0x600] sm:$0xff]  ;;  %v5048_v5 = vld [vmem:[#allocation2 + $0x608] sm:$0xff] }
 0x2b2   : > { %9124 = vmatprep.mubr.msk.f32.mxu1 %vm1663_vm5, %v2997_v6  ;;  %9347 = vmatprep.mubr.msk.f32.mxu0 %vm1663_vm5, %v4799_v7  ;;  %v2248_v6 = vmul.f32 %v2230_v1, %v11395_v36  ;;  %v5042_v7 = vld [vmem:[#allocation2 + $0x5d8] sm:$0xff]  ;;  %v2267_v57 = vmax.f32 %v2249_v18, 0.0  ;;  %v2256_v16 = vmul.f32 %v2238_v14, %v11395_v36 }
 0x2b3   : > { %v5060_v59 = vsub.f32 %v5042_v7, %v11369_v60  ;;  %v5097_v2 = vmax.f32 %v5079_v31, 0.0  ;;  %v5050_v18 = vld [vmem:[#allocation2 + $0x618] sm:$0xff] }
 0x2b4   : > { %v2266_v13 = vmax.f32 %v2248_v6, 0.0  ;;  %v5340_v14 = vld [vmem:[#allocation2 + $0x638] sm:$0xff] }
 0x2b5   : > { %9125 = vmatmul.mubr.msk.f32.gmra.mrb[10].mxu1 %vm1663_vm5, %v2998_v43  ;;  %9348 = vmatmul.mubr.msk.f32.gmra.mrb[14].mxu0 %vm1663_vm5, %v4800_v33  ;;  %v5076_v43 = vmul.f32 %v5058_v62, %v11395_v36  ;;  %v2217_v33 = vld [vmem:[#allocation2 + $0xb8] sm:$0xff] }
 0x2b6   : > { %9127 = vmatprep.mubr.msk.f32.mxu1 %vm1663_vm5, %v2999_v49  ;;  %9350 = vmatprep.mubr.msk.f32.mxu0 %vm1663_vm5, %v4801_v53  ;;  %v5044_v49 = vld [vmem:[#allocation2 + $0x5e8] sm:$0xff]  ;;  %v2218_v53 = vld [vmem:[#allocation2 + $0xc0] sm:$0xff]  ;;  %v2235_v24 = vsub.f32 %v2217_v33, %v11369_v60  ;;  %v2221_v62 = vld [vmem:[#allocation2 + $0xd8] sm:$0xff] }
 0x2b7   : > { %v5094_v38 = vmax.f32 %v5076_v43, 0.0  ;;  %v5062_v20 = vsub.f32 %v5044_v49, %v11369_v60  ;;  %v2236_v47 = vsub.f32 %v2218_v53, %v11369_v60  ;;  %v2239_v0 = vsub.f32 %v2221_v62, %v11369_v60  ;;  %v2358_v33 = vld [vmem:[%s12837_s3 + $0x14] sm:$0xff] }
 0x2b8   : > { %v2253_v29 = vmul.f32 %v2235_v24, %v11395_v36  ;;  %v5068_v49 = vsub.f32 %v5050_v18, %v11369_v60  ;;  %v2274_v53 = vmax.f32 %v2256_v16, 0.0  ;;  %v2228_v62 = vld [vmem:[#allocation2 + $0x110] sm:$0xff] }
 0x2b9   : > { %9128 = vmatmul.mubr.msk.f32.gmra.mrb[12].mxu1 %vm1663_vm5, %v3000_v8  ;;  %9351 = vmatmul.mubr.msk.f32.gmra.mrb[16].mxu0 %vm1663_vm5, %v4802_v50  ;;  %v5078_v8 = vmul.f32 %v5060_v59, %v11395_v36  ;;  %v2252_v50 = vmul.f32 %v2234_v35, %v11395_v36  ;;  %v5080_v51 = vmul.f32 %v5062_v20, %v11395_v36  ;;  %v5051_v35 = vld [vmem:[#allocation2 + $0x620] sm:$0xff]  ;;  %v5343_v18 = vld [vmem:[#allocation2 + $0x650] sm:$0xff] }
 0x2ba   : > { %9130 = vmatprep.mubr.msk.f32.mxu1 %vm1663_vm5, %v3001_v23  ;;  %9357 = vmatprep.mubr.msk.f32.mxu0 %vm1663_vm5, %v5089_v54  ;;  %v5046_v23 = vld [vmem:[#allocation2 + $0x5f8] sm:$0xff]  ;;  %v2237_v54 = vsub.f32 %v2219_v40, %v11369_v60  ;;  %v2254_v63 = vmul.f32 %v2236_v47, %v11395_v36  ;;  %v2271_v6 = vmax.f32 %v2253_v29, 0.0  ;;  %v2257_v17 = vmul.f32 %v2239_v0, %v11395_v36  ;;  %v2226_v20 = vld [vmem:[#allocation2 + $0x100] sm:$0xff] }
 0x2bb   : > { %v5064_v41 = vsub.f32 %v5046_v23, %v11369_v60  ;;  %v5096_v32 = vmax.f32 %v5078_v8, 0.0  ;;  %v2270_v58 = vmax.f32 %v2252_v50, 0.0  ;;  %v5098_v7 = vmax.f32 %v5080_v51, 0.0  ;;  %v5052_v8 = vld [vmem:[#allocation2 + $0x628] sm:$0xff]  ;;  %v5339_v23 = vld [vmem:[#allocation2 + $0x630] sm:$0xff] }
 0x2bc   : > { %v2255_v9 = vmul.f32 %v2237_v54, %v11395_v36  ;;  %v5086_v47 = vmul.f32 %v5068_v49, %v11395_v36  ;;  %v2227_v51 = vld [vmem:[#allocation2 + $0x108] sm:$0xff]  ;;  %v5344_v49 = vld [vmem:[#allocation2 + $0x658] sm:$0xff] }
 0x2bd   : > { %9131 = vmatmul.mubr.msk.f32.gmra.mrb[14].mxu1 %vm1663_vm5, %v3002_v37  ;;  %9358 = vmatmul.mubr.msk.f32.vlgmr.msra.gmra.mrb[0].mxu0 %vm1663_vm5, %v5090_v30  ;;  %v5081_v37 = vmul.f32 %v5063_v55, %v11395_v36  ;;  %v5065_v30 = vsub.f32 %v5047_v44, %v11369_v60  ;;  %v5082_v45 = vmul.f32 %v5064_v41, %v11395_v36 }
 0x2be   : > { %9753 = vmatpush3.bf16.msk.msra.mxu0 %vm11335_vm9, %v11661_v4  ;;  %9133 = vmatprep.mubr.msk.f32.mxu1 %vm1663_vm5, %v3003_v11  ;;  %v2251_v4 = vmul.f32 %v2233_v52, %v11395_v36  ;;  %v5049_v11 = vld [vmem:[#allocation2 + $0x610] sm:$0xff]  ;;  %v2273_v59 = vmax.f32 %v2255_v9, 0.0  ;;  %v2245_v9 = vsub.f32 %v2227_v51, %v11369_v60 }
 0x2bf   : > { %9360 = vmatprep.mubr.msk.f32.mxu0 %vm1663_vm5, %v5091_v25  ;;  %9756 = vmatprep.subr.msk.bf16.mxu0 %vm11335_vm9, %v11798_v15  ;;  %v5066_v25 = vsub.f32 %v5048_v5, %v11369_v60  ;;  %v5099_v43 = vmax.f32 %v5081_v37, 0.0  ;;  %v5083_v52 = vmul.f32 %v5065_v30, %v11395_v36  ;;  %v5341_v30 = vld [vmem:[#allocation2 + $0x640] sm:$0xff] }
 0x2c0   : > { %v2269_v1 = vmax.f32 %v2251_v4, 0.0  ;;  %v2225_v4 = vld [vmem:[#allocation2 + $0xf8] sm:$0xff] }
 0x2c1   : > { %9134 = vmatmul.mubr.msk.f32.gmra.mrb[16].mxu1 %vm1663_vm5, %v3004_v39  ;;  %9361 = vmatmul.mubr.msk.f32.gmra.mrb[2].mxu0 %vm1663_vm5, %v5092_v22  ;;  %v2223_v39 = vld [vmem:[#allocation2 + $0xe8] sm:$0xff]  ;;  %v5067_v22 = vsub.f32 %v5049_v11, %v11369_v60  ;;  %v5084_v42 = vmul.f32 %v5066_v25, %v11395_v36  ;;  %v5101_v24 = vmax.f32 %v5083_v52, 0.0  ;;  %v2243_v55 = vsub.f32 %v2225_v4, %v11369_v60 }
 0x2c2   : > { %9140 = vmatprep.mubr.msk.f32.mxu1 %vm1663_vm5, %v2266_v13  ;;  %9363 = vmatprep.mubr.msk.f32.mxu0 %vm1663_vm5, %v5093_v48  ;;  %v2359_v13 = vld [vmem:[%s12837_s3 + $0x1c] sm:$0x3]  ;;  %v5100_v48 = vmax.f32 %v5082_v45, 0.0  ;;  %v2241_v26 = vsub.f32 %v2223_v39, %v11369_v60  ;;  %v5358_v11 = vsub.f32 %v5340_v14, %v11369_v60  ;;  %v5342_v45 = vld [vmem:[#allocation2 + $0x648] sm:$0xff]  ;;  %v2246_v25 = vsub.f32 %v2228_v62, %v11369_v60 }
 0x2c3   : > { %v5085_v40 = vmul.f32 %v5067_v22, %v11395_v36  ;;  %v11875_v50 = vpack.c.bf16 %v2359_v13, %v2358_v33  ;;  %v5102_v61 = vmax.f32 %v5084_v42, 0.0  ;;  %v2261_v37 = vmul.f32 %v2243_v55, %v11395_v36  ;;  %v3432_v33 = vld [vmem:[#allocation2 + $0x368] sm:$0xff]  ;;  %v3433_v42 = vld [vmem:[#allocation2 + $0x370] sm:$0xff] }
 0x2c4   : > { %v2259_v31 = vmul.f32 %v2241_v26, %v11395_v36  ;;  %v5359_v39 = vsub.f32 %v5341_v30, %v11369_v60  ;;  %v5360_v52 = vsub.f32 %v5342_v45, %v11369_v60  ;;  %v5361_v26 = vsub.f32 %v5343_v18, %v11369_v60 }
 0x2c5   : > { %9141 = vmatmul.mubr.msk.f32.vlgmr.msra.gmra.mrb[0].mxu1 %vm1663_vm5, %v2267_v57  ;;  %9364 = vmatmul.mubr.msk.f32.gmra.mrb[4].mxu0 %vm1663_vm5, %v5094_v38  ;;  %v2258_v57 = vmul.f32 %v2240_v21, %v11395_v36  ;;  %v2242_v38 = vsub.f32 %v2224_v19, %v11369_v60  ;;  %v5103_v29 = vmax.f32 %v5085_v40, 0.0  ;;  %v3431_v21 = vld [vmem:[#allocation2 + $0x360] sm:$0xff]  ;;  %v2263_v19 = vmul.f32 %v2245_v9, %v11395_v36 }
 0x2c6   : > { %9143 = vmatprep.mubr.msk.f32.mxu1 %vm1663_vm5, %v2268_v46  ;;  %9366 = vmatprep.mubr.msk.f32.mxu0 %vm1663_vm5, %v5095_v27  ;;  %v5069_v46 = vsub.f32 %v5051_v35, %v11369_v60  ;;  %v2275_v27 = vmax.f32 %v2257_v17, 0.0  ;;  %v3449_v35 = vsub.f32 %v3431_v21, %v11369_v60  ;;  %v2264_v17 = vmul.f32 %v2246_v25, %v11395_v36  ;;  %v6019_v40 = vld [vmem:[%s12837_s3 + $0x82] sm:$0xff] }
 0x2c7   : > { %9711 = vmatpush3.bf16.msk.msra.mxu1 %vm11335_vm9, %v11763_v56  ;;  %v2272_v56 = vmax.f32 %v2254_v63, 0.0  ;;  %v2276_v54 = vmax.f32 %v2258_v57, 0.0  ;;  %v2260_v44 = vmul.f32 %v2242_v38, %v11395_v36  ;;  %v5104_v63 = vmax.f32 %v5086_v47, 0.0  ;;  %v5345_v57 = vld [vmem:[#allocation2 + $0x660] sm:$0xff] }
 0x2c8   : > { %9714 = vmatprep.subr.msk.bf16.mxu1 %vm11335_vm9, %v11875_v50  ;;  %v5087_v41 = vmul.f32 %v5069_v46, %v11395_v36  ;;  %v5378_v4 = vmul.f32 %v5360_v52, %v11395_v36  ;;  %v6020_v46 = vld [vmem:[%s12837_s3 + $0x8a] sm:$0x3]  ;;  %v2282_v47 = vmax.f32 %v2264_v17, 0.0  ;;  %v5379_v55 = vmul.f32 %v5361_v26, %v11395_v36  ;;  %v3438_v52 = vld [vmem:[#allocation2 + $0x398] sm:$0xff] }
 0x2c9   : > { %9144 = vmatmul.mubr.msk.f32.gmra.mrb[2].mxu1 %vm1663_vm5, %v2269_v1  ;;  %9367 = vmatmul.mubr.msk.f32.gmra.mrb[6].mxu0 %vm1663_vm5, %v5096_v32  ;;  %v5070_v1 = vsub.f32 %v5052_v8, %v11369_v60  ;;  %v2244_v32 = vsub.f32 %v2226_v20, %v11369_v60  ;;  %v2278_v5 = vmax.f32 %v2260_v44, 0.0  ;;  %v2281_v8 = vmax.f32 %v2263_v19, 0.0  ;;  %v5346_v44 = vld [vmem:[#allocation2 + $0x668] sm:$0xff] }
 0x2ca   : > { %9146 = vmatprep.mubr.msk.f32.mxu1 %vm1663_vm5, %v2270_v58  ;;  %9369 = vmatprep.mubr.msk.f32.mxu0 %vm1663_vm5, %v5097_v2  ;;  %v5357_v58 = vsub.f32 %v5339_v23, %v11369_v60  ;;  %v2277_v2 = vmax.f32 %v2259_v31, 0.0  ;;  %v5105_v0 = vmax.f32 %v5087_v41, 0.0  ;;  %v3467_v23 = vmul.f32 %v3449_v35, %v11395_v36  ;;  %v3434_v31 = vld [vmem:[#allocation2 + $0x378] sm:$0xff]  ;;  %v5347_v41 = vld [vmem:[#allocation2 + $0x670] sm:$0xff] }
 0x2cb   : > { %v5088_v3 = vmul.f32 %v5070_v1, %v11395_v36  ;;  %v3435_v1 = vld [vmem:[#allocation2 + $0x380] sm:$0xff]  ;;  %v5396_v51 = vmax.f32 %v5378_v4, 0.0  ;;  %v3452_v62 = vsub.f32 %v3434_v31, %v11369_v60  ;;  %v5397_v9 = vmax.f32 %v5379_v55, 0.0  ;;  %v5352_v31 = vld [vmem:[#allocation2 + $0x698] sm:$0xff] }
 0x2cc   : > { %v5375_v16 = vmul.f32 %v5357_v58, %v11395_v36  ;;  %v3453_v30 = vsub.f32 %v3435_v1, %v11369_v60  ;;  %v5365_v45 = vsub.f32 %v5347_v41, %v11369_v60  ;;  %v5353_v55 = vld [vmem:[#allocation2 + $0x6a0] sm:$0xff] }
 0x2cd   : > { %9147 = vmatmul.mubr.msk.f32.gmra.mrb[4].mxu1 %vm1663_vm5, %v2271_v6  ;;  %9370 = vmatmul.mubr.msk.f32.gmra.mrb[8].mxu0 %vm1663_vm5, %v5098_v7  ;;  %v2229_v6 = vld [vmem:[#allocation2 + $0x118] sm:$0xff]  ;;  %v2262_v7 = vmul.f32 %v2244_v32, %v11395_v36  ;;  %v5106_v22 = vmax.f32 %v5088_v3, 0.0  ;;  %v11934_v32 = vpack.c.bf16 %v6020_v46, %v6019_v40  ;;  %v3440_v46 = vld [vmem:[#allocation2 + $0x3a8] sm:$0xff] }
 0x2ce   : > { %9149 = vmatprep.mubr.msk.f32.mxu1 %vm1663_vm5, %v2272_v56  ;;  %9372 = vmatprep.mubr.msk.f32.mxu0 %vm1663_vm5, %v5099_v43  ;;  %v2279_v56 = vmax.f32 %v2261_v37, 0.0  ;;  %v2247_v43 = vsub.f32 %v2229_v6, %v11369_v60  ;;  %v5364_v37 = vsub.f32 %v5346_v44, %v11369_v60  ;;  %v5348_v3 = vld [vmem:[#allocation2 + $0x678] sm:$0xff] }
 0x2cf   : > { %v2280_v13 = vmax.f32 %v2262_v7, 0.0  ;;  %v5349_v7 = vld [vmem:[#allocation2 + $0x680] sm:$0xff]  ;;  %v5366_v21 = vsub.f32 %v5348_v3, %v11369_v60  ;;  %v5355_v3 = vld [vmem:[#allocation2 + $0x6b0] sm:$0xff] }
 0x2d0   : > { %v2265_v38 = vmul.f32 %v2247_v43, %v11395_v36  ;;  %v5382_v18 = vmul.f32 %v5364_v37, %v11395_v36  ;;  %v5367_v35 = vsub.f32 %v5349_v7, %v11369_v60 }
 0x2d1   : > { %9150 = vmatmul.mubr.msk.f32.gmra.mrb[6].mxu1 %vm1663_vm5, %v2273_v59  ;;  %9373 = vmatmul.mubr.msk.f32.gmra.mrb[10].mxu0 %vm1663_vm5, %v5100_v48  ;;  %v5376_v59 = vmul.f32 %v5358_v11, %v11395_v36  ;;  %v5393_v48 = vmax.f32 %v5375_v16, 0.0 }
 0x2d2   : > { %9152 = vmatprep.mubr.msk.f32.mxu1 %vm1663_vm5, %v2274_v53  ;;  %9375 = vmatprep.mubr.msk.f32.mxu0 %vm1663_vm5, %v5101_v24  ;;  %v5377_v53 = vmul.f32 %v5359_v39, %v11395_v36  ;;  %v3450_v24 = vsub.f32 %v3432_v33, %v11369_v60  ;;  %v2283_v58 = vmax.f32 %v2265_v38, 0.0  ;;  %v5350_v33 = vld [vmem:[#allocation2 + $0x688] sm:$0xff]  ;;  %v5400_v38 = vmax.f32 %v5382_v18, 0.0 }
 0x2d3   : > { %v5394_v20 = vmax.f32 %v5376_v59, 0.0  ;;  %v5383_v59 = vmul.f32 %v5365_v45, %v11395_v36  ;;  %v5368_v40 = vsub.f32 %v5350_v33, %v11369_v60 }
 0x2d4   : > { %v3468_v14 = vmul.f32 %v3450_v24, %v11395_v36 }
 0x2d5   : > { %9153 = vmatmul.mubr.msk.f32.gmra.mrb[8].mxu1 %vm1663_vm5, %v2275_v27  ;;  %9376 = vmatmul.mubr.msk.f32.gmra.mrb[12].mxu0 %vm1663_vm5, %v5102_v61  ;;  %v5362_v27 = vsub.f32 %v5344_v49, %v11369_v60  ;;  %v3451_v61 = vsub.f32 %v3433_v42, %v11369_v60  ;;  %v5384_v49 = vmul.f32 %v5366_v21, %v11395_v36  ;;  %v4001_v42 = vld [vmem:[%s12837_s3 + $0x46] sm:$0xff] }
 0x2d6   : > { %9155 = vmatprep.mubr.msk.f32.mxu1 %vm1663_vm5, %v2276_v54  ;;  %9378 = vmatprep.mubr.msk.f32.mxu0 %vm1663_vm5, %v5103_v29  ;;  %v5363_v54 = vsub.f32 %v5345_v57, %v11369_v60  ;;  %v5395_v29 = vmax.f32 %v5377_v53, 0.0  ;;  %v3486_v16 = vmax.f32 %v3468_v14, 0.0  ;;  %v3456_v53 = vsub.f32 %v3438_v52, %v11369_v60  ;;  %v4002_v57 = vld [vmem:[%s12837_s3 + $0x4e] sm:$0x3]  ;;  %v3445_v52 = vld [vmem:[#allocation2 + $0x3d0] sm:$0xff] }
 0x2d7   : > { %v3469_v11 = vmul.f32 %v3451_v61, %v11395_v36  ;;  %v11987_v61 = vpack.c.bf16 %v4002_v57, %v4001_v42  ;;  %v5402_v44 = vmax.f32 %v5384_v49, 0.0  ;;  %v3463_v42 = vsub.f32 %v3445_v52, %v11369_v60 }
 0x2d8   : > { %v5381_v6 = vmul.f32 %v5363_v54, %v11395_v36  ;;  %v3474_v1 = vmul.f32 %v3456_v53, %v11395_v36 }
 0x2d9   : > { %9156 = vmatmul.mubr.msk.f32.gmra.mrb[10].mxu1 %vm1663_vm5, %v2277_v2  ;;  %9379 = vmatmul.mubr.msk.f32.gmra.mrb[14].mxu0 %vm1663_vm5, %v5104_v63  ;;  %v3485_v2 = vmax.f32 %v3467_v23, 0.0  ;;  %v5380_v63 = vmul.f32 %v5362_v27, %v11395_v36 }
 0x2da   : > { %9158 = vmatprep.mubr.msk.f32.mxu1 %vm1663_vm5, %v2278_v5  ;;  %9381 = vmatprep.mubr.msk.f32.mxu0 %vm1663_vm5, %v5105_v0  ;;  %v3436_v5 = vld [vmem:[#allocation2 + $0x388] sm:$0xff]  ;;  %v3437_v0 = vld [vmem:[#allocation2 + $0x390] sm:$0xff]  ;;  %v5399_v19 = vmax.f32 %v5381_v6, 0.0 }
 0x2db   : > { %v3454_v25 = vsub.f32 %v3436_v5, %v11369_v60  ;;  %v5398_v39 = vmax.f32 %v5380_v63, 0.0  ;;  %v3455_v43 = vsub.f32 %v3437_v0, %v11369_v60  ;;  %v3443_v5 = vld [vmem:[#allocation2 + $0x3c0] sm:$0xff] }
 0x2dd   : > { %9159 = vmatmul.mubr.msk.f32.gmra.mrb[12].mxu1 %vm1663_vm5, %v2279_v56  ;;  %9382 = vmatmul.mubr.msk.f32.gmra.mrb[16].mxu0 %vm1663_vm5, %v5106_v22  ;;  %v3471_v56 = vmul.f32 %v3453_v30, %v11395_v36  ;;  %v3487_v22 = vmax.f32 %v3469_v11, 0.0  ;;  %v3472_v26 = vmul.f32 %v3454_v25, %v11395_v36  ;;  %v3473_v24 = vmul.f32 %v3455_v43, %v11395_v36  ;;  %v3444_v25 = vld [vmem:[#allocation2 + $0x3c8] sm:$0xff]  ;;  %v5356_v43 = vld [vmem:[#allocation2 + $0x6b8] sm:$0xff] }
 0x2de   : > { %9161 = vmatprep.mubr.msk.f32.mxu1 %vm1663_vm5, %v2280_v13  ;;  %9388 = vmatprep.mubr.msk.f32.mxu0 %vm1663_vm5, %v5393_v48  ;;  %v3439_v13 = vld [vmem:[#allocation2 + $0x3a0] sm:$0xff]  ;;  %v5351_v48 = vld [vmem:[#allocation2 + $0x690] sm:$0xff]  ;;  %v5371_v30 = vsub.f32 %v5353_v55, %v11369_v60  ;;  %v3462_v33 = vsub.f32 %v3444_v25, %v11369_v60  ;;  %v3448_v55 = vld [vmem:[#allocation2 + $0x3e8] sm:$0xff] }
 0x2df   : > { %v3489_v4 = vmax.f32 %v3471_v56, 0.0  ;;  %v3457_v23 = vsub.f32 %v3439_v13, %v11369_v60  ;;  %v5369_v27 = vsub.f32 %v5351_v48, %v11369_v60  ;;  %v3490_v54 = vmax.f32 %v3472_v26, 0.0 }
 0x2e0   : > { %v3491_v41 = vmax.f32 %v3473_v24, 0.0  ;;  %v5389_v18 = vmul.f32 %v5371_v30, %v11395_v36  ;;  %v5373_v56 = vsub.f32 %v5355_v3, %v11369_v60  ;;  %v5374_v26 = vsub.f32 %v5356_v43, %v11369_v60  ;;  %v3447_v24 = vld [vmem:[#allocation2 + $0x3e0] sm:$0xff]  ;;  %v2287_v3 = vld [vmem:[#allocation2 + $0x128] sm:$0xff] }
 0x2e1   : > { %9162 = vmatmul.mubr.msk.f32.gmra.mrb[14].mxu1 %vm1663_vm5, %v2281_v8  ;;  %9389 = vmatmul.mubr.msk.f32.vlgmr.msra.gmra.mrb[0].mxu0 %vm1663_vm5, %v5394_v20  ;;  %v5401_v8 = vmax.f32 %v5383_v59, 0.0  ;;  %v5385_v20 = vmul.f32 %v5367_v35, %v11395_v36  ;;  %v3475_v63 = vmul.f32 %v3457_v23, %v11395_v36  ;;  %v5387_v37 = vmul.f32 %v5369_v27, %v11395_v36 }
 0x2e2   : > { %9759 = vmatpush3.bf16.msk.msra.mxu0 %vm11335_vm9, %v11798_v15  ;;  %9164 = vmatprep.mubr.msk.f32.mxu1 %vm1663_vm5, %v2282_v47  ;;  %v3470_v15 = vmul.f32 %v3452_v62, %v11395_v36  ;;  %v3441_v47 = vld [vmem:[#allocation2 + $0x3b0] sm:$0xff]  ;;  %v5354_v62 = vld [vmem:[#allocation2 + $0x6a8] sm:$0xff]  ;;  %v5407_v49 = vmax.f32 %v5389_v18, 0.0  ;;  %v5391_v53 = vmul.f32 %v5373_v56, %v11395_v36  ;;  %v5392_v27 = vmul.f32 %v5374_v26, %v11395_v36  ;;  %v2290_v26 = vld [vmem:[#allocation2 + $0x140] sm:$0xff] }
 0x2e3   : > { %9391 = vmatprep.mubr.msk.f32.mxu0 %vm1663_vm5, %v5395_v29  ;;  %9762 = vmatprep.subr.msk.bf16.mxu0 %vm11335_vm9, %v11934_v32  ;;  %v3458_v29 = vsub.f32 %v3440_v46, %v11369_v60  ;;  %v3459_v14 = vsub.f32 %v3441_v47, %v11369_v60  ;;  %v5372_v45 = vsub.f32 %v5354_v62, %v11369_v60  ;;  %v3493_v21 = vmax.f32 %v3475_v63, 0.0  ;;  %v6323_v18 = vld [vmem:[%s12837_s3 + $0x8c] sm:$0xff]  ;;  %v6324_v56 = vld [vmem:[%s12837_s3 + $0x94] sm:$0x3] }
 0x2e4   : > { %v3488_v17 = vmax.f32 %v3470_v15, 0.0  ;;  %v3461_v15 = vsub.f32 %v3443_v5, %v11369_v60  ;;  %v3466_v62 = vsub.f32 %v3448_v55, %v11369_v60  ;;  %v5410_v63 = vmax.f32 %v5392_v27, 0.0  ;;  %v5652_v27 = vld [vmem:[#allocation2 + $0x708] sm:$0xff] }
 0x2e5   : > { %9165 = vmatmul.mubr.msk.f32.gmra.mrb[16].mxu1 %vm1663_vm5, %v2283_v58  ;;  %9392 = vmatmul.mubr.msk.f32.gmra.mrb[2].mxu0 %vm1663_vm5, %v5396_v51  ;;  %v5386_v58 = vmul.f32 %v5368_v40, %v11395_v36  ;;  %v5370_v51 = vsub.f32 %v5352_v31, %v11369_v60  ;;  %v3476_v11 = vmul.f32 %v3458_v29, %v11395_v36 }
 0x2e6   : > { %9171 = vmatprep.mubr.msk.f32.mxu1 %vm1663_vm5, %v3485_v2  ;;  %9394 = vmatprep.mubr.msk.f32.mxu0 %vm1663_vm5, %v5397_v9  ;;  %v5403_v2 = vmax.f32 %v5385_v20, 0.0  ;;  %v3492_v9 = vmax.f32 %v3474_v1, 0.0  ;;  %v5390_v35 = vmul.f32 %v5372_v45, %v11395_v36  ;;  %v5645_v20 = vld [vmem:[#allocation2 + $0x6d0] sm:$0xff]  ;;  %v3481_v1 = vmul.f32 %v3463_v42, %v11395_v36 }
 0x2e7   : > { %v5404_v0 = vmax.f32 %v5386_v58, 0.0  ;;  %v5388_v7 = vmul.f32 %v5370_v51, %v11395_v36  ;;  %v2286_v58 = vld [vmem:[#allocation2 + $0x120] sm:$0xff]  ;;  %v5663_v51 = vsub.f32 %v5645_v20, %v11369_v60  ;;  %v3484_v25 = vmul.f32 %v3466_v62, %v11395_v36 }
 0x2e8   : > { %v5408_v46 = vmax.f32 %v5390_v35, 0.0  ;;  %v2304_v5 = vsub.f32 %v2286_v58, %v11369_v60  ;;  %v12070_v42 = vpack.c.bf16 %v6324_v56, %v6323_v18  ;;  %v2308_v20 = vsub.f32 %v2290_v26, %v11369_v60 }
 0x2e9   : > { %9172 = vmatmul.mubr.msk.f32.vlgmr.msra.gmra.mrb[0].mxu1 %vm1663_vm5, %v3486_v16  ;;  %9395 = vmatmul.mubr.msk.f32.gmra.mrb[4].mxu0 %vm1663_vm5, %v5398_v39  ;;  %v3477_v16 = vmul.f32 %v3459_v14, %v11395_v36  ;;  %v5405_v39 = vmax.f32 %v5387_v37, 0.0  ;;  %v5406_v13 = vmax.f32 %v5388_v7, 0.0  ;;  %v5647_v14 = vld [vmem:[#allocation2 + $0x6e0] sm:$0xff]  ;;  %v5681_v7 = vmul.f32 %v5663_v51, %v11395_v36 }
 0x2ea   : > { %9174 = vmatprep.mubr.msk.f32.mxu1 %vm1663_vm5, %v3487_v22  ;;  %9397 = vmatprep.mubr.msk.f32.mxu0 %vm1663_vm5, %v5399_v19  ;;  %v5643_v22 = vld [vmem:[#allocation2 + $0x6c0] sm:$0xff]  ;;  %v3494_v19 = vmax.f32 %v3476_v11, 0.0  ;;  %v5665_v45 = vsub.f32 %v5647_v14, %v11369_v60  ;;  %v5670_v58 = vsub.f32 %v5652_v27, %v11369_v60 }
 0x2eb   : > { %9717 = vmatpush3.bf16.msk.msra.mxu1 %vm11335_vm9, %v11875_v50  ;;  %v3442_v50 = vld [vmem:[#allocation2 + $0x3b8] sm:$0xff]  ;;  %v3495_v48 = vmax.f32 %v3477_v16, 0.0  ;;  %v5661_v57 = vsub.f32 %v5643_v22, %v11369_v60  ;;  %v2288_v16 = vld [vmem:[#allocation2 + $0x130] sm:$0xff]  ;;  %v2322_v22 = vmul.f32 %v2304_v5, %v11395_v36 }
 0x2ec   : > { %9720 = vmatprep.subr.msk.bf16.mxu1 %vm11335_vm9, %v11987_v61  ;;  %v3460_v6 = vsub.f32 %v3442_v50, %v11369_v60 }
 0x2ed   : > { %9175 = vmatmul.mubr.msk.f32.gmra.mrb[2].mxu1 %vm1663_vm5, %v3488_v17  ;;  %9398 = vmatmul.mubr.msk.f32.gmra.mrb[6].mxu0 %vm1663_vm5, %v5400_v38  ;;  %v3479_v17 = vmul.f32 %v3461_v15, %v11395_v36  ;;  %v3446_v38 = vld [vmem:[#allocation2 + $0x3d8] sm:$0xff]  ;;  %v5679_v29 = vmul.f32 %v5661_v57, %v11395_v36  ;;  %v5649_v15 = vld [vmem:[#allocation2 + $0x6f0] sm:$0xff]  ;;  %v3502_v57 = vmax.f32 %v3484_v25, 0.0 }
 0x2ee   : > { %9177 = vmatprep.mubr.msk.f32.mxu1 %vm1663_vm5, %v3489_v4  ;;  %9400 = vmatprep.mubr.msk.f32.mxu0 %vm1663_vm5, %v5401_v8  ;;  %v3478_v59 = vmul.f32 %v3460_v6, %v11395_v36  ;;  %v5644_v4 = vld [vmem:[#allocation2 + $0x6c8] sm:$0xff]  ;;  %v3480_v8 = vmul.f32 %v3462_v33, %v11395_v36  ;;  %v3464_v31 = vsub.f32 %v3446_v38, %v11369_v60 }
 0x2ef   : > { %v3497_v23 = vmax.f32 %v3479_v17, 0.0  ;;  %v5662_v47 = vsub.f32 %v5644_v4, %v11369_v60  ;;  %v5697_v11 = vmax.f32 %v5679_v29, 0.0  ;;  %v5683_v33 = vmul.f32 %v5665_v45, %v11395_v36  ;;  %v5650_v17 = vld [vmem:[#allocation2 + $0x6f8] sm:$0xff] }
 0x2f0   : > { %v3496_v40 = vmax.f32 %v3478_v59, 0.0  ;;  %v3498_v50 = vmax.f32 %v3480_v8, 0.0  ;;  %v3482_v37 = vmul.f32 %v3464_v31, %v11395_v36  ;;  %v2289_v59 = vld [vmem:[#allocation2 + $0x138] sm:$0xff]  ;;  %v5668_v8 = vsub.f32 %v5650_v17, %v11369_v60 }
 0x2f1   : > { %9178 = vmatmul.mubr.msk.f32.gmra.mrb[4].mxu1 %vm1663_vm5, %v3490_v54  ;;  %9401 = vmatmul.mubr.msk.f32.gmra.mrb[8].mxu0 %vm1663_vm5, %v5402_v44  ;;  %v5646_v54 = vld [vmem:[#allocation2 + $0x6d8] sm:$0xff]  ;;  %v5409_v44 = vmax.f32 %v5391_v53, 0.0  ;;  %v5680_v30 = vmul.f32 %v5662_v47, %v11395_v36  ;;  %v5651_v53 = vld [vmem:[#allocation2 + $0x700] sm:$0xff]  ;;  %v5701_v31 = vmax.f32 %v5683_v33, 0.0 }
 0x2f2   : > { %9180 = vmatprep.mubr.msk.f32.mxu1 %vm1663_vm5, %v3491_v41  ;;  %9403 = vmatprep.mubr.msk.f32.mxu0 %vm1663_vm5, %v5403_v2  ;;  %v3465_v41 = vsub.f32 %v3447_v24, %v11369_v60  ;;  %v5664_v2 = vsub.f32 %v5646_v54, %v11369_v60  ;;  %v3500_v43 = vmax.f32 %v3482_v37, 0.0  ;;  %v2307_v24 = vsub.f32 %v2289_v59, %v11369_v60  ;;  %v5657_v59 = vld [vmem:[#allocation2 + $0x730] sm:$0xff] }
 0x2f3   : > { %v5698_v52 = vmax.f32 %v5680_v30, 0.0  ;;  %v5669_v54 = vsub.f32 %v5651_v53, %v11369_v60  ;;  %v5686_v14 = vmul.f32 %v5668_v8, %v11395_v36  ;;  %v2297_v53 = vld [vmem:[#allocation2 + $0x178] sm:$0xff]  ;;  %v5659_v8 = vld [vmem:[#allocation2 + $0x740] sm:$0xff] }
 0x2f4   : > { %v3483_v6 = vmul.f32 %v3465_v41, %v11395_v36  ;;  %v2315_v27 = vsub.f32 %v2297_v53, %v11369_v60 }
 0x2f5   : > { %9181 = vmatmul.mubr.msk.f32.gmra.mrb[6].mxu1 %vm1663_vm5, %v3492_v9  ;;  %9404 = vmatmul.mubr.msk.f32.gmra.mrb[10].mxu0 %vm1663_vm5, %v5404_v0  ;;  %v3499_v9 = vmax.f32 %v3481_v1, 0.0  ;;  %v5648_v0 = vld [vmem:[#allocation2 + $0x6e8] sm:$0xff]  ;;  %v5653_v1 = vld [vmem:[#allocation2 + $0x710] sm:$0xff]  ;;  %v5687_v30 = vmul.f32 %v5669_v54, %v11395_v36 }
 0x2f6   : > { %9183 = vmatprep.mubr.msk.f32.mxu1 %vm1663_vm5, %v3493_v21  ;;  %9406 = vmatprep.mubr.msk.f32.mxu0 %vm1663_vm5, %v5405_v39  ;;  %v5682_v21 = vmul.f32 %v5664_v2, %v11395_v36  ;;  %v2305_v39 = vsub.f32 %v2287_v3, %v11369_v60  ;;  %v3501_v35 = vmax.f32 %v3483_v6, 0.0  ;;  %v2293_v2 = vld [vmem:[#allocation2 + $0x158] sm:$0xff]  ;;  %v5671_v5 = vsub.f32 %v5653_v1, %v11369_v60  ;;  %v2299_v1 = vld [vmem:[#allocation2 + $0x188] sm:$0xff] }
 0x2f7   : > { %v5654_v3 = vld [vmem:[#allocation2 + $0x718] sm:$0xff]  ;;  %v5705_v18 = vmax.f32 %v5687_v30, 0.0 }
 0x2f8   : > { %v5700_v38 = vmax.f32 %v5682_v21, 0.0  ;;  %v2323_v4 = vmul.f32 %v2305_v39, %v11395_v36  ;;  %v5672_v21 = vsub.f32 %v5654_v3, %v11369_v60  ;;  %v2295_v39 = vld [vmem:[#allocation2 + $0x168] sm:$0xff]  ;;  %v5689_v56 = vmul.f32 %v5671_v5, %v11395_v36 }
 0x2f9   : > { %9184 = vmatmul.mubr.msk.f32.gmra.mrb[8].mxu1 %vm1663_vm5, %v3494_v19  ;;  %9407 = vmatmul.mubr.msk.f32.gmra.mrb[12].mxu0 %vm1663_vm5, %v5406_v13  ;;  %v5666_v19 = vsub.f32 %v5648_v0, %v11369_v60  ;;  %v2306_v13 = vsub.f32 %v2288_v16, %v11369_v60  ;;  %v5688_v0 = vmul.f32 %v5670_v58, %v11395_v36  ;;  %v5704_v16 = vmax.f32 %v5686_v14, 0.0  ;;  %v2300_v14 = vld [vmem:[#allocation2 + $0x190] sm:$0xff] }
 0x2fa   : > { %9186 = vmatprep.mubr.msk.f32.mxu1 %vm1663_vm5, %v3495_v48  ;;  %9409 = vmatprep.mubr.msk.f32.mxu0 %vm1663_vm5, %v5407_v49  ;;  %v5667_v48 = vsub.f32 %v5649_v15, %v11369_v60  ;;  %v5699_v49 = vmax.f32 %v5681_v7, 0.0  ;;  %v2341_v29 = vmax.f32 %v2323_v4, 0.0  ;;  %v2311_v7 = vsub.f32 %v2293_v2, %v11369_v60 }
 0x2fb   : > { %v2324_v47 = vmul.f32 %v2306_v13, %v11395_v36  ;;  %v5706_v33 = vmax.f32 %v5688_v0, 0.0  ;;  %v5690_v26 = vmul.f32 %v5672_v21, %v11395_v36  ;;  %v5677_v58 = vsub.f32 %v5659_v8, %v11369_v60 }
 0x2fc   : > { %v5685_v55 = vmul.f32 %v5667_v48, %v11395_v36  ;;  %v2329_v13 = vmul.f32 %v2311_v7, %v11395_v36  ;;  %v2313_v48 = vsub.f32 %v2295_v39, %v11369_v60  ;;  %v2333_v2 = vmul.f32 %v2315_v27, %v11395_v36  ;;  %v2301_v7 = vld [vmem:[#allocation2 + $0x198] sm:$0xff] }
 0x2fd   : > { %9187 = vmatmul.mubr.msk.f32.gmra.mrb[10].mxu1 %vm1663_vm5, %v3496_v40  ;;  %9410 = vmatmul.mubr.msk.f32.gmra.mrb[14].mxu0 %vm1663_vm5, %v5408_v46  ;;  %v2340_v40 = vmax.f32 %v2322_v22, 0.0  ;;  %v5684_v46 = vmul.f32 %v5666_v19, %v11395_v36  ;;  %v5656_v22 = vld [vmem:[#allocation2 + $0x728] sm:$0xff]  ;;  %v2296_v19 = vld [vmem:[#allocation2 + $0x170] sm:$0xff] }
 0x2fe   : > { %9189 = vmatprep.mubr.msk.f32.mxu1 %vm1663_vm5, %v3497_v23  ;;  %9412 = vmatprep.mubr.msk.f32.mxu0 %vm1663_vm5, %v5409_v44  ;;  %v2291_v23 = vld [vmem:[#allocation2 + $0x148] sm:$0xff]  ;;  %v2292_v44 = vld [vmem:[#allocation2 + $0x150] sm:$0xff]  ;;  %v5703_v37 = vmax.f32 %v5685_v55, 0.0 }
 0x2ff   : > { %v2309_v41 = vsub.f32 %v2291_v23, %v11369_v60  ;;  %v5702_v51 = vmax.f32 %v5684_v46, 0.0  ;;  %v2310_v62 = vsub.f32 %v2292_v44, %v11369_v60  ;;  %v2298_v46 = vld [vmem:[#allocation2 + $0x180] sm:$0xff]  ;;  %v2331_v23 = vmul.f32 %v2313_v48, %v11395_v36 }
 0x300   : > { %v2316_v44 = vsub.f32 %v2298_v46, %v11369_v60  ;;  %v3930_v46 = vld [vmem:[#allocation2 + $0x3f8] sm:$0xff] }
 0x301   : > { %9190 = vmatmul.mubr.msk.f32.gmra.mrb[12].mxu1 %vm1663_vm5, %v3498_v50  ;;  %9413 = vmatmul.mubr.msk.f32.gmra.mrb[16].mxu0 %vm1663_vm5, %v5410_v63  ;;  %v2326_v50 = vmul.f32 %v2308_v20, %v11395_v36  ;;  %v2342_v63 = vmax.f32 %v2324_v47, 0.0  ;;  %v2327_v45 = vmul.f32 %v2309_v41, %v11395_v36  ;;  %v2328_v25 = vmul.f32 %v2310_v62, %v11395_v36 }
 0x302   : > { %9192 = vmatprep.mubr.msk.f32.mxu1 %vm1663_vm5, %v3499_v9  ;;  %9419 = vmatprep.mubr.msk.f32.mxu0 %vm1663_vm5, %v5697_v11  ;;  %v2294_v9 = vld [vmem:[#allocation2 + $0x160] sm:$0xff]  ;;  %v2347_v20 = vmax.f32 %v2329_v13, 0.0  ;;  %v5708_v47 = vmax.f32 %v5690_v26, 0.0  ;;  %v2349_v62 = vmax.f32 %v2331_v23, 0.0  ;;  %v2334_v3 = vmul.f32 %v2316_v44, %v11395_v36 }
 0x303   : > { %v5655_v11 = vld [vmem:[#allocation2 + $0x720] sm:$0xff]  ;;  %v2344_v15 = vmax.f32 %v2326_v50, 0.0  ;;  %v2346_v17 = vmax.f32 %v2328_v25, 0.0  ;;  %v5947_v50 = vld [vmem:[#allocation2 + $0x750] sm:$0xff]  ;;  %v2351_v25 = vmax.f32 %v2333_v2, 0.0 }
 0x304   : > { %v5965_v0 = vsub.f32 %v5947_v50, %v11369_v60 }
 0x305   : > { %9193 = vmatmul.mubr.msk.f32.gmra.mrb[14].mxu1 %vm1663_vm5, %v3500_v43  ;;  %9420 = vmatmul.mubr.msk.f32.vlgmr.msra.gmra.mrb[0].mxu0 %vm1663_vm5, %v5698_v52  ;;  %v2312_v43 = vsub.f32 %v2294_v9, %v11369_v60  ;;  %v5673_v52 = vsub.f32 %v5655_v11, %v11369_v60 }
 0x306   : > { %9765 = vmatpush3.bf16.msk.msra.mxu0 %vm11335_vm9, %v11934_v32  ;;  %9195 = vmatprep.mubr.msk.f32.mxu1 %vm1663_vm5, %v3501_v35  ;;  %v2325_v32 = vmul.f32 %v2307_v24, %v11395_v36  ;;  %v2345_v35 = vmax.f32 %v2327_v45, 0.0  ;;  %v2318_v45 = vsub.f32 %v2300_v14, %v11369_v60  ;;  %v5983_v13 = vmul.f32 %v5965_v0, %v11395_v36 }
 0x307   : > { %9422 = vmatprep.mubr.msk.f32.mxu0 %vm1663_vm5, %v5699_v49  ;;  %9768 = vmatprep.subr.msk.bf16.mxu0 %vm11335_vm9, %v12070_v42  ;;  %v5674_v49 = vsub.f32 %v5656_v22, %v11369_v60  ;;  %v2330_v4 = vmul.f32 %v2312_v43, %v11395_v36  ;;  %v5691_v24 = vmul.f32 %v5673_v52, %v11395_v36 }
 0x308   : > { %v2343_v6 = vmax.f32 %v2325_v32, 0.0  ;;  %v2319_v52 = vsub.f32 %v2301_v7, %v11369_v60 }
 0x309   : > { %9196 = vmatmul.mubr.msk.f32.gmra.mrb[16].mxu1 %vm1663_vm5, %v3502_v57  ;;  %9423 = vmatmul.mubr.msk.f32.gmra.mrb[2].mxu0 %vm1663_vm5, %v5700_v38  ;;  %v5658_v57 = vld [vmem:[#allocation2 + $0x738] sm:$0xff]  ;;  %v5707_v38 = vmax.f32 %v5689_v56, 0.0  ;;  %v5692_v55 = vmul.f32 %v5674_v49, %v11395_v36  ;;  %v5709_v32 = vmax.f32 %v5691_v24, 0.0  ;;  %v2352_v56 = vmax.f32 %v2334_v3, 0.0  ;;  %v5951_v49 = vld [vmem:[#allocation2 + $0x770] sm:$0xff] }
 0x30a   : > { %9202 = vmatprep.mubr.msk.f32.mxu1 %vm1663_vm5, %v2340_v40  ;;  %9425 = vmatprep.mubr.msk.f32.mxu0 %vm1663_vm5, %v5701_v31  ;;  %v5675_v40 = vsub.f32 %v5657_v59, %v11369_v60  ;;  %v5676_v31 = vsub.f32 %v5658_v57, %v11369_v60  ;;  %v5950_v59 = vld [vmem:[#allocation2 + $0x768] sm:$0xff]  ;;  %v5969_v27 = vsub.f32 %v5951_v49, %v11369_v60  ;;  %v3933_v3 = vld [vmem:[#allocation2 + $0x410] sm:$0xff] }
 0x30b   : > { %v5710_v30 = vmax.f32 %v5692_v55, 0.0  ;;  %v5968_v57 = vsub.f32 %v5950_v59, %v11369_v60  ;;  %v3931_v55 = vld [vmem:[#allocation2 + $0x400] sm:$0xff] }
 0x30c   : > { %v5693_v41 = vmul.f32 %v5675_v40, %v11395_v36  ;;  %v3935_v59 = vld [vmem:[#allocation2 + $0x420] sm:$0xff] }
 0x30d   : > { %9203 = vmatmul.mubr.msk.f32.vlgmr.msra.gmra.mrb[0].mxu1 %vm1663_vm5, %v2341_v29  ;;  %9426 = vmatmul.mubr.msk.f32.gmra.mrb[4].mxu0 %vm1663_vm5, %v5702_v51  ;;  %v2348_v29 = vmax.f32 %v2330_v4, 0.0  ;;  %v5660_v51 = vld [vmem:[#allocation2 + $0x748] sm:$0xff]  ;;  %v2337_v4 = vmul.f32 %v2319_v52, %v11395_v36 }
 0x30e   : > { %9205 = vmatprep.mubr.msk.f32.mxu1 %vm1663_vm5, %v2342_v63  ;;  %9428 = vmatprep.mubr.msk.f32.mxu0 %vm1663_vm5, %v5703_v37  ;;  %v5694_v63 = vmul.f32 %v5676_v31, %v11395_v36  ;;  %v2317_v37 = vsub.f32 %v2299_v1, %v11369_v60  ;;  %v5678_v9 = vsub.f32 %v5660_v51, %v11369_v60  ;;  %v5711_v11 = vmax.f32 %v5693_v41, 0.0  ;;  %v5952_v31 = vld [vmem:[#allocation2 + $0x778] sm:$0xff] }
 0x30f   : > { %9723 = vmatpush3.bf16.msk.msra.mxu1 %vm11335_vm9, %v11987_v61  ;;  %v2314_v61 = vsub.f32 %v2296_v19, %v11369_v60  ;;  %v2303_v19 = vld [vmem:[#allocation2 + $0x1a8] sm:$0xff]  ;;  %v5986_v1 = vmul.f32 %v5968_v57, %v11395_v36  ;;  %v6628_v41 = vld [vmem:[%s12837_s3 + $0x9e] sm:$0x3]  ;;  %v5970_v50 = vsub.f32 %v5952_v31, %v11369_v60 }
 0x310   : > { %9846 = vmatprep.subr.msk.bf16.mxu1 %vm11335_vm9, %v11339_v10  ;;  %v5712_v21 = vmax.f32 %v5694_v63, 0.0  ;;  %v2335_v39 = vmul.f32 %v2317_v37, %v11395_v36  ;;  %v5696_v43 = vmul.f32 %v5678_v9, %v11395_v36  ;;  %v2321_v53 = vsub.f32 %v2303_v19, %v11369_v60 }
 0x311   : > { %9206 = vmatmul.mubr.msk.f32.gmra.mrb[2].mxu1 %vm1663_vm5, %v2343_v6  ;;  %9429 = vmatmul.mubr.msk.f32.gmra.mrb[6].mxu0 %vm1663_vm5, %v5704_v16  ;;  %v2332_v54 = vmul.f32 %v2314_v61, %v11395_v36  ;;  %v5695_v6 = vmul.f32 %v5677_v58, %v11395_v36  ;;  %v5948_v16 = vld [vmem:[#allocation2 + $0x758] sm:$0xff]  ;;  %v2355_v58 = vmax.f32 %v2337_v4, 0.0  ;;  %v5987_v63 = vmul.f32 %v5969_v27, %v11395_v36 }
 0x312   : > { %9208 = vmatprep.mubr.msk.f32.mxu1 %vm1663_vm5, %v2344_v15  ;;  %9431 = vmatprep.mubr.msk.f32.mxu0 %vm1663_vm5, %v5705_v18  ;;  %v2302_v15 = vld [vmem:[#allocation2 + $0x1a0] sm:$0xff]  ;;  %v5966_v22 = vsub.f32 %v5948_v16, %v11369_v60  ;;  %v2353_v61 = vmax.f32 %v2335_v39, 0.0  ;;  %v2339_v44 = vmul.f32 %v2321_v53, %v11395_v36  ;;  %v3949_v37 = vsub.f32 %v3931_v55, %v11369_v60  ;;  %v3936_v53 = vld [vmem:[#allocation2 + $0x428] sm:$0xff] }
 0x313   : > { %v2350_v5 = vmax.f32 %v2332_v54, 0.0  ;;  %v5949_v18 = vld [vmem:[#allocation2 + $0x760] sm:$0xff]  ;;  %v2320_v48 = vsub.f32 %v2302_v15, %v11369_v60  ;;  %v6004_v0 = vmax.f32 %v5986_v1, 0.0  ;;  %v3951_v39 = vsub.f32 %v3933_v3, %v11369_v60  ;;  %v3938_v1 = vld [vmem:[#allocation2 + $0x438] sm:$0xff] }
 0x314   : > { %v5967_v26 = vsub.f32 %v5949_v18, %v11369_v60  ;;  %v5984_v24 = vmul.f32 %v5966_v22, %v11395_v36  ;;  %v5953_v54 = vld [vmem:[#allocation2 + $0x780] sm:$0xff]  ;;  %v3934_v18 = vld [vmem:[#allocation2 + $0x418] sm:$0xff]  ;;  %v3967_v52 = vmul.f32 %v3949_v37, %v11395_v36  ;;  %v3954_v31 = vsub.f32 %v3936_v53, %v11369_v60 }
 0x315   : > { %9209 = vmatmul.mubr.msk.f32.gmra.mrb[4].mxu1 %vm1663_vm5, %v2345_v35  ;;  %9432 = vmatmul.mubr.msk.f32.gmra.mrb[8].mxu0 %vm1663_vm5, %v5706_v33  ;;  %v5713_v35 = vmax.f32 %v5695_v6, 0.0  ;;  %v2336_v33 = vmul.f32 %v2318_v45, %v11395_v36  ;;  %v2338_v23 = vmul.f32 %v2320_v48, %v11395_v36  ;;  %v2357_v45 = vmax.f32 %v2339_v44, 0.0 }
 0x316   : > { %9211 = vmatprep.mubr.msk.f32.mxu1 %vm1663_vm5, %v2346_v17  ;;  %9434 = vmatprep.mubr.msk.f32.mxu0 %vm1663_vm5, %v5707_v38  ;;  %v3929_v17 = vld [vmem:[#allocation2 + $0x3f0] sm:$0xff]  ;;  %v5714_v38 = vmax.f32 %v5696_v43, 0.0  ;;  %v6002_v51 = vmax.f32 %v5984_v24, 0.0  ;;  %v6005_v43 = vmax.f32 %v5987_v63, 0.0  ;;  %v3969_v49 = vmul.f32 %v3951_v39, %v11395_v36 }
 0x317   : > { %v3947_v40 = vsub.f32 %v3929_v17, %v11369_v60  ;;  %v2354_v8 = vmax.f32 %v2336_v33, 0.0  ;;  %v2356_v2 = vmax.f32 %v2338_v23, 0.0  ;;  %v3985_v57 = vmax.f32 %v3967_v52, 0.0 }
 0x318   : > { %v3987_v55 = vmax.f32 %v3969_v49, 0.0  ;;  %v3972_v63 = vmul.f32 %v3954_v31, %v11395_v36  ;;  %v3956_v37 = vsub.f32 %v3938_v1, %v11369_v60  ;;  %v6252_v31 = vld [vmem:[#allocation2 + $0x7e8] sm:$0xff]  ;;  %v6253_v1 = vld [vmem:[#allocation2 + $0x7f0] sm:$0xff] }
 0x319   : > { %9212 = vmatmul.mubr.msk.f32.gmra.mrb[6].mxu1 %vm1663_vm5, %v2347_v20  ;;  %9435 = vmatmul.mubr.msk.f32.gmra.mrb[10].mxu0 %vm1663_vm5, %v5708_v47  ;;  %v6001_v20 = vmax.f32 %v5983_v13, 0.0  ;;  %v5985_v47 = vmul.f32 %v5967_v26, %v11395_v36  ;;  %v3965_v14 = vmul.f32 %v3947_v40, %v11395_v36  ;;  %v3952_v13 = vsub.f32 %v3934_v18, %v11369_v60  ;;  %v5958_v40 = vld [vmem:[#allocation2 + $0x7a8] sm:$0xff] }
 0x31a   : > { %9214 = vmatprep.mubr.msk.f32.mxu1 %vm1663_vm5, %v2348_v29  ;;  %9437 = vmatprep.mubr.msk.f32.mxu0 %vm1663_vm5, %v5709_v32  ;;  %v3948_v29 = vsub.f32 %v3930_v46, %v11369_v60  ;;  %v6627_v32 = vld [vmem:[%s12837_s3 + $0x96] sm:$0xff]  ;;  %v5976_v44 = vsub.f32 %v5958_v40, %v11369_v60  ;;  %v3974_v39 = vmul.f32 %v3956_v37, %v11395_v36  ;;  %v2374_v37 = vld [vmem:[#allocation2 + $0x220] sm:$0xff] }
 0x31b   : > { %v6003_v9 = vmax.f32 %v5985_v47, 0.0  ;;  %v12198_v6 = vpack.c.bf16 %v6628_v41, %v6627_v32  ;;  %v3983_v15 = vmax.f32 %v3965_v14, 0.0  ;;  %v3937_v46 = vld [vmem:[#allocation2 + $0x430] sm:$0xff]  ;;  %v3970_v23 = vmul.f32 %v3952_v13, %v11395_v36  ;;  %v3939_v14 = vld [vmem:[#allocation2 + $0x440] sm:$0xff] }
 0x31c   : > { %v3966_v7 = vmul.f32 %v3948_v29, %v11395_v36  ;;  %v3955_v41 = vsub.f32 %v3937_v46, %v11369_v60  ;;  %v3992_v49 = vmax.f32 %v3974_v39, 0.0 }
 0x31d   : > { %9215 = vmatmul.mubr.msk.f32.gmra.mrb[8].mxu1 %vm1663_vm5, %v2349_v62  ;;  %9438 = vmatmul.mubr.msk.f32.gmra.mrb[12].mxu0 %vm1663_vm5, %v5710_v30  ;;  %v3932_v62 = vld [vmem:[#allocation2 + $0x408] sm:$0xff]  ;;  %v5971_v30 = vsub.f32 %v5953_v54, %v11369_v60 }
 0x31e   : > { %9217 = vmatprep.mubr.msk.f32.mxu1 %vm1663_vm5, %v2350_v5  ;;  %9440 = vmatprep.mubr.msk.f32.mxu0 %vm1663_vm5, %v5711_v11  ;;  %v5954_v5 = vld [vmem:[#allocation2 + $0x788] sm:$0xff]  ;;  %v5955_v11 = vld [vmem:[#allocation2 + $0x790] sm:$0xff]  ;;  %v3950_v16 = vsub.f32 %v3932_v62, %v11369_v60  ;;  %v3984_v33 = vmax.f32 %v3966_v7, 0.0  ;;  %v3988_v62 = vmax.f32 %v3970_v23, 0.0 }
 0x31f   : > { %v5989_v22 = vmul.f32 %v5971_v30, %v11395_v36  ;;  %v5973_v19 = vsub.f32 %v5955_v11, %v11369_v60  ;;  %v3940_v11 = vld [vmem:[#allocation2 + $0x448] sm:$0xff] }
 0x320   : > { %v3958_v18 = vsub.f32 %v3940_v11, %v11369_v60 }
 0x321   : > { %9218 = vmatmul.mubr.msk.f32.gmra.mrb[10].mxu1 %vm1663_vm5, %v2351_v25  ;;  %9441 = vmatmul.mubr.msk.f32.gmra.mrb[14].mxu0 %vm1663_vm5, %v5712_v21  ;;  %v5988_v25 = vmul.f32 %v5970_v50, %v11395_v36  ;;  %v5972_v21 = vsub.f32 %v5954_v5, %v11369_v60  ;;  %v5991_v4 = vmul.f32 %v5973_v19, %v11395_v36  ;;  %v5961_v50 = vld [vmem:[#allocation2 + $0x7c0] sm:$0xff] }
 0x322   : > { %9220 = vmatprep.mubr.msk.f32.mxu1 %vm1663_vm5, %v2352_v56  ;;  %9443 = vmatprep.mubr.msk.f32.mxu0 %vm1663_vm5, %v5713_v35  ;;  %v5956_v56 = vld [vmem:[#allocation2 + $0x798] sm:$0xff]  ;;  %v5957_v35 = vld [vmem:[#allocation2 + $0x7a0] sm:$0xff]  ;;  %v5994_v5 = vmul.f32 %v5976_v44, %v11395_v36 }
 0x323   : > { %v5974_v48 = vsub.f32 %v5956_v56, %v11369_v60  ;;  %v6006_v17 = vmax.f32 %v5988_v25, 0.0  ;;  %v5990_v26 = vmul.f32 %v5972_v21, %v11395_v36  ;;  %v5975_v24 = vsub.f32 %v5957_v35, %v11369_v60  ;;  %v5963_v25 = vld [vmem:[#allocation2 + $0x7d0] sm:$0xff] }
 0x324   : > { %v6009_v29 = vmax.f32 %v5991_v4, 0.0  ;;  %v3990_v21 = vmax.f32 %v3972_v63, 0.0  ;;  %v5981_v13 = vsub.f32 %v5963_v25, %v11369_v60 }
 0x325   : > { %9221 = vmatmul.mubr.msk.f32.gmra.mrb[12].mxu1 %vm1663_vm5, %v2353_v61  ;;  %9444 = vmatmul.mubr.msk.f32.gmra.mrb[16].mxu0 %vm1663_vm5, %v5714_v38  ;;  %v3953_v61 = vsub.f32 %v3935_v59, %v11369_v60  ;;  %v6007_v38 = vmax.f32 %v5989_v22, 0.0  ;;  %v5992_v27 = vmul.f32 %v5974_v48, %v11395_v36  ;;  %v6008_v47 = vmax.f32 %v5990_v26, 0.0  ;;  %v3942_v59 = vld [vmem:[#allocation2 + $0x458] sm:$0xff]  ;;  %v6251_v26 = vld [vmem:[#allocation2 + $0x7e0] sm:$0xff] }
 0x326   : > { %9223 = vmatprep.mubr.msk.f32.mxu1 %vm1663_vm5, %v2354_v8  ;;  %9450 = vmatprep.mubr.msk.f32.mxu0 %vm1663_vm5, %v6001_v20  ;;  %v5959_v8 = vld [vmem:[#allocation2 + $0x7b0] sm:$0xff]  ;;  %v5993_v32 = vmul.f32 %v5975_v24, %v11395_v36  ;;  %v5964_v48 = vld [vmem:[#allocation2 + $0x7d8] sm:$0xff]  ;;  %v6269_v23 = vsub.f32 %v6251_v26, %v11369_v60 }
 0x327   : > { %v3971_v54 = vmul.f32 %v3953_v61, %v11395_v36  ;;  %v3976_v61 = vmul.f32 %v3958_v18, %v11395_v36  ;;  %v5982_v40 = vsub.f32 %v5964_v48, %v11369_v60  ;;  %v6256_v18 = vld [vmem:[#allocation2 + $0x808] sm:$0xff] }
 0x329   : > { %9224 = vmatmul.mubr.msk.f32.gmra.mrb[14].mxu1 %vm1663_vm5, %v2355_v58  ;;  %9451 = vmatmul.mubr.msk.f32.vlgmr.msra.gmra.mrb[0].mxu0 %vm1663_vm5, %v6002_v51  ;;  %v5977_v58 = vsub.f32 %v5959_v8, %v11369_v60  ;;  %v5960_v51 = vld [vmem:[#allocation2 + $0x7b8] sm:$0xff]  ;;  %v3989_v30 = vmax.f32 %v3971_v54, 0.0  ;;  %v5999_v8 = vmul.f32 %v5981_v13, %v11395_v36  ;;  %v6274_v13 = vsub.f32 %v6256_v18, %v11369_v60 }
 0x32a   : > { %9771 = vmatpush3.bf16.msk.msra.mxu0 %vm11335_vm9, %v12070_v42  ;;  %9226 = vmatprep.mubr.msk.f32.mxu1 %vm1663_vm5, %v2356_v2  ;;  %v3968_v42 = vmul.f32 %v3950_v16, %v11395_v36  ;;  %v6010_v2 = vmax.f32 %v5992_v27, 0.0  ;;  %v5978_v3 = vsub.f32 %v5960_v51, %v11369_v60  ;;  %v5979_v16 = vsub.f32 %v5961_v50, %v11369_v60  ;;  %v3944_v27 = vld [vmem:[#allocation2 + $0x468] sm:$0xff]  ;;  %v3946_v51 = vld [vmem:[#allocation2 + $0x478] sm:$0xff] }
 0x32b   : > { %9453 = vmatprep.mubr.msk.f32.mxu0 %vm1663_vm5, %v6003_v9  ;;  %9774 = vmatprep.subr.msk.bf16.mxu0 %vm11335_vm9, %v12198_v6  ;;  %v3957_v9 = vsub.f32 %v3939_v14, %v11369_v60  ;;  %v5995_v7 = vmul.f32 %v5977_v58, %v11395_v36  ;;  %v6270_v58 = vsub.f32 %v6252_v31, %v11369_v60  ;;  %v6254_v14 = vld [vmem:[#allocation2 + $0x7f8] sm:$0xff]  ;;  %v6017_v50 = vmax.f32 %v5999_v8, 0.0 }
 0x32c   : > { %v3986_v20 = vmax.f32 %v3968_v42, 0.0  ;;  %v5996_v52 = vmul.f32 %v5978_v3, %v11395_v36  ;;  %v5997_v42 = vmul.f32 %v5979_v16, %v11395_v36  ;;  %v6272_v11 = vsub.f32 %v6254_v14, %v11369_v60  ;;  %v2375_v16 = vld [vmem:[#allocation2 + $0x228] sm:$0xff] }
 0x32d   : > { %9227 = vmatmul.mubr.msk.f32.gmra.mrb[16].mxu1 %vm1663_vm5, %v2357_v45  ;;  %9454 = vmatmul.mubr.msk.f32.gmra.mrb[2].mxu0 %vm1663_vm5, %v6004_v0  ;;  %v5962_v45 = vld [vmem:[#allocation2 + $0x7c8] sm:$0xff]  ;;  %v3973_v0 = vmul.f32 %v3955_v41, %v11395_v36  ;;  %v3975_v22 = vmul.f32 %v3957_v9, %v11395_v36  ;;  %v3962_v41 = vsub.f32 %v3944_v27, %v11369_v60 }
 0x32e   : > { %9233 = vmatprep.mubr.msk.f32.mxu1 %vm1663_vm5, %v3983_v15  ;;  %9456 = vmatprep.mubr.msk.f32.mxu0 %vm1663_vm5, %v6005_v43  ;;  %v3941_v15 = vld [vmem:[#allocation2 + $0x450] sm:$0xff]  ;;  %v5980_v56 = vsub.f32 %v5962_v45, %v11369_v60  ;;  %v6012_v43 = vmax.f32 %v5994_v5, 0.0  ;;  %v6015_v46 = vmax.f32 %v5997_v42, 0.0  ;;  %v6255_v5 = vld [vmem:[#allocation2 + $0x800] sm:$0xff]  ;;  %v3964_v9 = vsub.f32 %v3946_v51, %v11369_v60 }
 0x32f   : > { %v3959_v19 = vsub.f32 %v3941_v15, %v11369_v60  ;;  %v3991_v35 = vmax.f32 %v3973_v0, 0.0  ;;  %v3993_v4 = vmax.f32 %v3975_v22, 0.0  ;;  %v6288_v0 = vmul.f32 %v6270_v58, %v11395_v36 }
 0x330   : > { %v5998_v53 = vmul.f32 %v5980_v56, %v11395_v36  ;;  %v6273_v39 = vsub.f32 %v6255_v5, %v11369_v60  ;;  %v3982_v22 = vmul.f32 %v3964_v9, %v11395_v36  ;;  %v6292_v8 = vmul.f32 %v6274_v13, %v11395_v36 }
 0x331   : > { %9234 = vmatmul.mubr.msk.f32.vlgmr.msra.gmra.mrb[0].mxu1 %vm1663_vm5, %v3984_v33  ;;  %9457 = vmatmul.mubr.msk.f32.gmra.mrb[4].mxu0 %vm1663_vm5, %v6006_v17  ;;  %v6013_v33 = vmax.f32 %v5995_v7, 0.0  ;;  %v3943_v17 = vld [vmem:[#allocation2 + $0x460] sm:$0xff]  ;;  %v3977_v24 = vmul.f32 %v3959_v19, %v11395_v36  ;;  %v2392_v7 = vsub.f32 %v2374_v37, %v11369_v60  ;;  %v6290_v19 = vmul.f32 %v6272_v11, %v11395_v36  ;;  %v6264_v11 = vld [vmem:[#allocation2 + $0x848] sm:$0xff] }
 0x332   : > { %9236 = vmatprep.mubr.msk.f32.mxu1 %vm1663_vm5, %v3985_v57  ;;  %9459 = vmatprep.mubr.msk.f32.mxu0 %vm1663_vm5, %v6007_v38  ;;  %v3960_v57 = vsub.f32 %v3942_v59, %v11369_v60  ;;  %v6014_v38 = vmax.f32 %v5996_v52, 0.0  ;;  %v6016_v54 = vmax.f32 %v5998_v53, 0.0  ;;  %v6257_v52 = vld [vmem:[#allocation2 + $0x810] sm:$0xff]  ;;  %v2393_v59 = vsub.f32 %v2375_v16, %v11369_v60  ;;  %v6258_v53 = vld [vmem:[#allocation2 + $0x818] sm:$0xff] }
 0x333   : > { %9847 = vmatpush3.bf16.msk.msra.mxu1 %vm11335_vm9, %v11339_v10  ;;  %v6011_v10 = vmax.f32 %v5993_v32, 0.0  ;;  %v6000_v32 = vmul.f32 %v5982_v40, %v11395_v36  ;;  %v2410_v42 = vmul.f32 %v2392_v7, %v11395_v36  ;;  %v6310_v28 = vmax.f32 %v6292_v8, 0.0  ;;  %v6559_v8 = vld [vmem:[#allocation2 + $0x890] sm:$0xff] }
 0x334   : > { %v3978_v44 = vmul.f32 %v3960_v57, %v11395_v36  ;;  %v2411_v40 = vmul.f32 %v2393_v59, %v11395_v36  ;;  %v6282_v7 = vsub.f32 %v6264_v11, %v11369_v60  ;;  %v6268_v59 = vld [vmem:[#allocation2 + $0x868] sm:$0xff] }
 0x335   : > { %9237 = vmatmul.mubr.msk.f32.gmra.mrb[2].mxu1 %vm1663_vm5, %v3986_v20  ;;  %9460 = vmatmul.mubr.msk.f32.gmra.mrb[6].mxu0 %vm1663_vm5, %v6008_v47  ;;  %v3961_v20 = vsub.f32 %v3943_v17, %v11369_v60  ;;  %v3945_v47 = vld [vmem:[#allocation2 + $0x470] sm:$0xff]  ;;  %v6018_v45 = vmax.f32 %v6000_v32, 0.0  ;;  %v6291_v17 = vmul.f32 %v6273_v39, %v11395_v36  ;;  %v6267_v39 = vld [vmem:[#allocation2 + $0x860] sm:$0xff]  ;;  %v6286_v13 = vsub.f32 %v6268_v59, %v11369_v60 }
 0x336   : > { %9239 = vmatprep.mubr.msk.f32.mxu1 %vm1663_vm5, %v3987_v55  ;;  %9462 = vmatprep.mubr.msk.f32.mxu0 %vm1663_vm5, %v6009_v29  ;;  %v3994_v55 = vmax.f32 %v3976_v61, 0.0  ;;  %v3995_v29 = vmax.f32 %v3977_v24, 0.0  ;;  %v3963_v63 = vsub.f32 %v3945_v47, %v11369_v60  ;;  %v3996_v3 = vmax.f32 %v3978_v44, 0.0  ;;  %v2377_v61 = vld [vmem:[#allocation2 + $0x238] sm:$0xff]  ;;  %v6261_v44 = vld [vmem:[#allocation2 + $0x830] sm:$0xff] }
 0x337   : > { %v6308_v24 = vmax.f32 %v6290_v19, 0.0  ;;  %v6309_v27 = vmax.f32 %v6291_v17, 0.0  ;;  %v6279_v14 = vsub.f32 %v6261_v44, %v11369_v60  ;;  %v6285_v19 = vsub.f32 %v6267_v39, %v11369_v60  ;;  %v6561_v44 = vld [vmem:[#allocation2 + $0x8a0] sm:$0xff] }
 0x339   : > { %9240 = vmatmul.mubr.msk.f32.gmra.mrb[4].mxu1 %vm1663_vm5, %v3988_v62  ;;  %9463 = vmatmul.mubr.msk.f32.gmra.mrb[8].mxu0 %vm1663_vm5, %v6010_v2  ;;  %v3979_v62 = vmul.f32 %v3961_v20, %v11395_v36  ;;  %v6287_v2 = vmul.f32 %v6269_v23, %v11395_v36  ;;  %v2395_v20 = vsub.f32 %v2377_v61, %v11369_v60  ;;  %v6557_v61 = vld [vmem:[#allocation2 + $0x880] sm:$0xff] }
 0x33a   : > { %9242 = vmatprep.mubr.msk.f32.mxu1 %vm1663_vm5, %v3989_v30  ;;  %9465 = vmatprep.mubr.msk.f32.mxu0 %vm1663_vm5, %v6011_v10  ;;  %v6271_v30 = vsub.f32 %v6253_v1, %v11369_v60  ;;  %v3980_v10 = vmul.f32 %v3962_v41, %v11395_v36  ;;  %v6276_v23 = vsub.f32 %v6258_v53, %v11369_v60  ;;  %v2429_v1 = vmax.f32 %v2411_v40, 0.0 }
 0x33b   : > { %v3997_v15 = vmax.f32 %v3979_v62, 0.0  ;;  %v6305_v25 = vmax.f32 %v6287_v2, 0.0  ;;  %v6263_v62 = vld [vmem:[#allocation2 + $0x840] sm:$0xff]  ;;  %v6303_v17 = vmul.f32 %v6285_v19, %v11395_v36  ;;  %v6575_v40 = vsub.f32 %v6557_v61, %v11369_v60 }
 0x33c   : > { %v6289_v56 = vmul.f32 %v6271_v30, %v11395_v36  ;;  %v6281_v9 = vsub.f32 %v6263_v62, %v11369_v60 }
 0x33d   : > { %9243 = vmatmul.mubr.msk.f32.gmra.mrb[6].mxu1 %vm1663_vm5, %v3990_v21  ;;  %9466 = vmatmul.mubr.msk.f32.gmra.mrb[10].mxu0 %vm1663_vm5, %v6012_v43  ;;  %v3981_v21 = vmul.f32 %v3963_v63, %v11395_v36  ;;  %v2376_v43 = vld [vmem:[#allocation2 + $0x230] sm:$0xff] }
 0x33e   : > { %9245 = vmatprep.mubr.msk.f32.mxu1 %vm1663_vm5, %v3991_v35  ;;  %9468 = vmatprep.mubr.msk.f32.mxu0 %vm1663_vm5, %v6013_v33  ;;  %v3998_v35 = vmax.f32 %v3980_v10, 0.0  ;;  %v6306_v33 = vmax.f32 %v6288_v0, 0.0  ;;  %v2394_v26 = vsub.f32 %v2376_v43, %v11369_v60  ;;  %v6307_v57 = vmax.f32 %v6289_v56, 0.0 }
 0x33f   : > { %v3999_v48 = vmax.f32 %v3981_v21, 0.0  ;;  %v6266_v21 = vld [vmem:[#allocation2 + $0x858] sm:$0xff]  ;;  %v6300_v56 = vmul.f32 %v6282_v7, %v11395_v36  ;;  %v6566_v7 = vld [vmem:[#allocation2 + $0x8c8] sm:$0xff] }
 0x340   : > { %v2412_v31 = vmul.f32 %v2394_v26, %v11395_v36  ;;  %v6284_v43 = vsub.f32 %v6266_v21, %v11369_v60  ;;  %v6584_v21 = vsub.f32 %v6566_v7, %v11369_v60 }
 0x341   : > { %9246 = vmatmul.mubr.msk.f32.gmra.mrb[8].mxu1 %vm1663_vm5, %v3992_v49  ;;  %9469 = vmatmul.mubr.msk.f32.gmra.mrb[12].mxu0 %vm1663_vm5, %v6014_v38  ;;  %v6275_v49 = vsub.f32 %v6257_v52, %v11369_v60  ;;  %v6259_v38 = vld [vmem:[#allocation2 + $0x820] sm:$0xff] }
 0x342   : > { %9248 = vmatprep.mubr.msk.f32.mxu1 %vm1663_vm5, %v3993_v4  ;;  %9471 = vmatprep.mubr.msk.f32.mxu0 %vm1663_vm5, %v6015_v46  ;;  %v4000_v4 = vmax.f32 %v3982_v22, 0.0  ;;  %v2428_v46 = vmax.f32 %v2410_v42, 0.0  ;;  %v2430_v41 = vmax.f32 %v2412_v31, 0.0  ;;  %v6302_v42 = vmul.f32 %v6284_v43, %v11395_v36  ;;  %v6568_v43 = vld [vmem:[#allocation2 + $0x8d8] sm:$0xff] }
 0x343   : > { %v6293_v47 = vmul.f32 %v6275_v49, %v11395_v36  ;;  %v6556_v49 = vld [vmem:[#allocation2 + $0x878] sm:$0xff]  ;;  %v6602_v19 = vmul.f32 %v6584_v21, %v11395_v36  ;;  %v6586_v59 = vsub.f32 %v6568_v43, %v11369_v60 }
 0x344   : > { %v6320_v53 = vmax.f32 %v6302_v42, 0.0 }
 0x345   : > { %9249 = vmatmul.mubr.msk.f32.gmra.mrb[10].mxu1 %vm1663_vm5, %v3994_v55  ;;  %9472 = vmatmul.mubr.msk.f32.gmra.mrb[14].mxu0 %vm1663_vm5, %v6016_v54  ;;  %v6277_v55 = vsub.f32 %v6259_v38, %v11369_v60  ;;  %v6260_v54 = vld [vmem:[#allocation2 + $0x828] sm:$0xff]  ;;  %v6311_v58 = vmax.f32 %v6293_v47, 0.0  ;;  %v6574_v38 = vsub.f32 %v6556_v49, %v11369_v60  ;;  %v6593_v47 = vmul.f32 %v6575_v40, %v11395_v36 }
 0x346   : > { %9251 = vmatprep.mubr.msk.f32.mxu1 %vm1663_vm5, %v3995_v29  ;;  %9474 = vmatprep.mubr.msk.f32.mxu0 %vm1663_vm5, %v6017_v50  ;;  %v6294_v29 = vmul.f32 %v6276_v23, %v11395_v36  ;;  %v6278_v32 = vsub.f32 %v6260_v54, %v11369_v60  ;;  %v6262_v50 = vld [vmem:[#allocation2 + $0x838] sm:$0xff] }
 0x347   : > { %v6295_v51 = vmul.f32 %v6277_v55, %v11395_v36  ;;  %v6280_v30 = vsub.f32 %v6262_v50, %v11369_v60  ;;  %v6592_v23 = vmul.f32 %v6574_v38, %v11395_v36  ;;  %v6577_v55 = vsub.f32 %v6559_v8, %v11369_v60  ;;  %v6560_v54 = vld [vmem:[#allocation2 + $0x898] sm:$0xff] }
 0x348   : > { %v6312_v63 = vmax.f32 %v6294_v29, 0.0  ;;  %v6296_v37 = vmul.f32 %v6278_v32, %v11395_v36  ;;  %v6611_v29 = vmax.f32 %v6593_v47, 0.0  ;;  %v6572_v38 = vld [vmem:[#allocation2 + $0x8f8] sm:$0xff] }
 0x349   : > { %9252 = vmatmul.mubr.msk.f32.gmra.mrb[12].mxu1 %vm1663_vm5, %v3996_v3  ;;  %9475 = vmatmul.mubr.msk.f32.gmra.mrb[16].mxu0 %vm1663_vm5, %v6018_v45  ;;  %v6313_v5 = vmax.f32 %v6295_v51, 0.0  ;;  %v6297_v3 = vmul.f32 %v6279_v14, %v11395_v36  ;;  %v6265_v45 = vld [vmem:[#allocation2 + $0x850] sm:$0xff]  ;;  %v6298_v0 = vmul.f32 %v6280_v30, %v11395_v36  ;;  %v6595_v32 = vmul.f32 %v6577_v55, %v11395_v36  ;;  %v6564_v30 = vld [vmem:[#allocation2 + $0x8b8] sm:$0xff] }
 0x34a   : > { %9254 = vmatprep.mubr.msk.f32.mxu1 %vm1663_vm5, %v3997_v15  ;;  %9481 = vmatprep.mubr.msk.f32.mxu0 %vm1663_vm5, %v6305_v25  ;;  %v6314_v10 = vmax.f32 %v6296_v37, 0.0  ;;  %v6299_v15 = vmul.f32 %v6281_v9, %v11395_v36  ;;  %v6283_v25 = vsub.f32 %v6265_v45, %v11369_v60  ;;  %v6563_v51 = vld [vmem:[#allocation2 + $0x8b0] sm:$0xff]  ;;  %v6582_v11 = vsub.f32 %v6564_v30, %v11369_v60  ;;  %v7107_v30 = vld [vmem:[%s12839_s5 + $0x3c] sm:$0xff] }
 0x34b   : > { %v6315_v16 = vmax.f32 %v6297_v3, 0.0  ;;  %v6316_v18 = vmax.f32 %v6298_v0, 0.0  ;;  %v6581_v37 = vsub.f32 %v6563_v51, %v11369_v60  ;;  %v6590_v40 = vsub.f32 %v6572_v38, %v11369_v60 }
 0x34c   : > { %v6317_v52 = vmax.f32 %v6299_v15, 0.0  ;;  %v6301_v22 = vmul.f32 %v6283_v25, %v11395_v36  ;;  %v6600_v25 = vmul.f32 %v6582_v11, %v11395_v36 }
 0x34d   : > { %9255 = vmatmul.mubr.msk.f32.gmra.mrb[14].mxu1 %vm1663_vm5, %v3998_v35  ;;  %9482 = vmatmul.mubr.msk.f32.vlgmr.msra.gmra.mrb[0].mxu0 %vm1663_vm5, %v6306_v33  ;;  %v6555_v35 = vld [vmem:[#allocation2 + $0x870] sm:$0xff]  ;;  %v6318_v33 = vmax.f32 %v6300_v56, 0.0 }
 0x34e   : > { %9777 = vmatpush3.bf16.msk.msra.mxu0 %vm11335_vm9, %v12198_v6  ;;  %9257 = vmatprep.mubr.msk.f32.mxu1 %vm1663_vm5, %v3999_v48  ;;  %v2413_v6 = vmul.f32 %v2395_v20, %v11395_v36  ;;  %v6319_v48 = vmax.f32 %v6301_v22, 0.0  ;;  %v6573_v26 = vsub.f32 %v6555_v35, %v11369_v60  ;;  %v6618_v22 = vmax.f32 %v6600_v25, 0.0  ;;  %v7099_v25 = vld [vmem:[%s12839_s5 + $0x8] sm:$0xff] }
 0x34f   : > { %9484 = vmatprep.mubr.msk.f32.mxu0 %vm1663_vm5, %v6307_v57  ;;  %v6304_v57 = vmul.f32 %v6286_v13, %v11395_v36  ;;  %v6570_v13 = vld [vmem:[#allocation2 + $0x8e8] sm:$0xff] }
 0x350   : > { %v2431_v2 = vmax.f32 %v2413_v6, 0.0  ;;  %v6578_v6 = vsub.f32 %v6560_v54, %v11369_v60  ;;  %v6588_v49 = vsub.f32 %v6570_v13, %v11369_v60 }
 0x351   : > { %9258 = vmatmul.mubr.msk.f32.gmra.mrb[16].mxu1 %vm1663_vm5, %v4000_v4  ;;  %9485 = vmatmul.mubr.msk.f32.gmra.mrb[2].mxu0 %vm1663_vm5, %v6308_v24  ;;  %v6321_v4 = vmax.f32 %v6303_v17, 0.0  ;;  %v6591_v24 = vmul.f32 %v6573_v26, %v11395_v36  ;;  %v6322_v20 = vmax.f32 %v6304_v57, 0.0  ;;  %v6620_v17 = vmax.f32 %v6602_v19, 0.0 }
 0x352   : > { %9285 = vmatprep.mubr.msk.f32.mxu1 %vm1663_vm5, %v2428_v46  ;;  %9487 = vmatprep.mubr.msk.f32.mxu0 %vm1663_vm5, %v6309_v27  ;;  %v6558_v46 = vld [vmem:[#allocation2 + $0x888] sm:$0xff]  ;;  %v6596_v50 = vmul.f32 %v6578_v6, %v11395_v36  ;;  %v6604_v26 = vmul.f32 %v6586_v59, %v11395_v36 }
 0x353   : > { %v6576_v27 = vsub.f32 %v6558_v46, %v11369_v60  ;;  %v6609_v31 = vmax.f32 %v6591_v24, 0.0  ;;  %v6606_v24 = vmul.f32 %v6588_v49, %v11395_v36 }
 0x354   : > { %v6614_v3 = vmax.f32 %v6596_v50, 0.0 }
 0x355   : > { %9286 = vmatmul.mubr.msk.f32.vlgmr.msra.gmra.mrb[14].mxu1 %vm1663_vm5, %v2429_v1  ;;  %9488 = vmatmul.mubr.msk.f32.gmra.mrb[4].mxu0 %vm1663_vm5, %v6310_v28  ;;  %v6610_v1 = vmax.f32 %v6592_v23, 0.0  ;;  %v6594_v28 = vmul.f32 %v6576_v27, %v11395_v36  ;;  %v6608_v23 = vmul.f32 %v6590_v40, %v11395_v36 }
 0x356   : > { %9288 = vmatprep.mubr.msk.f32.mxu1 %vm1663_vm5, %v2430_v41  ;;  %9490 = vmatprep.mubr.msk.f32.mxu0 %vm1663_vm5, %v6311_v58  ;;  %v6579_v41 = vsub.f32 %v6561_v44, %v11369_v60  ;;  %v6562_v58 = vld [vmem:[#allocation2 + $0x8a8] sm:$0xff] }
 0x357   : > { %v6612_v14 = vmax.f32 %v6594_v28, 0.0  ;;  %v6580_v62 = vsub.f32 %v6562_v58, %v11369_v60 }
 0x359   : > { %9289 = vmatmul.mubr.msk.f32.gmra.mrb[16].mxu1 %vm1663_vm5, %v2431_v2  ;;  %9491 = vmatmul.mubr.msk.f32.gmra.mrb[6].mxu0 %vm1663_vm5, %v6312_v63  ;;  %v6613_v2 = vmax.f32 %v6595_v32, 0.0  ;;  %v6597_v63 = vmul.f32 %v6579_v41, %v11395_v36  ;;  %v6598_v9 = vmul.f32 %v6580_v62, %v11395_v36 }
 0x35a   : > { %9493 = vmatprep.mubr.msk.f32.mxu0 %vm1663_vm5, %v6313_v5  ;;  %v6565_v5 = vld [vmem:[#allocation2 + $0x8c0] sm:$0xff] }
 0x35b   : > { %v6615_v45 = vmax.f32 %v6597_v63, 0.0  ;;  %v6583_v0 = vsub.f32 %v6565_v5, %v11369_v60  ;;  %v6616_v15 = vmax.f32 %v6598_v9, 0.0  ;;  %v7108_v5 = vld [vmem:[%s12839_s5 + $0x44] sm:$0xff] }
 0x35c   : > { %v9778_v11 = vpack.c.bf16 %v7108_v5, %v7107_v30 }
 0x35d   : > { %9494 = vmatmul.mubr.msk.f32.gmra.mrb[8].mxu0 %vm1663_vm5, %v6314_v10  ;;  %v6599_v10 = vmul.f32 %v6581_v37, %v11395_v36  ;;  %v12445_v37 = vld [vmem:[%s12838_s4] ss:$0 sm:$0xff] }
 0x35e   : > { %9496 = vmatprep.mubr.msk.f32.mxu0 %vm1663_vm5, %v6315_v16  ;;  %v6567_v16 = vld [vmem:[#allocation2 + $0x8d0] sm:$0xff]  ;;  %9779 = vmatprep.subr.bf16.mxu1 %v9778_v11 }
 0x35f   : > { %v6617_v39 = vmax.f32 %v6599_v10, 0.0  ;;  %v6585_v56 = vsub.f32 %v6567_v16, %v11369_v60  ;;  %v7109_v10 = vld [vmem:[%s12839_s5 + $0x4c] sm:$0xf]  ;;  %9781 = vmatpush3.bf16.msra.mxu1 %v9778_v11 }
 0x360   : > { %9543 = vmatprep.subr.msk.mxu1 %vm808_vm1, %v7109_v10 }
 0x361   : > { %9497 = vmatmul.mubr.msk.f32.gmra.mrb[10].mxu0 %vm1663_vm5, %v6316_v18  ;;  %v6601_v18 = vmul.f32 %v6583_v0, %v11395_v36 }
 0x362   : > { %9499 = vmatprep.mubr.msk.f32.mxu0 %vm1663_vm5, %v6317_v52  ;;  %v6569_v52 = vld [vmem:[#allocation2 + $0x8e0] sm:$0xff] }
 0x363   : > { %v6619_v35 = vmax.f32 %v6601_v18, 0.0  ;;  %v6587_v42 = vsub.f32 %v6569_v52, %v11369_v60  ;;  %9544 = vmatpush3.msk.msra.mxu1 %vm808_vm1, %v7109_v10 }
 0x365   : > { %9500 = vmatmul.mubr.msk.f32.gmra.mrb[12].mxu0 %vm1663_vm5, %v6318_v33  ;;  %v6603_v33 = vmul.f32 %v6585_v56, %v11395_v36 }
 0x366   : > { %9502 = vmatprep.mubr.msk.f32.mxu0 %vm1663_vm5, %v6319_v48  ;;  %v6571_v48 = vld [vmem:[#allocation2 + $0x8f0] sm:$0xff] }
 0x367   : > { %v6621_v61 = vmax.f32 %v6603_v33, 0.0  ;;  %v6589_v57 = vsub.f32 %v6571_v48, %v11369_v60 }
 0x369   : > { %9503 = vmatmul.mubr.msk.f32.gmra.mrb[14].mxu0 %vm1663_vm5, %v6320_v53  ;;  %v6605_v53 = vmul.f32 %v6587_v42, %v11395_v36  ;;  %v6607_v8 = vmul.f32 %v6589_v57, %v11395_v36 }
 0x36a   : > { %9505 = vmatprep.mubr.msk.f32.mxu0 %vm1663_vm5, %v6321_v4  ;;  %v6622_v4 = vmax.f32 %v6604_v26, 0.0 }
 0x36b   : > { %v6623_v46 = vmax.f32 %v6605_v53, 0.0  ;;  %v6625_v27 = vmax.f32 %v6607_v8, 0.0 }
 0x36d   : > { %9506 = vmatmul.mubr.msk.f32.gmra.mrb[16].mxu0 %vm1663_vm5, %v6322_v20  ;;  %v6624_v20 = vmax.f32 %v6606_v24, 0.0 }
 0x36e   : > { %9512 = vmatprep.mubr.msk.f32.mxu0 %vm1663_vm5, %v6609_v31  ;;  %v6626_v31 = vmax.f32 %v6608_v23, 0.0 }
 0x371   : > { %9513 = vmatmul.mubr.msk.f32.vlgmr.msra.gmra.mrb[0].mxu0 %vm1663_vm5, %v6610_v1 }
 0x372   : > { %9515 = vmatprep.mubr.msk.f32.mxu0 %vm1663_vm5, %v6611_v29 }
 0x375   : > { %9516 = vmatmul.mubr.msk.f32.gmra.mrb[2].mxu0 %vm1663_vm5, %v6612_v14 }
 0x376   : > { %9518 = vmatprep.mubr.msk.f32.mxu0 %vm1663_vm5, %v6613_v2 }
 0x379   : > { %9519 = vmatmul.mubr.msk.f32.gmra.mrb[4].mxu0 %vm1663_vm5, %v6614_v3 }
 0x37a   : > { %9521 = vmatprep.mubr.msk.f32.mxu0 %vm1663_vm5, %v6615_v45 }
 0x37d   : > { %9522 = vmatmul.mubr.msk.f32.gmra.mrb[6].mxu0 %vm1663_vm5, %v6616_v15  ;;  %v7098_v15 = vld [vmem:[%s12839_s5] sm:$0xff] }
 0x37e   : > { %9524 = vmatprep.mubr.msk.f32.mxu0 %vm1663_vm5, %v6617_v39  ;;  %v12471_v56 = vpack.c.bf16 %v7099_v25, %v7098_v15 }
 0x380   : > { %9783 = vmatprep.subr.bf16.mxu1 %v12471_v56 }
 0x381   : > { %9525 = vmatmul.mubr.msk.f32.gmra.mrb[8].mxu0 %vm1663_vm5, %v6618_v22 }
 0x382   : > { %9527 = vmatprep.mubr.msk.f32.mxu0 %vm1663_vm5, %v6619_v35 }
 0x385   : > { %9528 = vmatmul.mubr.msk.f32.gmra.mrb[10].mxu0 %vm1663_vm5, %v6620_v17 }
 0x386   : > { %9530 = vmatprep.mubr.msk.f32.mxu0 %vm1663_vm5, %v6621_v61 }
 0x389   : > { %9531 = vmatmul.mubr.msk.f32.gmra.mrb[12].mxu0 %vm1663_vm5, %v6622_v4 }
 0x38a   : > { %9533 = vmatprep.mubr.msk.f32.mxu0 %vm1663_vm5, %v6623_v46 }
 0x38d   : > { %9534 = vmatmul.mubr.msk.f32.gmra.mrb[14].mxu0 %vm1663_vm5, %v6624_v20 }
 0x38e   : > { %9536 = vmatprep.mubr.msk.f32.mxu0 %vm1663_vm5, %v6625_v27 }
 0x391   : > { %9537 = vmatmul.mubr.msk.f32.gmra.mrb[16].mxu0 %vm1663_vm5, %v6626_v31 }
 0x404   : > { %v9235_v60 = vpop.f32.mrb[0].mxu1 }
 0x405   : > { %v4126_v47 = vpop.f32.mrb[1].mxu1 }
 0x408   : > { %v9238_v55 = vpop.f32.mrb[2].mxu1 }
 0x409   : > { %v4136_v54 = vpop.f32.mrb[3].mxu1 }
 0x40c   : > { %v9241_v44 = vpop.f32.mrb[4].mxu1 }
 0x40d   : > { %v4146_v1 = vpop.f32.mrb[5].mxu1 }
 0x410   : > { %v9244_v28 = vpop.f32.mrb[6].mxu1 }
 0x411   : > { %v4156_v6 = vpop.f32.mrb[7].mxu1 }
 0x414   : > { %v9247_v29 = vpop.f32.mrb[8].mxu1 }
 0x415   : > { %v4166_v36 = vpop.f32.mrb[9].mxu1 }
 0x418   : > { %v12426_v32 = vpop.f32.mrb[10].mxu1 }
 0x419   : > { %v12428_v41 = vpop.f32.mrb[11].mxu1 }
 0x41c   : > { %v12430_v58 = vpop.f32.mrb[12].mxu1 }
 0x41d   : > { %v12432_v51 = vpop.f32.mrb[13].mxu1 }
 0x428   : > { %v12434_v14 = vpop.f32.mrb[14].mxu1 }
 0x429   : > { %v12436_v50 = vpop.f32.mrb[15].mxu1 }
 0x42c   : > { %v12438_v62 = vpop.f32.mrb[16].mxu1 }
 0x42d   : > { %v12440_v2 = vpop.f32.mrb[17].mxu1 }
 0x444   : > { %v9514_v63 = vpop.f32.mrb[0].mxu0 }
 0x445   : > { %v9848_v3 = vadd.f32 %v9514_v63, %v9235_v60  ;;  %v6752_v9 = vpop.f32.mrb[1].mxu0 }
 0x446   : > { %v9849_v45 = vadd.f32 %v6752_v9, %v4126_v47 }
 0x447   : > { %v12457_v0 = vadd.f32 %v9848_v3, %v12445_v37 }
 0x448   : > { %v12460_v7 = vadd.f32 %v9849_v45, %v12445_v37  ;;  %v9517_v16 = vpop.f32.mrb[2].mxu0 }
 0x449   : > { %v6940_v21 = vsel %vm6938_vm10, %v12457_v0, 0.0  ;;  %v9850_v39 = vadd.f32 %v9517_v16, %v9238_v55  ;;  %v6762_v18 = vpop.f32.mrb[3].mxu0 }
 0x44a   : > { %v6939_v43 = vsel %vm6938_vm10, %v12460_v7, 0.0  ;;  %v9851_v52 = vadd.f32 %v6762_v18, %v4136_v54 }
 0x44b   : > { %v6941_v22 = vadd.f32 %v6940_v21, %v6939_v43  ;;  %v12476_v19 = vadd.f32 %v9850_v39, %v12445_v37 }
 0x44c   : > { %v12479_v59 = vadd.f32 %v9851_v52, %v12445_v37  ;;  %v9520_v35 = vpop.f32.mrb[4].mxu0 }
 0x44d   : > { %v9852_v33 = vadd.f32 %v9520_v35, %v9241_v44  ;;  %v6772_v42 = vpop.f32.mrb[5].mxu0  ;;  %v6944_v26 = vsel %vm6938_vm10, %v12476_v19, 0.0 }
 0x44e   : > { %v6942_v13 = vsel %vm6938_vm10, %v12479_v59, 0.0  ;;  %v9853_v48 = vadd.f32 %v6772_v42, %v4146_v1 }
 0x44f   : > { %v6943_v17 = vadd.f32 %v6942_v13, %v6941_v22  ;;  %v12488_v49 = vadd.f32 %v9852_v33, %v12445_v37 }
 0x450   : > { %v12491_v61 = vadd.f32 %v9853_v48, %v12445_v37  ;;  %v9523_v53 = vpop.f32.mrb[6].mxu0 }
 0x451   : > { %v6945_v57 = vadd.f32 %v6944_v26, %v6943_v17  ;;  %v9854_v38 = vadd.f32 %v9523_v53, %v9244_v28  ;;  %v6782_v4 = vpop.f32.mrb[7].mxu0  ;;  %v6948_v8 = vsel %vm6938_vm10, %v12488_v49, 0.0 }
 0x452   : > { %v6946_v24 = vsel %vm6938_vm10, %v12491_v61, 0.0  ;;  %v9855_v40 = vadd.f32 %v6782_v4, %v4156_v6 }
 0x453   : > { %v6947_v46 = vadd.f32 %v6946_v24, %v6945_v57  ;;  %v12498_v20 = vadd.f32 %v9854_v38, %v12445_v37 }
 0x454   : > { %v12501_v23 = vadd.f32 %v9855_v40, %v12445_v37  ;;  %v9526_v27 = vpop.f32.mrb[8].mxu0 }
 0x455   : > { %v6949_v31 = vadd.f32 %v6948_v8, %v6947_v46  ;;  %v9856_v60 = vadd.f32 %v9526_v27, %v9247_v29  ;;  %v6792_v47 = vpop.f32.mrb[9].mxu0  ;;  %v6952_v1 = vsel %vm6938_vm10, %v12498_v20, 0.0 }
 0x456   : > { %v6950_v55 = vsel %vm6938_vm10, %v12501_v23, 0.0  ;;  %v9857_v54 = vadd.f32 %v6792_v47, %v4166_v36 }
 0x457   : > { %v6951_v44 = vadd.f32 %v6950_v55, %v6949_v31  ;;  %v12508_v28 = vadd.f32 %v9856_v60, %v12445_v37 }
 0x458   : > { %v6928_v6 = vadd.f32 %v9857_v54, %v12445_v37  ;;  %v9529_v63 = vpop.f32.mrb[10].mxu0 }
 0x459   : > { %v6953_v30 = vadd.f32 %v6952_v1, %v6951_v44  ;;  %v9858_v5 = vadd.f32 %v9529_v63, %v12426_v32  ;;  %v6802_v3 = vpop.f32.mrb[11].mxu0  ;;  %v6956_v36 = vsel %vm6938_vm10, %v12508_v28, 0.0 }
 0x45a   : > { %v6954_v29 = vsel %vm6938_vm10, %v6928_v6, 0.0  ;;  %v9859_v9 = vadd.f32 %v6802_v3, %v12428_v41 }
 0x45b   : > { %v6955_v11 = vadd.f32 %v6954_v29, %v6953_v30  ;;  %v6931_v45 = vadd.f32 %v9858_v5, %v12445_v37 }
 0x45c   : > { %v6930_v10 = vadd.f32 %v9859_v9, %v12445_v37  ;;  %v9532_v16 = vpop.f32.mrb[12].mxu0 }
 0x45d   : > { %v6957_v15 = vadd.f32 %v6956_v36, %v6955_v11  ;;  %v9860_v25 = vadd.f32 %v9532_v16, %v12430_v58  ;;  %v6812_v21 = vpop.f32.mrb[13].mxu0  ;;  %v6960_v41 = vsel %vm6938_vm10, %v6931_v45, 0.0 }
 0x45e   : > { %v6958_v32 = vsel %vm6938_vm10, %v6930_v10, 0.0  ;;  %v9861_v39 = vadd.f32 %v6812_v21, %v12432_v51 }
 0x45f   : > { %v6959_v18 = vadd.f32 %v6958_v32, %v6957_v15  ;;  %v6933_v43 = vadd.f32 %v9860_v25, %v12445_v37 }
 0x460   : > { %v6932_v52 = vadd.f32 %v9861_v39, %v12445_v37  ;;  %v9535_v22 = vpop.f32.mrb[14].mxu0 }
 0x461   : > { %v6961_v35 = vadd.f32 %v6960_v41, %v6959_v18  ;;  %v9862_v33 = vadd.f32 %v9535_v22, %v12434_v14  ;;  %v6822_v42 = vpop.f32.mrb[15].mxu0  ;;  %v6964_v17 = vsel %vm6938_vm10, %v6933_v43, 0.0 }
 0x462   : > { %v6962_v13 = vsel %vm6938_vm10, %v6932_v52, 0.0  ;;  %v9863_v58 = vadd.f32 %v6822_v42, %v12436_v50 }
 0x463   : > { %v6963_v48 = vadd.f32 %v6962_v13, %v6961_v35  ;;  %v6935_v51 = vadd.f32 %v9862_v33, %v12445_v37 }
 0x464   : > { %v6934_v26 = vadd.f32 %v9863_v58, %v12445_v37  ;;  %v9538_v53 = vpop.f32.mrb[16].mxu0 }
 0x465   : > { %v6965_v57 = vadd.f32 %v6964_v17, %v6963_v48  ;;  %v9864_v38 = vadd.f32 %v9538_v53, %v12438_v62  ;;  %v6832_v4 = vpop.f32.mrb[17].mxu0  ;;  %v6968_v46 = vsel %vm6938_vm10, %v6935_v51, 0.0 }
 0x466   : > { %v6966_v24 = vsel %vm6938_vm10, %v6934_v26, 0.0  ;;  %v9865_v14 = vadd.f32 %v6832_v4, %v12440_v2 }
 0x467   : > { %v6967_v40 = vadd.f32 %v6966_v24, %v6965_v57  ;;  %v6937_v50 = vadd.f32 %v9864_v38, %v12445_v37 }
 0x468   : > { %v6936_v8 = vadd.f32 %v9865_v14, %v12445_v37 }
 0x469   : > { %v6969_v27 = vadd.f32 %v6968_v46, %v6967_v40  ;;  %v6972_v47 = vsel %vm6938_vm10, %v6937_v50, 0.0 }
 0x46a   : > { %v6970_v31 = vsel %vm6938_vm10, %v6936_v8, 0.0 }
 0x46b   : > { %v6971_v60 = vadd.f32 %v6970_v31, %v6969_v27 }
 0x46d   : > { %v6973_v55 = vadd.f32 %v6972_v47, %v6971_v60 }
 0x46f   : > { %v6974_v62 = vrot.slane %v6973_v55, 4 }
 0x471   : > { %v6975_v54 = vadd.f32 %v6974_v62, %v6973_v55 }
 0x473   : > { %v6976_v44 = vrot.slane %v6975_v54, 2 }
 0x475   : > { %v6977_v1 = vadd.f32 %v6976_v44, %v6975_v54 }
 0x477   : > { %v6978_v63 = vrot.slane %v6977_v1, 1 }
 0x479   : > { %v6979_v2 = vadd.f32 %v6978_v63, %v6977_v1 }
 0x47b   : > { %v6981_v30 = vmul.f32 0.0069444445, %v6979_v2 }
 0x47d   : > { %v12539_v5 = vsub.f32 %v12460_v7, %v6981_v30  ;;  %v12542_v3 = vsub.f32 %v12457_v0, %v6981_v30  ;;  %v12545_v37 = vsub.f32 %v12479_v59, %v6981_v30  ;;  %v12548_v29 = vsub.f32 %v12476_v19, %v6981_v30 }
 0x47e   : > { %v12551_v9 = vsub.f32 %v12491_v61, %v6981_v30  ;;  %v12554_v11 = vsub.f32 %v12488_v49, %v6981_v30  ;;  %v12557_v36 = vsub.f32 %v12501_v23, %v6981_v30  ;;  %v12560_v7 = vsub.f32 %v12498_v20, %v6981_v30 }
 0x47f   : > { %v12562_v0 = vsub.f32 %v6928_v6, %v6981_v30  ;;  %v12565_v59 = vsub.f32 %v12508_v28, %v6981_v30  ;;  %v12567_v16 = vsub.f32 %v6930_v10, %v6981_v30  ;;  %v12569_v19 = vsub.f32 %v6931_v45, %v6981_v30 }
 0x480   : > { %v12571_v61 = vsub.f32 %v6932_v52, %v6981_v30  ;;  %v12573_v15 = vsub.f32 %v6933_v43, %v6981_v30  ;;  %v12575_v49 = vsub.f32 %v6934_v26, %v6981_v30  ;;  %v12577_v23 = vsub.f32 %v6935_v51, %v6981_v30 }
 0x481   : > { %v12579_v25 = vsub.f32 %v6936_v8, %v6981_v30  ;;  %v12581_v20 = vsub.f32 %v6937_v50, %v6981_v30  ;;  %v7000_v28 = vmul.f32 %v12539_v5, %v12539_v5  ;;  %v7001_v6 = vmul.f32 %v12542_v3, %v12542_v3 }
 0x482   : > { %v7002_v45 = vmul.f32 %v12545_v37, %v12545_v37  ;;  %v7003_v10 = vmul.f32 %v12548_v29, %v12548_v29  ;;  %v7004_v18 = vmul.f32 %v12551_v9, %v12551_v9  ;;  %v7005_v52 = vmul.f32 %v12554_v11, %v12554_v11 }
 0x483   : > { %v7018_v21 = vsel %vm6938_vm10, %v7000_v28, 0.0  ;;  %v7019_v32 = vsel %vm6938_vm10, %v7001_v6, 0.0  ;;  %v7006_v33 = vmul.f32 %v12557_v36, %v12557_v36  ;;  %v7007_v58 = vmul.f32 %v12560_v7, %v12560_v7 }
 0x484   : > { %v7020_v39 = vadd.f32 %v7019_v32, %v7018_v21  ;;  %v7021_v41 = vsel %vm6938_vm10, %v7002_v45, 0.0  ;;  %v7023_v22 = vsel %vm6938_vm10, %v7003_v10, 0.0  ;;  %v7025_v42 = vsel %vm6938_vm10, %v7004_v18, 0.0 }
 0x485   : > { %v7027_v48 = vsel %vm6938_vm10, %v7005_v52, 0.0  ;;  %v7008_v51 = vmul.f32 %v12562_v0, %v12562_v0  ;;  %v7029_v26 = vsel %vm6938_vm10, %v7006_v33, 0.0  ;;  %v7009_v57 = vmul.f32 %v12565_v59, %v12565_v59 }
 0x486   : > { %v7022_v43 = vadd.f32 %v7021_v41, %v7020_v39  ;;  %v7031_v38 = vsel %vm6938_vm10, %v7007_v58, 0.0  ;;  %v7010_v24 = vmul.f32 %v12567_v16, %v12567_v16  ;;  %v7011_v46 = vmul.f32 %v12569_v19, %v12569_v19 }
 0x487   : > { %v7033_v14 = vsel %vm6938_vm10, %v7008_v51, 0.0  ;;  %v7035_v50 = vsel %vm6938_vm10, %v7009_v57, 0.0  ;;  %v7012_v27 = vmul.f32 %v12571_v61, %v12571_v61  ;;  %v7013_v47 = vmul.f32 %v12573_v15, %v12573_v15 }
 0x488   : > { %v7024_v35 = vadd.f32 %v7023_v22, %v7022_v43  ;;  %v7037_v31 = vsel %vm6938_vm10, %v7010_v24, 0.0  ;;  %v7039_v55 = vsel %vm6938_vm10, %v7011_v46, 0.0  ;;  %v7014_v54 = vmul.f32 %v12575_v49, %v12575_v49 }
 0x489   : > { %v7041_v44 = vsel %vm6938_vm10, %v7012_v27, 0.0  ;;  %v7015_v63 = vmul.f32 %v12577_v23, %v12577_v23  ;;  %v7043_v2 = vsel %vm6938_vm10, %v7013_v47, 0.0  ;;  %v7016_v28 = vmul.f32 %v12579_v25, %v12579_v25 }
 0x48a   : > { %v7026_v13 = vadd.f32 %v7025_v42, %v7024_v35  ;;  %v7045_v6 = vsel %vm6938_vm10, %v7014_v54, 0.0  ;;  %v7017_v10 = vmul.f32 %v12581_v20, %v12581_v20 }
 0x48b   : > { %v7047_v21 = vsel %vm6938_vm10, %v7015_v63, 0.0  ;;  %v7049_v39 = vsel %vm6938_vm10, %v7016_v28, 0.0 }
 0x48c   : > { %v7028_v17 = vadd.f32 %v7027_v48, %v7026_v13  ;;  %v7051_v41 = vsel %vm6938_vm10, %v7017_v10, 0.0 }
 0x48e   : > { %v7030_v53 = vadd.f32 %v7029_v26, %v7028_v17 }
 0x490   : > { %v7032_v4 = vadd.f32 %v7031_v38, %v7030_v53 }
 0x492   : > { %v7034_v40 = vadd.f32 %v7033_v14, %v7032_v4 }
 0x494   : > { %v7036_v8 = vadd.f32 %v7035_v50, %v7034_v40  ;;  %v7280_v50 = vld [vmem:[%s12839_s5 + $0x60] sm:$0xf] }
 0x496   : > { %v7038_v60 = vadd.f32 %v7037_v31, %v7036_v8  ;;  %v7102_v8 = vld [vmem:[%s12839_s5 + $0x1c] sm:$0xff] }
 0x498   : > { %v7040_v62 = vadd.f32 %v7039_v55, %v7038_v60  ;;  %v7103_v55 = vld [vmem:[%s12839_s5 + $0x24] sm:$0xf] }
 0x49a   : > { %v7042_v1 = vadd.f32 %v7041_v44, %v7040_v62  ;;  %v7449_v62 = vld [vmem:[%s12839_s5 + $0x64] sm:$0xff] }
 0x49c   : > { %v7044_v30 = vadd.f32 %v7043_v2, %v7042_v1  ;;  %v7451_v2 = vld [vmem:[%s12839_s5 + $0x74] sm:$0xf] }
 0x49e   : > { %v7046_v45 = vadd.f32 %v7045_v6, %v7044_v30  ;;  %v7104_v30 = vld [vmem:[%s12839_s5 + $0x28] sm:$0xff] }
 0x4a0   : > { %v7048_v32 = vadd.f32 %v7047_v21, %v7046_v45  ;;  %v7106_v21 = vld [vmem:[%s12839_s5 + $0x38] sm:$0xf] }
 0x4a2   : > { %v7050_v18 = vadd.f32 %v7049_v39, %v7048_v32  ;;  %v7620_v32 = vld [vmem:[%s12839_s5 + $0x78] sm:$0xff] }
 0x4a4   : > { %v7052_v43 = vadd.f32 %v7051_v41, %v7050_v18 }
 0x4a6   : > { %v7053_v52 = vrot.slane %v7052_v43, 4 }
 0x4a8   : > { %v7054_v22 = vadd.f32 %v7053_v52, %v7052_v43  ;;  %v7622_v52 = vld [vmem:[%s12839_s5 + $0x88] sm:$0xf] }
 0x4aa   : > { %v7055_v35 = vrot.slane %v7054_v22, 2 }
 0x4ac   : > { %v7056_v33 = vadd.f32 %v7055_v35, %v7054_v22  ;;  %v7709_v22 = vld [vmem:[%s12839_s5 + $0x8c] sm:$0xff] }
 0x4ae   : > { %v7057_v42 = vrot.slane %v7056_v33, 1 }
 0x4b0   : > { %v7058_v13 = vadd.f32 %v7057_v42, %v7056_v33 }
 0x4b2   : > { %v7059_v58 = vmul.f32 0.0069444445, %v7058_v13 }
 0x4b4   : > { %v7060_v48 = vadd.f32 1e-05, %v7059_v58  ;;  %v7711_v58 = vld [vmem:[%s12839_s5 + $0x9c] sm:$0xf] }
 0x4b6   : > { %10150 = vrsqrt.f32 %v7060_v48  ;;  %v7798_v48 = vld [vmem:[%s12839_s5 + $0xa0] sm:$0xff] }
 0x4c0   : > { %v12637_v17 = vpop.eup %10150 }
 0x4c1   : > { %v12641_v51 = vmul.f32 %v12637_v17, %v12579_v25  ;;  %v7068_v26 = vmul.f32 %v12637_v17, %v12557_v36  ;;  %v7069_v53 = vmul.f32 %v12637_v17, %v12560_v7  ;;  %v7062_v57 = vmul.f32 %v12637_v17, %v12539_v5  ;;  %v7100_v25 = vld [vmem:[%s12839_s5 + $0x10] sm:$0xf]  ;;  %v7279_v5 = vld [vmem:[%s12839_s5 + $0x58] sm:$0xff] }
 0x4c2   : > { %v7070_v38 = vmul.f32 %v12637_v17, %v12562_v0  ;;  %v7278_v36 = vld [vmem:[%s12839_s5 + $0x50] sm:$0xff]  ;;  %v7063_v0 = vmul.f32 %v12637_v17, %v12542_v3  ;;  %v7071_v27 = vmul.f32 %v12637_v17, %v12565_v59  ;;  %v7064_v31 = vmul.f32 %v12637_v17, %v12545_v37 }
 0x4c3   : > { %v7086_v4 = vmax.f32 %v7068_v26, 0.0  ;;  %v7087_v24 = vmax.f32 %v7069_v53, 0.0  ;;  %v7080_v14 = vmax.f32 %v7062_v57, 0.0  ;;  %v9786_v7 = vpack.c.bf16 %v7279_v5, %v7278_v36  ;;  %v7450_v59 = vld [vmem:[%s12839_s5 + $0x6c] sm:$0xff] }
 0x4c4   : > { %v7081_v40 = vmax.f32 %v7063_v0, 0.0  ;;  %v7088_v46 = vmax.f32 %v7070_v38, 0.0  ;;  %v7089_v60 = vmax.f32 %v7071_v27, 0.0  ;;  %v7082_v47 = vmax.f32 %v7064_v31, 0.0  ;;  %v7800_v38 = vld [vmem:[%s12839_s5 + $0xb0] sm:$0xf] }
 0x4c5   : > { %9545 = vmatprep.mubr.msk.f32.mxu1 %vm6938_vm10, %v7086_v4  ;;  %v9794_v37 = vpack.c.bf16 %v7450_v59, %v7449_v62  ;;  %v7065_v54 = vmul.f32 %v12637_v17, %v12548_v29  ;;  %v7072_v44 = vmul.f32 %v12637_v17, %v12567_v16  ;;  %v7105_v29 = vld [vmem:[%s12839_s5 + $0x30] sm:$0xff]  ;;  %v7073_v28 = vmul.f32 %v12637_v17, %v12569_v19  ;;  %v7621_v19 = vld [vmem:[%s12839_s5 + $0x80] sm:$0xff] }
 0x4c6   : > { %9546 = vmatmul.mubr.msk.f32.vlgmr.msra.gmra.mrb[18].mxu1 %vm6938_vm10, %v7087_v24  ;;  %v9798_v16 = vpack.c.bf16 %v7105_v29, %v7104_v30  ;;  %v7066_v6 = vmul.f32 %v12637_v17, %v12551_v9  ;;  %v9802_v9 = vpack.c.bf16 %v7621_v19, %v7620_v32  ;;  %v7067_v39 = vmul.f32 %v12637_v17, %v12554_v11  ;;  %v7710_v11 = vld [vmem:[%s12839_s5 + $0x94] sm:$0xff]  ;;  %v7932_v19 = vld [vmem:[%s12841_s7 + $0x8] sm:$0xff] }
 0x4c7   : > { %9785 = vmatpush3.bf16.msra.mxu1 %v12471_v56  ;;  %9554 = vmatprep.mubr.msk.f32.mxu1 %vm6938_vm10, %v7080_v14  ;;  %v7101_v56 = vld [vmem:[%s12839_s5 + $0x14] sm:$0xff]  ;;  %v7083_v1 = vmax.f32 %v7065_v54, 0.0  ;;  %v7090_v63 = vmax.f32 %v7072_v44, 0.0  ;;  %v7091_v45 = vmax.f32 %v7073_v28, 0.0  ;;  %v7074_v18 = vmul.f32 %v12637_v17, %v12571_v61 }
 0x4c8   : > { %9552 = vmatprep.subr.msk.mxu1 %vm808_vm1, %v7100_v25  ;;  %v9790_v3 = vpack.c.bf16 %v7102_v8, %v7101_v56  ;;  %v7084_v10 = vmax.f32 %v7066_v6, 0.0  ;;  %v7085_v41 = vmax.f32 %v7067_v39, 0.0  ;;  %v9806_v61 = vpack.c.bf16 %v7710_v11, %v7709_v22  ;;  %v7933_v6 = vld [vmem:[%s12841_s7 + $0x10] sm:$0xff]  ;;  %v7934_v32 = vld [vmem:[%s12841_s7 + $0x18] sm:$0xff]  ;;  %v7936_v22 = vld [vmem:[%s12841_s7 + $0x28] sm:$0xff] }
 0x4c9   : > { %v7092_v43 = vmax.f32 %v7074_v18, 0.0  ;;  %v7075_v35 = vmul.f32 %v12637_v17, %v12573_v15  ;;  %v7076_v33 = vmul.f32 %v12637_v17, %v12575_v49  ;;  %v7799_v15 = vld [vmem:[%s12839_s5 + $0xa8] sm:$0xff]  ;;  %v7077_v26 = vmul.f32 %v12637_v17, %v12577_v23  ;;  %v7935_v11 = vld [vmem:[%s12841_s7 + $0x20] sm:$0xff] }
 0x4ca   : > { %v9810_v49 = vpack.c.bf16 %v7799_v15, %v7798_v48  ;;  %v7096_v57 = vmax.f32 %v12641_v51, 0.0  ;;  %v7079_v23 = vmul.f32 %v12637_v17, %v12581_v20  ;;  %v8477_v51 = vld [vmem:[%s12840_s6] ss:$0 sm:$0xff] }
 0x4cb   : > { %9553 = vmatpush3.msk.msra.mxu1 %vm808_vm1, %v7100_v25  ;;  %v7093_v42 = vmax.f32 %v7075_v35, 0.0  ;;  %v7094_v13 = vmax.f32 %v7076_v33, 0.0  ;;  %v7095_v53 = vmax.f32 %v7077_v26, 0.0 }
 0x4cc   : > { %9787 = vmatprep.subr.bf16.mxu1 %v9786_v7  ;;  %v7097_v4 = vmax.f32 %v7079_v23, 0.0 }
 0x4ce   : > { %9555 = vmatmul.mubr.msk.f32.vlgmr.msra.gmra.mrb[18].mxu1 %vm6938_vm10, %v7081_v40 }
 0x4cf   : > { %9789 = vmatpush3.bf16.msra.mxu1 %v9786_v7  ;;  %9563 = vmatprep.mubr.msk.f32.mxu1 %vm6938_vm10, %v7088_v46 }
 0x4d0   : > { %9561 = vmatprep.subr.msk.mxu1 %vm808_vm1, %v7280_v50 }
 0x4d3   : > { %9562 = vmatpush3.msk.msra.mxu1 %vm808_vm1, %v7280_v50 }
 0x4d4   : > { %9791 = vmatprep.subr.bf16.mxu1 %v9790_v3 }
 0x4d6   : > { %9564 = vmatmul.mubr.msk.f32.vlgmr.msra.gmra.mrb[18].mxu1 %vm6938_vm10, %v7089_v60 }
 0x4d7   : > { %9793 = vmatpush3.bf16.msra.mxu1 %v9790_v3  ;;  %9572 = vmatprep.mubr.msk.f32.mxu1 %vm6938_vm10, %v7082_v47 }
 0x4d8   : > { %9570 = vmatprep.subr.msk.mxu1 %vm808_vm1, %v7103_v55 }
 0x4db   : > { %9571 = vmatpush3.msk.msra.mxu1 %vm808_vm1, %v7103_v55 }
 0x4dc   : > { %9795 = vmatprep.subr.bf16.mxu1 %v9794_v37 }
 0x4de   : > { %9573 = vmatmul.mubr.msk.f32.vlgmr.msra.gmra.mrb[18].mxu1 %vm6938_vm10, %v7083_v1 }
 0x4df   : > { %9797 = vmatpush3.bf16.msra.mxu1 %v9794_v37  ;;  %9581 = vmatprep.mubr.msk.f32.mxu1 %vm6938_vm10, %v7090_v63 }
 0x4e0   : > { %9579 = vmatprep.subr.msk.mxu1 %vm808_vm1, %v7451_v2 }
 0x4e3   : > { %9580 = vmatpush3.msk.msra.mxu1 %vm808_vm1, %v7451_v2 }
 0x4e4   : > { %9799 = vmatprep.subr.bf16.mxu1 %v9798_v16 }
 0x4e6   : > { %9582 = vmatmul.mubr.msk.f32.vlgmr.msra.gmra.mrb[18].mxu1 %vm6938_vm10, %v7091_v45  ;;  %v7931_v45 = vld [vmem:[%s12841_s7] sm:$0xff] }
 0x4e7   : > { %9801 = vmatpush3.bf16.msra.mxu1 %v9798_v16  ;;  %9590 = vmatprep.mubr.msk.f32.mxu1 %vm6938_vm10, %v7084_v10 }
 0x4e8   : > { %9588 = vmatprep.subr.msk.mxu1 %vm808_vm1, %v7106_v21 }
 0x4eb   : > { %9589 = vmatpush3.msk.msra.mxu1 %vm808_vm1, %v7106_v21 }
 0x4ec   : > { %9803 = vmatprep.subr.bf16.mxu1 %v9802_v9 }
 0x4ee   : > { %9591 = vmatmul.mubr.msk.f32.vlgmr.msra.gmra.mrb[18].mxu1 %vm6938_vm10, %v7085_v41 }
 0x4ef   : > { %9805 = vmatpush3.bf16.msra.mxu1 %v9802_v9  ;;  %9599 = vmatprep.mubr.msk.f32.mxu1 %vm6938_vm10, %v7092_v43 }
 0x4f0   : > { %9597 = vmatprep.subr.msk.mxu1 %vm808_vm1, %v7622_v52 }
 0x4f3   : > { %9598 = vmatpush3.msk.msra.mxu1 %vm808_vm1, %v7622_v52 }
 0x4f4   : > { %9807 = vmatprep.subr.bf16.mxu1 %v9806_v61 }
 0x4f6   : > { %9600 = vmatmul.mubr.msk.f32.vlgmr.msra.gmra.mrb[18].mxu1 %vm6938_vm10, %v7093_v42 }
 0x4f7   : > { %9809 = vmatpush3.bf16.msra.mxu1 %v9806_v61  ;;  %9608 = vmatprep.mubr.msk.f32.mxu1 %vm6938_vm10, %v7094_v13  ;;  %v7938_v13 = vld [vmem:[%s12841_s7 + $0x38] sm:$0xff] }
 0x4f8   : > { %9606 = vmatprep.subr.msk.mxu1 %vm808_vm1, %v7711_v58 }
 0x4fb   : > { %9607 = vmatpush3.msk.msra.mxu1 %vm808_vm1, %v7711_v58  ;;  %v7937_v58 = vld [vmem:[%s12841_s7 + $0x30] sm:$0xff] }
 0x4fc   : > { %9811 = vmatprep.subr.bf16.mxu1 %v9810_v49 }
 0x4fe   : > { %9609 = vmatmul.mubr.msk.f32.vlgmr.msra.gmra.mrb[18].mxu1 %vm6938_vm10, %v7095_v53 }
 0x4ff   : > { %9813 = vmatpush3.bf16.msra.mxu1 %v9810_v49  ;;  %9617 = vmatprep.mubr.msk.f32.mxu1 %vm6938_vm10, %v7096_v57 }
 0x500   : > { %9615 = vmatprep.subr.msk.mxu1 %vm808_vm1, %v7800_v38 }
 0x503   : > { %9616 = vmatpush3.msk.msra.mxu1 %vm808_vm1, %v7800_v38  ;;  %v7980_v38 = vand.u32 127, %v2145_v12 }
 0x505   : > { %v7985_v23 = vadd.s32 4294967288, %v7980_v38 }
 0x506   : > { %9618 = vmatmul.mubr.msk.f32.vlgmr.msra.gmra.mrb[18].mxu1 %vm6938_vm10, %v7097_v4 }
 0x5d9   : > { %v9619_v24 = vpop.f32.mrb[18].mxu1 }
 0x5da   : > { %v7899_v14 = vadd.f32 %v9619_v24, %v8477_v51  ;;  %v7876_v25 = vpop.f32.mrb[19].mxu1  ;;  %v7988_v24 = vsub.s32 %v7985_v23, %v11363_v34 }
 0x5db   : > { %v7898_v36 = vadd.f32 %v8477_v51, %v7876_v25 }
 0x5dc   : > { %v7901_v5 = vsel %vm1663_vm5, %v7899_v14, 0.0 }
 0x5dd   : > { %v7900_v7 = vsel %vm1663_vm5, %v7898_v36, 0.0 }
 0x5de   : > { %v7902_v0 = vadd.f32 %v7901_v5, %v7900_v7 }
 0x5e0   : > { %v7903_v40 = vrot.slane %v7902_v0, 4 }
 0x5e2   : > { %v7904_v20 = vadd.f32 %v7903_v40, %v7902_v0 }
 0x5e4   : > { %v7905_v17 = vrot.slane %v7904_v20, 2 }
 0x5e6   : > { %v7906_v46 = vadd.f32 %v7905_v17, %v7904_v20 }
 0x5e8   : > { %v7907_v50 = vrot.slane %v7906_v46, 1 }
 0x5ea   : > { %v7908_v56 = vadd.f32 %v7907_v50, %v7906_v46 }
 0x5ec   : > { %v7910_v8 = vmul.f32 0.0625, %v7908_v56 }
 0x5ee   : > { %v7911_v3 = vsub.f32 %v7898_v36, %v7910_v8  ;;  %v7912_v27 = vsub.f32 %v7899_v14, %v7910_v8  ;;  %v7983_v36 = vsub.s32 %v7980_v38, %v11363_v34 }
 0x5f0   : > { %v7913_v31 = vmul.f32 %v7911_v3, %v7911_v3  ;;  %v7914_v60 = vmul.f32 %v7912_v27, %v7912_v27 }
 0x5f2   : > { %v7915_v47 = vsel %vm1663_vm5, %v7913_v31, 0.0  ;;  %v7916_v55 = vsel %vm1663_vm5, %v7914_v60, 0.0 }
 0x5f3   : > { %v7917_v62 = vadd.f32 %v7916_v55, %v7915_v47 }
 0x5f5   : > { %v7918_v59 = vrot.slane %v7917_v62, 4 }
 0x5f7   : > { %v7919_v37 = vadd.f32 %v7918_v59, %v7917_v62 }
 0x5f9   : > { %v7920_v54 = vrot.slane %v7919_v37, 2 }
 0x5fb   : > { %v7921_v44 = vadd.f32 %v7920_v54, %v7919_v37  ;;  %v8030_v37 = vld [vmem:[%s12842_s8] sm:$0xf] }
 0x5fd   : > { %v7922_v1 = vrot.slane %v7921_v44, 1 }
 0x5ff   : > { %v7923_v63 = vadd.f32 %v7922_v1, %v7921_v44 }
 0x601   : > { %v7924_v2 = vmul.f32 0.0625, %v7923_v63 }
 0x603   : > { %v7925_v30 = vadd.f32 1e-05, %v7924_v2 }
 0x605   : > { %10152 = vrsqrt.f32 %v7925_v30 }
 0x60f   : > { %v10153_v29 = vpop.eup %10152 }
 0x610   : > { %v7927_v16 = vmul.f32 %v10153_v29, %v7911_v3  ;;  %v7928_v28 = vmul.f32 %v10153_v29, %v7912_v27 }
 0x612   : > { %v7929_v10 = vmax.f32 %v7927_v16, 0.0  ;;  %v7930_v21 = vmax.f32 %v7928_v28, 0.0 }
 0x614   : > { %v7941_v9 = vmul.f32 %v7933_v6, %v7929_v10  ;;  %v7939_v39 = vmul.f32 %v7931_v45, %v7929_v10  ;;  %v7942_v43 = vmul.f32 %v7934_v32, %v7930_v21  ;;  %v7940_v52 = vmul.f32 %v7932_v19, %v7930_v21 }
 0x615   : > { %v7944_v33 = vmul.f32 %v7936_v22, %v7930_v21  ;;  %v7943_v42 = vmul.f32 %v7935_v11, %v7929_v10  ;;  %v7946_v49 = vmul.f32 %v7938_v13, %v7930_v21  ;;  %v7945_v26 = vmul.f32 %v7937_v58, %v7929_v10 }
 0x616   : > { %v7953_v18 = vsel %vm1663_vm5, %v7941_v9, 0.0  ;;  %v7947_v41 = vsel %vm1663_vm5, %v7939_v39, 0.0  ;;  %v7956_v61 = vsel %vm1663_vm5, %v7942_v43, 0.0  ;;  %v7950_v35 = vsel %vm1663_vm5, %v7940_v52, 0.0 }
 0x617   : > { %7954 = vadd.xlane.f32.xlu1 %v7953_v18  ;;  %7948 = vadd.xlane.f32.xlu0 %v7947_v41  ;;  %v7962_v48 = vsel %vm1663_vm5, %v7944_v33, 0.0  ;;  %v7959_v15 = vsel %vm1663_vm5, %v7943_v42, 0.0  ;;  %v7968_v53 = vsel %vm1663_vm5, %v7946_v49, 0.0  ;;  %v7965_v57 = vsel %vm1663_vm5, %v7945_v26, 0.0 }
 0x61b   : > { %7957 = vadd.xlane.f32.xlu1 %v7956_v61  ;;  %7951 = vadd.xlane.f32.xlu0 %v7950_v35 }
 0x61f   : > { %7963 = vadd.xlane.f32.xlu1 %v7962_v48  ;;  %7960 = vadd.xlane.f32.xlu0 %v7959_v15 }
 0x623   : > { %7969 = vadd.xlane.f32.xlu1 %v7968_v53  ;;  %7966 = vadd.xlane.f32.xlu0 %v7965_v57 }
 0x6a4   : > { %v7955_v4 = vpop.xlane.xlu1 %7954  ;;  %v7949_v51 = vpop.xlane.xlu0 %7948 }
 0x6a5   : > { %v7995_v20 = vrot.slane %v7955_v4, %v7983_v36  ;;  %v7984_v17 = vrot.slane %v7949_v51, %v7983_v36 }
 0x6a8   : > { %v7958_v14 = vpop.xlane.xlu1 %7957  ;;  %v7952_v25 = vpop.xlane.xlu0 %7951 }
 0x6a9   : > { %v7999_v5 = vrot.slane %v7958_v14, %v7988_v24  ;;  %v7989_v7 = vrot.slane %v7952_v25, %v7988_v24 }
 0x6ab   : > { %v8000_v12 = vsel %vm7990_vm11, %v7999_v5, %v7995_v20  ;;  %v7991_v56 = vsel %vm7990_vm11, %v7989_v7, %v7984_v17 }
 0x6ac   : > { %v7964_v0 = vpop.xlane.xlu1 %7963  ;;  %v7961_v40 = vpop.xlane.xlu0 %7960  ;;  %v8020_v60 = vsel %vm8019_vm12, %v8000_v12, %v7991_v56 }
 0x6ad   : > { %v8008_v46 = vrot.slane %v7964_v0, %v7988_v24  ;;  %v8004_v50 = vrot.slane %v7961_v40, %v7983_v36 }
 0x6af   : > { %v8009_v8 = vsel %vm7990_vm11, %v8008_v46, %v8004_v50 }
 0x6b0   : > { %v7970_v3 = vpop.xlane.xlu1 %7969  ;;  %v7967_v27 = vpop.xlane.xlu0 %7966  ;;  %v8022_v55 = vsel %vm8021_vm13, %v8009_v8, %v8020_v60 }
 0x6b1   : > { %v8017_v34 = vrot.slane %v7970_v3, %v7988_v24  ;;  %v8013_v31 = vrot.slane %v7967_v27, %v7983_v36 }
 0x6b3   : > { %v8018_v47 = vsel %vm7990_vm11, %v8017_v34, %v8013_v31 }
 0x6b4   : > { %v8024_v62 = vsel %vm8023_vm14, %v8018_v47, %v8022_v55 }
 0x6b5   : > { %v8027_v59 = vsel %vm8026_vm15, %v8024_v62, 0.0 }
 0x6b6   : > { %8028 = vadd.xlane.f32.xlu0 %v8027_v59 }
 0x743   : > { %v8029_v54 = vpop.xlane.xlu0 %8028 }
 0x744   : > { %v8031_v44 = vadd.f32 %v8030_v37, %v8029_v54 }
 0x746   : > { %8033 = vst.msk [vmem:[%s12843_s9] sm:$0xf] %vm8032_vm0, %v8031_v44 }
 0x747 PF: > { %s19_s30 = sadd.s32 1, %s10160_s30  }
 0x748   : > { %p16_p6 = scmp.ge.s32.totalorder %s19_s30, 6  }
 0x74a   :  { %18 = sbr.rel (!%p16_p6) target bundleno = 1 (0x1), region = 91 }

</bundles_post_ra>
